<compile_context>
chip_gen: v7x
topology: tpu7x:2x2x1
jax: 0.10.0
libtpu: 0.0.40
codegen_flags: <defaults>
</compile_context>

<pallas_src>
import math
from functools import partial

import jax
import jax.numpy as jnp
from jax.experimental import pallas as pl
from jax.experimental.pallas import tpu as pltpu

# ----------------------------- configuration -----------------------------
B = 2            # batch
C = 8            # channels (divisible by GroupNorm groups=4 and nheads)
K = 16           # number of spatial nodes (target_dim)
L = 8            # temporal length
NHEADS = 2
DH = C // NHEADS
PROJ_T = 8       # Linformer projection size k (proj_t)
ORDER = 2
SUPPORT_LEN = 3  # 2 given supports + 1 adaptive
GROUPS = 4
EPS = 1e-5
M = K * L                                 # 128, lane axis everywhere
JL = PROJ_T * L                           # 64
HJL = NHEADS * JL                         # 128
NPIECE = ORDER * SUPPORT_LEN + 1          # 7 (include_self=True)
BC = B * C                                # 16 folded sublane rows


# ------------------------------- fused kernel ---------------------------------
def fused_spatial_kernel(y_ref, itp_ref, ksup_ref, gcnw_ref, gcnb_ref,
                         wqk_ref, wv_ref, pk_ref, pv_ref, wo_ref, bo_ref,
                         ffw1_ref, ffb1_ref, ffw2_ref, ffb2_ref,
                         gng_ref, gnb_ref, gsame_ref, chk_ref,
                         lmask_ref, hsel_ref, out_ref):
    f32 = jnp.float32
    hp = jax.lax.Precision.HIGHEST
    y = y_ref[...]                       # (BC, M) f32, batch folded on sublanes
    itp = itp_ref[...]                   # (BC, M)
    gsame = gsame_ref[...]               # (BC, BC) 1 where same (batch, group)
    inv_cnt = 1.0 / ((C // GROUPS) * M)

    def group_norm(z, idx):
        # Lane-reduce first, then mix per-(batch, group) with a tiny matvec.
        gamma = gng_ref[idx]             # (BC, 1)
        beta = gnb_ref[idx]              # (BC, 1)
        s = jnp.sum(z, axis=1, keepdims=True)                         # (BC, 1)
        mu = jnp.dot(gsame, s, precision=hp,
                     preferred_element_type=f32) * inv_cnt
        d = z - mu
        ssq = jnp.sum(d * d, axis=1, keepdims=True)                   # (BC, 1)
        var = jnp.dot(gsame, ssq, precision=hp,
                      preferred_element_type=f32) * inv_cnt
        return d * (jax.lax.rsqrt(var + EPS) * gamma) + beta

    # ---------------- AdaptiveGCN (one wide propagation matmul) ----------------
    y_bf = y.astype(jnp.bfloat16)
    prop = jnp.dot(y_bf, ksup_ref[...], preferred_element_type=f32)   # (BC, 6M)
    pieces = [y] + [prop[:, p * M:(p + 1) * M]                        # 128-lane
                    for p in range(ORDER * SUPPORT_LEN)]              # aligned
    cat = jnp.concatenate(pieces, axis=0).astype(jnp.bfloat16)        # (7BC, M)
    gcn = jnp.dot(gcnw_ref[...], cat, preferred_element_type=f32) + gcnb_ref[...]
    y_local = group_norm(y + gcn, 0)

    # --------- cross Linformer attention (heads stacked along lanes) -----------
    chk = chk_ref[...]                   # (BC, HJL) head/channel mask
    lmask = lmask_ref[...]               # (M, HJL) same-timestep mask (0/-1e9)
    hsel = hsel_ref[...]                 # (NHEADS, HJL) per-head column select
    hneg = (hsel - 1.0) * 1e9            # 0 on own head's columns, -1e9 else

    qk = jnp.dot(wqk_ref[...], itp, preferred_element_type=f32)       # (2BC, M)
    q_fold = qk[0:BC, :]                                              # (BC, M)
    k_fold = qk[BC:2 * BC, :]                                         # (BC, M)
    v_fold = jnp.dot(wv_ref[...], y, preferred_element_type=f32)      # (BC, M)
    # pk already contains the 1/sqrt(dh) scale; both proj matrices are tiled
    # per head host-side so keys/vals come out directly in (BC, H*JL) form.
    keys_st = jnp.dot(k_fold, pk_ref[...], preferred_element_type=f32) * chk
    vals_st = jnp.dot(v_fold, pv_ref[...], preferred_element_type=f32) * chk

    wo = wo_ref[...]
    bo = bo_ref[...]
    attn_rows = []
    for b in range(B):                       # B=2, static unroll
        r0 = b * C
        q_tok = q_fold[r0:r0 + C, :].T                                # (M, C)
        dots = jnp.dot(q_tok, keys_st[r0:r0 + C, :],
                       preferred_element_type=f32) + lmask            # (M, HJL)
        # per-head max / sum via lane reductions + precomputed head selectors
        maxcol = 0.0
        for h in range(NHEADS):
            m_h = jnp.max(dots + hneg[h:h + 1, :], axis=1, keepdims=True)
            maxcol = maxcol + m_h * hsel[h:h + 1, :]
        e = jnp.exp(dots - maxcol)
        denom = 0.0
        for h in range(NHEADS):
            s_h = jnp.sum(e * hsel[h:h + 1, :], axis=1, keepdims=True)
            denom = denom + s_h * hsel[h:h + 1, :]
        attn = e * pl.reciprocal(denom, approx=True)                  # (M, HJL)
        vs = vals_st[r0:r0 + C, :].T                                  # (HJL, C)
        out_tok = jnp.dot(attn, vs, preferred_element_type=f32)       # (M, C)
        attn_rows.append(jnp.dot(wo, out_tok.T,
                                 preferred_element_type=f32) + bo)    # (C, M)
    attn_fold = jnp.concatenate(attn_rows, axis=0)                    # (BC, M)
    y_attn = group_norm(y + attn_fold, 1)

    # --------------- feed-forward + residual + final GroupNorm -----------------
    y2 = y_local + y_attn
    h1 = jnp.maximum(jnp.dot(ffw1_ref[...], y2, preferred_element_type=f32)
                     + ffb1_ref[...], 0.0)                            # (2BC, M)
    ff = jnp.dot(ffw2_ref[...], h1, preferred_element_type=f32) + ffb2_ref[...]
    out_ref[...] = group_norm(ff + y2, 2)                             # (BC, M)


# ---------------------------- operand preparation -----------------------------
def _prep_operands(params, support_list, nodevecs, Kv, Lv):
    nv1, nv2 = nodevecs
    adp = jax.nn.softmax(jax.nn.relu(nv1 @ nv2), axis=1)
    supports = list(support_list) + [adp]
    eyeL = jnp.eye(Lv, dtype=jnp.float32)
    eyeB = jnp.eye(B, dtype=jnp.float32)

    # propagation matrices: x(C, K*L) @ kron(A^T, I_L) applies A on K.
    mats = []
    for a in supports:
        ap = a
        for _ in range(ORDER):
            mats.append(jnp.kron(ap.T, eyeL))
            ap = ap @ a
    ksup_wide = jnp.concatenate(mats, axis=1).astype(jnp.bfloat16)    # (M, 6M)

    def bdiag(w):                                   # (o,i) -> batch block-diag
        o, i = w.shape
        return (eyeB[:, None, :, None] * w[None, :, None, :]).reshape(B * o, B * i)

    # GCN mix weight (C, 7C) -> (BC, 7*BC), column order (piece, batch, ch_in)
    w3 = params['gcn_w'].reshape(C, NPIECE, C)
    gcnw_big = (eyeB[:, None, None, :, None] *
                w3[None, :, :, None, :]).reshape(BC, NPIECE * BC).astype(jnp.bfloat16)
    gcnb_fold = jnp.tile(params['gcn_b'], (B, 1))

    wqk_big = jnp.concatenate([bdiag(params['wq']), bdiag(params['wk'])],
                              axis=0).astype(jnp.bfloat16)            # (2BC, BC)
    wv_big = bdiag(params['wv']).astype(jnp.bfloat16)                 # (BC, BC)

    # Linformer projections: kron(proj, I_L), tiled per head, scale folded in pk.
    pk_big = jnp.kron(params['pk'], eyeL) / math.sqrt(DH)             # (M, JL)
    pv_big = jnp.kron(params['pv'], eyeL)                             # (M, JL)
    pk_stacked = jnp.tile(pk_big, (1, NHEADS)).astype(jnp.bfloat16)   # (M, HJL)
    pv_stacked = jnp.tile(pv_big, (1, NHEADS)).astype(jnp.bfloat16)   # (M, HJL)

    ffw1_big = bdiag(params['ff_w1']).astype(jnp.bfloat16)            # (2BC, BC)
    ffw2_big = bdiag(params['ff_w2']).astype(jnp.bfloat16)            # (BC, 2BC)
    ffb1_fold = jnp.tile(params['ff_b1'], (B, 1))
    ffb2_fold = jnp.tile(params['ff_b2'], (B, 1))

    gn_gamma = jnp.stack([jnp.tile(params['gn1l_g'], (B, 1)),
                          jnp.tile(params['gn1a_g'], (B, 1)),
                          jnp.tile(params['gn2_g'], (B, 1))], 0)      # (3, BC, 1)
    gn_beta = jnp.stack([jnp.tile(params['gn1l_b'], (B, 1)),
                         jnp.tile(params['gn1a_b'], (B, 1)),
                         jnp.tile(params['gn2_b'], (B, 1))], 0)

    cg = C // GROUPS
    cid = jnp.arange(C)
    gsame = (cid[:, None] // cg == cid[None, :] // cg).astype(jnp.float32)
    gsame_big = bdiag(gsame)                                          # (BC, BC)

    hm = (cid[None, :] // DH == jnp.arange(NHEADS)[:, None]).astype(jnp.float32)
    chk = jnp.tile(jnp.repeat(hm.T, JL, axis=1), (B, 1))              # (BC, HJL)
    hsel = jnp.repeat(jnp.eye(NHEADS, dtype=jnp.float32), JL, axis=1)  # (H, HJL)

    tl = jnp.arange(Kv * Lv) % Lv
    ul = jnp.arange(PROJ_T * Lv) % Lv
    lmask = jnp.where(tl[:, None] == ul[None, :], 0.0, -1e9).astype(jnp.float32)
    lmask_h = jnp.tile(lmask, (1, NHEADS))                            # (M, HJL)

    return dict(ksup_wide=ksup_wide, gcnw_big=gcnw_big, gcnb_fold=gcnb_fold,
                wqk_big=wqk_big, wv_big=wv_big,
                pk_stacked=pk_stacked, pv_stacked=pv_stacked,
                wo=params['wo'].astype(jnp.bfloat16), bo=params['bo'],
                ffw1_big=ffw1_big, ffb1_fold=ffb1_fold,
                ffw2_big=ffw2_big, ffb2_fold=ffb2_fold,
                gn_gamma=gn_gamma, gn_beta=gn_beta, gsame_big=gsame_big,
                chk=chk, lmask_h=lmask_h, hsel=hsel)


# ------------------------------- forward (glue) -------------------------------
@partial(jax.jit, static_argnums=(3,))
def spatial_learning_forward(params, y, itp_y, base_shape, support_list, nodevecs):
    Bv, Cv, Kv, Lv = base_shape
    if Kv == 1:
        return y
    Mv = Kv * Lv
    ops = _prep_operands(params, support_list, nodevecs, Kv, Lv)

    y2d = y.reshape(Bv * Cv, Mv)          # fold batch into sublanes (free reshape)
    itp2d = itp_y.reshape(Bv * Cv, Mv)

    operands = [y2d, itp2d,
                ops['ksup_wide'], ops['gcnw_big'], ops['gcnb_fold'],
                ops['wqk_big'], ops['wv_big'],
                ops['pk_stacked'], ops['pv_stacked'],
                ops['wo'], ops['bo'],
                ops['ffw1_big'], ops['ffb1_fold'],
                ops['ffw2_big'], ops['ffb2_fold'],
                ops['gn_gamma'], ops['gn_beta'], ops['gsame_big'],
                ops['chk'], ops['lmask_h'], ops['hsel']]

    def full_spec(a):
        nd = a.ndim
        return pl.BlockSpec(a.shape, lambda i, _nd=nd: (0,) * _nd)

    out2d = pl.pallas_call(
        fused_spatial_kernel,
        out_shape=jax.ShapeDtypeStruct((Bv * Cv, Mv), jnp.float32),
        grid=(1,),
        in_specs=[full_spec(a) for a in operands],
        out_specs=pl.BlockSpec((Bv * Cv, Mv), lambda i: (0, 0)),
        compiler_params=pltpu.CompilerParams(dimension_semantics=("arbitrary",)),
        cost_estimate=pl.CostEstimate(flops=8_000_000, transcendentals=40_000,
                                      bytes_accessed=450_000),
    )(*operands)
    return out2d.reshape(Bv, Cv, Mv)


# ------------------------------ parameter init --------------------------------
def init_params(key):
    ks = jax.random.split(key, 20)
    u = lambda k, shape, s: jax.random.uniform(k, shape, jnp.float32, -s, s)
    p = {}
    p['gcn_w'] = jax.random.normal(ks[0], (C, NPIECE * C), jnp.float32) \
        * math.sqrt(2.0 / (NPIECE * C))
    p['gcn_b'] = 0.02 * jax.random.normal(ks[1], (C, 1), jnp.float32)
    s = 1.0 / math.sqrt(C)
    p['wq'] = u(ks[2], (C, C), s)
    p['wk'] = u(ks[3], (C, C), s)
    p['wv'] = u(ks[4], (C, C), s)
    sp = 1.0 / math.sqrt(PROJ_T)
    p['pk'] = u(ks[5], (K, PROJ_T), sp)
    p['pv'] = u(ks[6], (K, PROJ_T), sp)
    p['wo'] = u(ks[7], (C, C), s)
    p['bo'] = u(ks[8], (C, 1), s)
    p['gn1l_g'] = 1.0 + 0.1 * jax.random.normal(ks[9], (C, 1), jnp.float32)
    p['gn1l_b'] = 0.1 * jax.random.normal(ks[10], (C, 1), jnp.float32)
    p['gn1a_g'] = 1.0 + 0.1 * jax.random.normal(ks[11], (C, 1), jnp.float32)
    p['gn1a_b'] = 0.1 * jax.random.normal(ks[12], (C, 1), jnp.float32)
    p['gn2_g'] = 1.0 + 0.1 * jax.random.normal(ks[13], (C, 1), jnp.float32)
    p['gn2_b'] = 0.1 * jax.random.normal(ks[14], (C, 1), jnp.float32)
    p['ff_w1'] = u(ks[15], (2 * C, C), 1.0 / math.sqrt(C))
    p['ff_b1'] = u(ks[16], (2 * C, 1), 1.0 / math.sqrt(C))
    p['ff_w2'] = u(ks[17], (C, 2 * C), 1.0 / math.sqrt(2 * C))
    p['ff_b2'] = u(ks[18], (C, 1), 1.0 / math.sqrt(2 * C))
    return p


# ----------------------------- pure-JAX reference ------------------------------
def reference_forward(params, y, itp_y, base_shape, support_list, nodevecs):
    Bv, Cv, Kv, Lv = base_shape
    nv1, nv2 = nodevecs
    adp = jax.nn.softmax(jax.nn.relu(nv1 @ nv2), axis=1)
    supports = list(support_list) + [adp]
    # AdaptiveGCN
    x = y.reshape(Bv, Cv, Kv, Lv).transpose(0, 3, 1, 2).reshape(Bv * Lv, Cv, Kv)
    outs = [x]
    for a in supports:
        x1 = jnp.einsum('ncv,wv->ncw', x, a)
        outs.append(x1)
        for _ in range(2, ORDER + 1):
            x1 = jnp.einsum('ncv,wv->ncw', x1, a)
            outs.append(x1)
    cat = jnp.concatenate(outs, axis=1)
    gout = jnp.einsum('oc,nck->nok', params['gcn_w'], cat) + params['gcn_b'].reshape(1, Cv, 1)
    gout = gout.reshape(Bv, Lv, Cv, Kv).transpose(0, 2, 3, 1).reshape(Bv, Cv, Kv * Lv)

    def groupnorm(z, gamma, beta):
        zz = z.reshape(Bv, GROUPS, Cv // GROUPS, -1)
        mu = zz.mean(axis=(2, 3), keepdims=True)
        var = ((zz - mu) ** 2).mean(axis=(2, 3), keepdims=True)
        zn = ((zz - mu) / jnp.sqrt(var + EPS)).reshape(Bv, Cv, -1)
        return zn * gamma.reshape(1, Cv, 1) + beta.reshape(1, Cv, 1)

    y_local = groupnorm(y + gout, params['gn1l_g'], params['gn1l_b'])

    def to_bkc(t):
        return (t.reshape(Bv, Cv, Kv, Lv).transpose(0, 3, 1, 2)
                 .reshape(Bv * Lv, Cv, Kv).transpose(0, 2, 1))
    xq, xv = to_bkc(itp_y), to_bkc(y)
    q = xq @ params['wq'].T
    kk = xq @ params['wk'].T
    vv = xv @ params['wv'].T
    keys = jnp.einsum('bnd,nk->bkd', kk, params['pk'])
    vals = jnp.einsum('bnd,nk->bkd', vv, params['pv'])
    bN = Bv * Lv
    q4 = q.reshape(bN, Kv, NHEADS, DH).transpose(0, 2, 1, 3)
    k4 = keys.reshape(bN, PROJ_T, NHEADS, DH).transpose(0, 2, 1, 3)
    v4 = vals.reshape(bN, PROJ_T, NHEADS, DH).transpose(0, 2, 1, 3)
    dots = jnp.einsum('bhnd,bhkd->bhnk', q4, k4) / math.sqrt(DH)
    attn = jax.nn.softmax(dots, axis=-1)
    ao = jnp.einsum('bhnk,bhkd->bhnd', attn, v4).transpose(0, 2, 1, 3).reshape(bN, Kv, Cv)
    ao = (ao @ params['wo'].T + params['bo'].reshape(1, 1, Cv)).transpose(0, 2, 1)
    ao = ao.reshape(Bv, Lv, Cv, Kv).transpose(0, 2, 3, 1).reshape(Bv, Cv, Kv * Lv)
    y_attn = groupnorm(y + ao, params['gn1a_g'], params['gn1a_b'])

    y_in2 = y_local + y_attn
    h = jax.nn.relu(jnp.einsum('bcm,dc->bdm', y_in2, params['ff_w1'])
                    + params['ff_b1'].reshape(1, -1, 1))
    ff = jnp.einsum('bdm,cd->bcm', h, params['ff_w2']) + params['ff_b2'].reshape(1, -1, 1)
    return groupnorm(ff + y_in2, params['gn2_g'], params['gn2_b'])


# ------------------------------------ main -------------------------------------
if __name__ == "__main__":
    key = jax.random.PRNGKey(0)
    kk = jax.random.split(key, 8)
    params = init_params(kk[0])

    y = jax.random.normal(kk[1], (B, C, K * L), jnp.float32)
    itp_y = jax.random.normal(kk[2], (B, C, K * L), jnp.float32)
    A1 = jax.nn.softmax(jax.random.normal(kk[3], (K, K), jnp.float32), axis=-1)
    A2 = jax.nn.softmax(jax.random.normal(kk[4], (K, K), jnp.float32), axis=-1)
    nv1 = 0.1 * jax.random.normal(kk[5], (K, 10), jnp.float32)
    nv2 = 0.1 * jax.random.normal(kk[6], (10, K), jnp.float32)

    base_shape = (B, C, K, L)
    out = spatial_learning_forward(params, y, itp_y, base_shape, [A1, A2], (nv1, nv2))
    out = jax.block_until_ready(out)
    assert out.shape == (B, C, K * L)

    ref = reference_forward(params, y, itp_y, base_shape, [A1, A2], (nv1, nv2))
    err = float(jnp.max(jnp.abs(out - ref)))
    if not (err < 3e-2):
        raise AssertionError(f"Pallas/reference mismatch, max abs err = {err}")

    print("KERNEL_OK")
</pallas_src>

<mosaic_0001>
module attributes {stable_mosaic.version = 11 : i64} {
  func.func @fused_spatial_kernel(%arg0: i32, %arg1: memref<16x128xf32, #tpu.memory_space<vmem>>, %arg2: memref<16x128xf32, #tpu.memory_space<vmem>>, %arg3: memref<128x768xbf16, #tpu.memory_space<vmem>>, %arg4: memref<16x112xbf16, #tpu.memory_space<vmem>>, %arg5: memref<16x1xf32, #tpu.memory_space<vmem>>, %arg6: memref<32x16xbf16, #tpu.memory_space<vmem>>, %arg7: memref<16x16xbf16, #tpu.memory_space<vmem>>, %arg8: memref<128x128xbf16, #tpu.memory_space<vmem>>, %arg9: memref<128x128xbf16, #tpu.memory_space<vmem>>, %arg10: memref<8x8xbf16, #tpu.memory_space<vmem>>, %arg11: memref<8x1xf32, #tpu.memory_space<vmem>>, %arg12: memref<32x16xbf16, #tpu.memory_space<vmem>>, %arg13: memref<32x1xf32, #tpu.memory_space<vmem>>, %arg14: memref<16x32xbf16, #tpu.memory_space<vmem>>, %arg15: memref<16x1xf32, #tpu.memory_space<vmem>>, %arg16: memref<3x16x1xf32, #tpu.memory_space<vmem>>, %arg17: memref<3x16x1xf32, #tpu.memory_space<vmem>>, %arg18: memref<16x16xf32, #tpu.memory_space<vmem>>, %arg19: memref<16x128xf32, #tpu.memory_space<vmem>>, %arg20: memref<128x128xf32, #tpu.memory_space<vmem>>, %arg21: memref<2x128xf32, #tpu.memory_space<vmem>>, %arg22: memref<16x128xf32, #tpu.memory_space<vmem>>) attributes {dimension_semantics = [#tpu.dimension_semantics<arbitrary>], iteration_bounds = array<i64: 1>, scalar_prefetch = 0 : i64, scratch_operands = 0 : i64, tpu.core_type = #tpu.core_type<tc>, window_params = [{pipeline_mode = #tpu.pipeline_mode<synchronous>, transform_indices = @transform_0, window_bounds = array<i64: 16, 128>}, {pipeline_mode = #tpu.pipeline_mode<synchronous>, transform_indices = @transform_1, window_bounds = array<i64: 16, 128>}, {pipeline_mode = #tpu.pipeline_mode<synchronous>, transform_indices = @transform_2, window_bounds = array<i64: 128, 768>}, {pipeline_mode = #tpu.pipeline_mode<synchronous>, transform_indices = @transform_3, window_bounds = array<i64: 16, 112>}, {pipeline_mode = #tpu.pipeline_mode<synchronous>, transform_indices = @transform_4, window_bounds = array<i64: 16, 1>}, {pipeline_mode = #tpu.pipeline_mode<synchronous>, transform_indices = @transform_5, window_bounds = array<i64: 32, 16>}, {pipeline_mode = #tpu.pipeline_mode<synchronous>, transform_indices = @transform_6, window_bounds = array<i64: 16, 16>}, {pipeline_mode = #tpu.pipeline_mode<synchronous>, transform_indices = @transform_7, window_bounds = array<i64: 128, 128>}, {pipeline_mode = #tpu.pipeline_mode<synchronous>, transform_indices = @transform_8, window_bounds = array<i64: 128, 128>}, {pipeline_mode = #tpu.pipeline_mode<synchronous>, transform_indices = @transform_9, window_bounds = array<i64: 8, 8>}, {pipeline_mode = #tpu.pipeline_mode<synchronous>, transform_indices = @transform_10, window_bounds = array<i64: 8, 1>}, {pipeline_mode = #tpu.pipeline_mode<synchronous>, transform_indices = @transform_11, window_bounds = array<i64: 32, 16>}, {pipeline_mode = #tpu.pipeline_mode<synchronous>, transform_indices = @transform_12, window_bounds = array<i64: 32, 1>}, {pipeline_mode = #tpu.pipeline_mode<synchronous>, transform_indices = @transform_13, window_bounds = array<i64: 16, 32>}, {pipeline_mode = #tpu.pipeline_mode<synchronous>, transform_indices = @transform_14, window_bounds = array<i64: 16, 1>}, {pipeline_mode = #tpu.pipeline_mode<synchronous>, transform_indices = @transform_15, window_bounds = array<i64: 3, 16, 1>}, {pipeline_mode = #tpu.pipeline_mode<synchronous>, transform_indices = @transform_16, window_bounds = array<i64: 3, 16, 1>}, {pipeline_mode = #tpu.pipeline_mode<synchronous>, transform_indices = @transform_17, window_bounds = array<i64: 16, 16>}, {pipeline_mode = #tpu.pipeline_mode<synchronous>, transform_indices = @transform_18, window_bounds = array<i64: 16, 128>}, {pipeline_mode = #tpu.pipeline_mode<synchronous>, transform_indices = @transform_19, window_bounds = array<i64: 128, 128>}, {pipeline_mode = #tpu.pipeline_mode<synchronous>, transform_indices = @transform_20, window_bounds = array<i64: 2, 128>}, {pipeline_mode = #tpu.pipeline_mode<synchronous>, transform_indices = @transform_21, window_bounds = array<i64: 16, 128>}]} {
    %c0 = arith.constant 0 : index
    %c0_0 = arith.constant 0 : index
    %0 = vector.load %arg1[%c0, %c0_0] : memref<16x128xf32, #tpu.memory_space<vmem>>, vector<16x128xf32>
    %c0_1 = arith.constant 0 : index
    %c0_2 = arith.constant 0 : index
    %1 = vector.load %arg2[%c0_1, %c0_2] : memref<16x128xf32, #tpu.memory_space<vmem>>, vector<16x128xf32>
    %c0_3 = arith.constant 0 : index
    %c0_4 = arith.constant 0 : index
    %2 = vector.load %arg18[%c0_3, %c0_4] : memref<16x16xf32, #tpu.memory_space<vmem>>, vector<16x16xf32>
    %3 = arith.truncf %0 : vector<16x128xf32> to vector<16x128xbf16>
    %c0_5 = arith.constant 0 : index
    %c0_6 = arith.constant 0 : index
    %4 = vector.load %arg3[%c0_5, %c0_6] : memref<128x768xbf16, #tpu.memory_space<vmem>>, vector<128x768xbf16>
    %cst = arith.constant dense<0.000000e+00> : vector<16x768xf32>
    %5 = tpu.matmul %3, %4, %cst {dimension_numbers = #tpu.dot_dimension_numbers<[1], [0], [0], [1], [0, 0, 1, 1], [], []>} : vector<16x128xbf16>, vector<128x768xbf16>, vector<16x768xf32> -> vector<16x768xf32>
    %6 = vector.extract_strided_slice %5 {offsets = [0, 0], sizes = [16, 128], strides = [1, 1]} : vector<16x768xf32> to vector<16x128xf32>
    %7 = vector.extract_strided_slice %5 {offsets = [0, 128], sizes = [16, 128], strides = [1, 1]} : vector<16x768xf32> to vector<16x128xf32>
    %8 = vector.extract_strided_slice %5 {offsets = [0, 256], sizes = [16, 128], strides = [1, 1]} : vector<16x768xf32> to vector<16x128xf32>
    %9 = vector.extract_strided_slice %5 {offsets = [0, 384], sizes = [16, 128], strides = [1, 1]} : vector<16x768xf32> to vector<16x128xf32>
    %10 = vector.extract_strided_slice %5 {offsets = [0, 512], sizes = [16, 128], strides = [1, 1]} : vector<16x768xf32> to vector<16x128xf32>
    %11 = vector.extract_strided_slice %5 {offsets = [0, 640], sizes = [16, 128], strides = [1, 1]} : vector<16x768xf32> to vector<16x128xf32>
    %12 = tpu.concatenate %0, %6, %7, %8, %9, %10, %11 in 0 : vector<16x128xf32>, vector<16x128xf32>, vector<16x128xf32>, vector<16x128xf32>, vector<16x128xf32>, vector<16x128xf32>, vector<16x128xf32> -> vector<112x128xf32>
    %13 = arith.truncf %12 : vector<112x128xf32> to vector<112x128xbf16>
    %c0_7 = arith.constant 0 : index
    %c0_8 = arith.constant 0 : index
    %14 = vector.load %arg4[%c0_7, %c0_8] : memref<16x112xbf16, #tpu.memory_space<vmem>>, vector<16x112xbf16>
    %cst_9 = arith.constant dense<0.000000e+00> : vector<16x128xf32>
    %15 = tpu.matmul %14, %13, %cst_9 {dimension_numbers = #tpu.dot_dimension_numbers<[1], [0], [0], [1], [0, 0, 1, 1], [], []>} : vector<16x112xbf16>, vector<112x128xbf16>, vector<16x128xf32> -> vector<16x128xf32>
    %c0_10 = arith.constant 0 : index
    %c0_11 = arith.constant 0 : index
    %16 = vector.load %arg5[%c0_10, %c0_11] : memref<16x1xf32, #tpu.memory_space<vmem>>, vector<16x1xf32>
    %17 = vector.broadcast %16 : vector<16x1xf32> to vector<16x128xf32>
    %18 = arith.addf %15, %17 : vector<16x128xf32>
    %19 = arith.addf %0, %18 : vector<16x128xf32>
    %c0_12 = arith.constant 0 : index
    %c0_13 = arith.constant 0 : index
    %c0_14 = arith.constant 0 : index
    %20 = vector.load %arg16[%c0_12, %c0_13, %c0_14] : memref<3x16x1xf32, #tpu.memory_space<vmem>>, vector<1x16x1xf32>
    %21 = vector.shape_cast %20 : vector<1x16x1xf32> to vector<16x1xf32>
    %c0_15 = arith.constant 0 : index
    %c0_16 = arith.constant 0 : index
    %c0_17 = arith.constant 0 : index
    %22 = vector.load %arg17[%c0_15, %c0_16, %c0_17] : memref<3x16x1xf32, #tpu.memory_space<vmem>>, vector<1x16x1xf32>
    %23 = vector.shape_cast %22 : vector<1x16x1xf32> to vector<16x1xf32>
    %cst_18 = arith.constant dense<0.000000e+00> : vector<16xf32>
    %24 = vector.multi_reduction <add>, %19, %cst_18 [1] : vector<16x128xf32> to vector<16xf32>
    %25 = vector.shape_cast %24 : vector<16xf32> to vector<16x1xf32>
    %cst_19 = arith.constant dense<0.000000e+00> : vector<16x1xf32>
    %26 = tpu.matmul %2, %25, %cst_19 {dimension_numbers = #tpu.dot_dimension_numbers<[1], [0], [0], [1], [0, 0, 1, 1], [], []>, precision = #tpu.contract_precision<fp32>} : vector<16x16xf32>, vector<16x1xf32>, vector<16x1xf32> -> vector<16x1xf32>
    %cst_20 = arith.constant 3.906250e-03 : f32
    %27 = vector.broadcast %cst_20 : f32 to vector<16x1xf32>
    %28 = arith.mulf %26, %27 : vector<16x1xf32>
    %29 = vector.broadcast %28 : vector<16x1xf32> to vector<16x128xf32>
    %30 = arith.subf %19, %29 : vector<16x128xf32>
    %31 = arith.mulf %30, %30 : vector<16x128xf32>
    %cst_21 = arith.constant dense<0.000000e+00> : vector<16xf32>
    %32 = vector.multi_reduction <add>, %31, %cst_21 [1] : vector<16x128xf32> to vector<16xf32>
    %33 = vector.shape_cast %32 : vector<16xf32> to vector<16x1xf32>
    %cst_22 = arith.constant dense<0.000000e+00> : vector<16x1xf32>
    %34 = tpu.matmul %2, %33, %cst_22 {dimension_numbers = #tpu.dot_dimension_numbers<[1], [0], [0], [1], [0, 0, 1, 1], [], []>, precision = #tpu.contract_precision<fp32>} : vector<16x16xf32>, vector<16x1xf32>, vector<16x1xf32> -> vector<16x1xf32>
    %cst_23 = arith.constant 3.906250e-03 : f32
    %35 = vector.broadcast %cst_23 : f32 to vector<16x1xf32>
    %36 = arith.mulf %34, %35 : vector<16x1xf32>
    %cst_24 = arith.constant 9.99999974E-6 : f32
    %37 = vector.broadcast %cst_24 : f32 to vector<16x1xf32>
    %38 = arith.addf %36, %37 : vector<16x1xf32>
    %39 = math.rsqrt %38 : vector<16x1xf32>
    %40 = arith.mulf %39, %21 : vector<16x1xf32>
    %41 = vector.broadcast %40 : vector<16x1xf32> to vector<16x128xf32>
    %42 = arith.mulf %30, %41 : vector<16x128xf32>
    %43 = vector.broadcast %23 : vector<16x1xf32> to vector<16x128xf32>
    %44 = arith.addf %42, %43 : vector<16x128xf32>
    %c0_25 = arith.constant 0 : index
    %c0_26 = arith.constant 0 : index
    %45 = vector.load %arg19[%c0_25, %c0_26] : memref<16x128xf32, #tpu.memory_space<vmem>>, vector<16x128xf32>
    %c0_27 = arith.constant 0 : index
    %c0_28 = arith.constant 0 : index
    %46 = vector.load %arg20[%c0_27, %c0_28] : memref<128x128xf32, #tpu.memory_space<vmem>>, vector<128x128xf32>
    %c0_29 = arith.constant 0 : index
    %c0_30 = arith.constant 0 : index
    %47 = vector.load %arg21[%c0_29, %c0_30] : memref<2x128xf32, #tpu.memory_space<vmem>>, vector<2x128xf32>
    %cst_31 = arith.constant 1.000000e+00 : f32
    %48 = vector.broadcast %cst_31 : f32 to vector<2x128xf32>
    %49 = arith.subf %47, %48 : vector<2x128xf32>
    %cst_32 = arith.constant 1.000000e+09 : f32
    %50 = vector.broadcast %cst_32 : f32 to vector<2x128xf32>
    %51 = arith.mulf %49, %50 : vector<2x128xf32>
    %c0_33 = arith.constant 0 : index
    %c0_34 = arith.constant 0 : index
    %52 = vector.load %arg6[%c0_33, %c0_34] : memref<32x16xbf16, #tpu.memory_space<vmem>>, vector<32x16xbf16>
    %cst_35 = arith.constant dense<0.000000e+00> : vector<32x128xf32>
    %53 = tpu.matmul %52, %1, %cst_35 {dimension_numbers = #tpu.dot_dimension_numbers<[1], [0], [0], [1], [0, 0, 1, 1], [], []>} : vector<32x16xbf16>, vector<16x128xf32>, vector<32x128xf32> -> vector<32x128xf32>
    %54 = vector.extract_strided_slice %53 {offsets = [0, 0], sizes = [16, 128], strides = [1, 1]} : vector<32x128xf32> to vector<16x128xf32>
    %55 = vector.extract_strided_slice %53 {offsets = [16, 0], sizes = [16, 128], strides = [1, 1]} : vector<32x128xf32> to vector<16x128xf32>
    %c0_36 = arith.constant 0 : index
    %c0_37 = arith.constant 0 : index
    %56 = vector.load %arg7[%c0_36, %c0_37] : memref<16x16xbf16, #tpu.memory_space<vmem>>, vector<16x16xbf16>
    %cst_38 = arith.constant dense<0.000000e+00> : vector<16x128xf32>
    %57 = tpu.matmul %56, %0, %cst_38 {dimension_numbers = #tpu.dot_dimension_numbers<[1], [0], [0], [1], [0, 0, 1, 1], [], []>} : vector<16x16xbf16>, vector<16x128xf32>, vector<16x128xf32> -> vector<16x128xf32>
    %c0_39 = arith.constant 0 : index
    %c0_40 = arith.constant 0 : index
    %58 = vector.load %arg8[%c0_39, %c0_40] : memref<128x128xbf16, #tpu.memory_space<vmem>>, vector<128x128xbf16>
    %cst_41 = arith.constant dense<0.000000e+00> : vector<16x128xf32>
    %59 = tpu.matmul %55, %58, %cst_41 {dimension_numbers = #tpu.dot_dimension_numbers<[1], [0], [0], [1], [0, 0, 1, 1], [], []>} : vector<16x128xf32>, vector<128x128xbf16>, vector<16x128xf32> -> vector<16x128xf32>
    %60 = arith.mulf %59, %45 : vector<16x128xf32>
    %c0_42 = arith.constant 0 : index
    %c0_43 = arith.constant 0 : index
    %61 = vector.load %arg9[%c0_42, %c0_43] : memref<128x128xbf16, #tpu.memory_space<vmem>>, vector<128x128xbf16>
    %cst_44 = arith.constant dense<0.000000e+00> : vector<16x128xf32>
    %62 = tpu.matmul %57, %61, %cst_44 {dimension_numbers = #tpu.dot_dimension_numbers<[1], [0], [0], [1], [0, 0, 1, 1], [], []>} : vector<16x128xf32>, vector<128x128xbf16>, vector<16x128xf32> -> vector<16x128xf32>
    %63 = arith.mulf %62, %45 : vector<16x128xf32>
    %c0_45 = arith.constant 0 : index
    %c0_46 = arith.constant 0 : index
    %64 = vector.load %arg10[%c0_45, %c0_46] : memref<8x8xbf16, #tpu.memory_space<vmem>>, vector<8x8xbf16>
    %c0_47 = arith.constant 0 : index
    %c0_48 = arith.constant 0 : index
    %65 = vector.load %arg11[%c0_47, %c0_48] : memref<8x1xf32, #tpu.memory_space<vmem>>, vector<8x1xf32>
    %66 = vector.extract_strided_slice %54 {offsets = [0, 0], sizes = [8, 128], strides = [1, 1]} : vector<16x128xf32> to vector<8x128xf32>
    %67 = tpu.transpose %66, [1, 0] : vector<8x128xf32> -> vector<128x8xf32>
    %68 = vector.extract_strided_slice %60 {offsets = [0, 0], sizes = [8, 128], strides = [1, 1]} : vector<16x128xf32> to vector<8x128xf32>
    %cst_49 = arith.constant dense<0.000000e+00> : vector<128x128xf32>
    %69 = tpu.matmul %67, %68, %cst_49 {dimension_numbers = #tpu.dot_dimension_numbers<[1], [0], [0], [1], [0, 0, 1, 1], [], []>} : vector<128x8xf32>, vector<8x128xf32>, vector<128x128xf32> -> vector<128x128xf32>
    %70 = arith.addf %69, %46 : vector<128x128xf32>
    %71 = vector.extract_strided_slice %51 {offsets = [0, 0], sizes = [1, 128], strides = [1, 1]} : vector<2x128xf32> to vector<1x128xf32>
    %72 = vector.broadcast %71 : vector<1x128xf32> to vector<128x128xf32>
    %73 = arith.addf %70, %72 : vector<128x128xf32>
    %cst_50 = arith.constant dense<0xFF800000> : vector<128xf32>
    %74 = vector.multi_reduction <maximumf>, %73, %cst_50 [1] : vector<128x128xf32> to vector<128xf32>
    %75 = vector.shape_cast %74 : vector<128xf32> to vector<128x1xf32>
    %76 = vector.extract_strided_slice %47 {offsets = [0, 0], sizes = [1, 128], strides = [1, 1]} : vector<2x128xf32> to vector<1x128xf32>
    %77 = vector.broadcast %75 : vector<128x1xf32> to vector<128x128xf32>
    %78 = vector.broadcast %76 : vector<1x128xf32> to vector<128x128xf32>
    %79 = arith.mulf %77, %78 : vector<128x128xf32>
    %cst_51 = arith.constant 0.000000e+00 : f32
    %80 = vector.broadcast %cst_51 : f32 to vector<128x128xf32>
    %81 = arith.addf %80, %79 : vector<128x128xf32>
    %82 = vector.extract_strided_slice %51 {offsets = [1, 0], sizes = [1, 128], strides = [1, 1]} : vector<2x128xf32> to vector<1x128xf32>
    %83 = vector.broadcast %82 : vector<1x128xf32> to vector<128x128xf32>
    %84 = arith.addf %70, %83 : vector<128x128xf32>
    %cst_52 = arith.constant dense<0xFF800000> : vector<128xf32>
    %85 = vector.multi_reduction <maximumf>, %84, %cst_52 [1] : vector<128x128xf32> to vector<128xf32>
    %86 = vector.shape_cast %85 : vector<128xf32> to vector<128x1xf32>
    %87 = vector.extract_strided_slice %47 {offsets = [1, 0], sizes = [1, 128], strides = [1, 1]} : vector<2x128xf32> to vector<1x128xf32>
    %88 = vector.broadcast %86 : vector<128x1xf32> to vector<128x128xf32>
    %89 = vector.broadcast %87 : vector<1x128xf32> to vector<128x128xf32>
    %90 = arith.mulf %88, %89 : vector<128x128xf32>
    %91 = arith.addf %81, %90 : vector<128x128xf32>
    %92 = arith.subf %70, %91 : vector<128x128xf32>
    %93 = math.exp %92 : vector<128x128xf32>
    %94 = vector.extract_strided_slice %47 {offsets = [0, 0], sizes = [1, 128], strides = [1, 1]} : vector<2x128xf32> to vector<1x128xf32>
    %95 = vector.broadcast %94 : vector<1x128xf32> to vector<128x128xf32>
    %96 = arith.mulf %93, %95 : vector<128x128xf32>
    %cst_53 = arith.constant dense<0.000000e+00> : vector<128xf32>
    %97 = vector.multi_reduction <add>, %96, %cst_53 [1] : vector<128x128xf32> to vector<128xf32>
    %98 = vector.shape_cast %97 : vector<128xf32> to vector<128x1xf32>
    %99 = vector.extract_strided_slice %47 {offsets = [0, 0], sizes = [1, 128], strides = [1, 1]} : vector<2x128xf32> to vector<1x128xf32>
    %100 = vector.broadcast %98 : vector<128x1xf32> to vector<128x128xf32>
    %101 = vector.broadcast %99 : vector<1x128xf32> to vector<128x128xf32>
    %102 = arith.mulf %100, %101 : vector<128x128xf32>
    %cst_54 = arith.constant 0.000000e+00 : f32
    %103 = vector.broadcast %cst_54 : f32 to vector<128x128xf32>
    %104 = arith.addf %103, %102 : vector<128x128xf32>
    %105 = vector.extract_strided_slice %47 {offsets = [1, 0], sizes = [1, 128], strides = [1, 1]} : vector<2x128xf32> to vector<1x128xf32>
    %106 = vector.broadcast %105 : vector<1x128xf32> to vector<128x128xf32>
    %107 = arith.mulf %93, %106 : vector<128x128xf32>
    %cst_55 = arith.constant dense<0.000000e+00> : vector<128xf32>
    %108 = vector.multi_reduction <add>, %107, %cst_55 [1] : vector<128x128xf32> to vector<128xf32>
    %109 = vector.shape_cast %108 : vector<128xf32> to vector<128x1xf32>
    %110 = vector.extract_strided_slice %47 {offsets = [1, 0], sizes = [1, 128], strides = [1, 1]} : vector<2x128xf32> to vector<1x128xf32>
    %111 = vector.broadcast %109 : vector<128x1xf32> to vector<128x128xf32>
    %112 = vector.broadcast %110 : vector<1x128xf32> to vector<128x128xf32>
    %113 = arith.mulf %111, %112 : vector<128x128xf32>
    %114 = arith.addf %104, %113 : vector<128x128xf32>
    %115 = tpu.reciprocal %114 {approx = true} : vector<128x128xf32> -> vector<128x128xf32>
    %116 = arith.mulf %93, %115 : vector<128x128xf32>
    %117 = vector.extract_strided_slice %63 {offsets = [0, 0], sizes = [8, 128], strides = [1, 1]} : vector<16x128xf32> to vector<8x128xf32>
    %118 = tpu.transpose %117, [1, 0] : vector<8x128xf32> -> vector<128x8xf32>
    %cst_56 = arith.constant dense<0.000000e+00> : vector<128x8xf32>
    %119 = tpu.matmul %116, %118, %cst_56 {dimension_numbers = #tpu.dot_dimension_numbers<[1], [0], [0], [1], [0, 0, 1, 1], [], []>} : vector<128x128xf32>, vector<128x8xf32>, vector<128x8xf32> -> vector<128x8xf32>
    %120 = tpu.transpose %119, [1, 0] : vector<128x8xf32> -> vector<8x128xf32>
    %cst_57 = arith.constant dense<0.000000e+00> : vector<8x128xf32>
    %121 = tpu.matmul %64, %120, %cst_57 {dimension_numbers = #tpu.dot_dimension_numbers<[1], [0], [0], [1], [0, 0, 1, 1], [], []>} : vector<8x8xbf16>, vector<8x128xf32>, vector<8x128xf32> -> vector<8x128xf32>
    %122 = vector.broadcast %65 : vector<8x1xf32> to vector<8x128xf32>
    %123 = arith.addf %121, %122 : vector<8x128xf32>
    %124 = vector.extract_strided_slice %54 {offsets = [8, 0], sizes = [8, 128], strides = [1, 1]} : vector<16x128xf32> to vector<8x128xf32>
    %125 = tpu.transpose %124, [1, 0] : vector<8x128xf32> -> vector<128x8xf32>
    %126 = vector.extract_strided_slice %60 {offsets = [8, 0], sizes = [8, 128], strides = [1, 1]} : vector<16x128xf32> to vector<8x128xf32>
    %cst_58 = arith.constant dense<0.000000e+00> : vector<128x128xf32>
    %127 = tpu.matmul %125, %126, %cst_58 {dimension_numbers = #tpu.dot_dimension_numbers<[1], [0], [0], [1], [0, 0, 1, 1], [], []>} : vector<128x8xf32>, vector<8x128xf32>, vector<128x128xf32> -> vector<128x128xf32>
    %128 = arith.addf %127, %46 : vector<128x128xf32>
    %129 = vector.extract_strided_slice %51 {offsets = [0, 0], sizes = [1, 128], strides = [1, 1]} : vector<2x128xf32> to vector<1x128xf32>
    %130 = vector.broadcast %129 : vector<1x128xf32> to vector<128x128xf32>
    %131 = arith.addf %128, %130 : vector<128x128xf32>
    %cst_59 = arith.constant dense<0xFF800000> : vector<128xf32>
    %132 = vector.multi_reduction <maximumf>, %131, %cst_59 [1] : vector<128x128xf32> to vector<128xf32>
    %133 = vector.shape_cast %132 : vector<128xf32> to vector<128x1xf32>
    %134 = vector.extract_strided_slice %47 {offsets = [0, 0], sizes = [1, 128], strides = [1, 1]} : vector<2x128xf32> to vector<1x128xf32>
    %135 = vector.broadcast %133 : vector<128x1xf32> to vector<128x128xf32>
    %136 = vector.broadcast %134 : vector<1x128xf32> to vector<128x128xf32>
    %137 = arith.mulf %135, %136 : vector<128x128xf32>
    %cst_60 = arith.constant 0.000000e+00 : f32
    %138 = vector.broadcast %cst_60 : f32 to vector<128x128xf32>
    %139 = arith.addf %138, %137 : vector<128x128xf32>
    %140 = vector.extract_strided_slice %51 {offsets = [1, 0], sizes = [1, 128], strides = [1, 1]} : vector<2x128xf32> to vector<1x128xf32>
    %141 = vector.broadcast %140 : vector<1x128xf32> to vector<128x128xf32>
    %142 = arith.addf %128, %141 : vector<128x128xf32>
    %cst_61 = arith.constant dense<0xFF800000> : vector<128xf32>
    %143 = vector.multi_reduction <maximumf>, %142, %cst_61 [1] : vector<128x128xf32> to vector<128xf32>
    %144 = vector.shape_cast %143 : vector<128xf32> to vector<128x1xf32>
    %145 = vector.extract_strided_slice %47 {offsets = [1, 0], sizes = [1, 128], strides = [1, 1]} : vector<2x128xf32> to vector<1x128xf32>
    %146 = vector.broadcast %144 : vector<128x1xf32> to vector<128x128xf32>
    %147 = vector.broadcast %145 : vector<1x128xf32> to vector<128x128xf32>
    %148 = arith.mulf %146, %147 : vector<128x128xf32>
    %149 = arith.addf %139, %148 : vector<128x128xf32>
    %150 = arith.subf %128, %149 : vector<128x128xf32>
    %151 = math.exp %150 : vector<128x128xf32>
    %152 = vector.extract_strided_slice %47 {offsets = [0, 0], sizes = [1, 128], strides = [1, 1]} : vector<2x128xf32> to vector<1x128xf32>
    %153 = vector.broadcast %152 : vector<1x128xf32> to vector<128x128xf32>
    %154 = arith.mulf %151, %153 : vector<128x128xf32>
    %cst_62 = arith.constant dense<0.000000e+00> : vector<128xf32>
    %155 = vector.multi_reduction <add>, %154, %cst_62 [1] : vector<128x128xf32> to vector<128xf32>
    %156 = vector.shape_cast %155 : vector<128xf32> to vector<128x1xf32>
    %157 = vector.extract_strided_slice %47 {offsets = [0, 0], sizes = [1, 128], strides = [1, 1]} : vector<2x128xf32> to vector<1x128xf32>
    %158 = vector.broadcast %156 : vector<128x1xf32> to vector<128x128xf32>
    %159 = vector.broadcast %157 : vector<1x128xf32> to vector<128x128xf32>
    %160 = arith.mulf %158, %159 : vector<128x128xf32>
    %cst_63 = arith.constant 0.000000e+00 : f32
    %161 = vector.broadcast %cst_63 : f32 to vector<128x128xf32>
    %162 = arith.addf %161, %160 : vector<128x128xf32>
    %163 = vector.extract_strided_slice %47 {offsets = [1, 0], sizes = [1, 128], strides = [1, 1]} : vector<2x128xf32> to vector<1x128xf32>
    %164 = vector.broadcast %163 : vector<1x128xf32> to vector<128x128xf32>
    %165 = arith.mulf %151, %164 : vector<128x128xf32>
    %cst_64 = arith.constant dense<0.000000e+00> : vector<128xf32>
    %166 = vector.multi_reduction <add>, %165, %cst_64 [1] : vector<128x128xf32> to vector<128xf32>
    %167 = vector.shape_cast %166 : vector<128xf32> to vector<128x1xf32>
    %168 = vector.extract_strided_slice %47 {offsets = [1, 0], sizes = [1, 128], strides = [1, 1]} : vector<2x128xf32> to vector<1x128xf32>
    %169 = vector.broadcast %167 : vector<128x1xf32> to vector<128x128xf32>
    %170 = vector.broadcast %168 : vector<1x128xf32> to vector<128x128xf32>
    %171 = arith.mulf %169, %170 : vector<128x128xf32>
    %172 = arith.addf %162, %171 : vector<128x128xf32>
    %173 = tpu.reciprocal %172 {approx = true} : vector<128x128xf32> -> vector<128x128xf32>
    %174 = arith.mulf %151, %173 : vector<128x128xf32>
    %175 = vector.extract_strided_slice %63 {offsets = [8, 0], sizes = [8, 128], strides = [1, 1]} : vector<16x128xf32> to vector<8x128xf32>
    %176 = tpu.transpose %175, [1, 0] : vector<8x128xf32> -> vector<128x8xf32>
    %cst_65 = arith.constant dense<0.000000e+00> : vector<128x8xf32>
    %177 = tpu.matmul %174, %176, %cst_65 {dimension_numbers = #tpu.dot_dimension_numbers<[1], [0], [0], [1], [0, 0, 1, 1], [], []>} : vector<128x128xf32>, vector<128x8xf32>, vector<128x8xf32> -> vector<128x8xf32>
    %178 = tpu.transpose %177, [1, 0] : vector<128x8xf32> -> vector<8x128xf32>
    %cst_66 = arith.constant dense<0.000000e+00> : vector<8x128xf32>
    %179 = tpu.matmul %64, %178, %cst_66 {dimension_numbers = #tpu.dot_dimension_numbers<[1], [0], [0], [1], [0, 0, 1, 1], [], []>} : vector<8x8xbf16>, vector<8x128xf32>, vector<8x128xf32> -> vector<8x128xf32>
    %180 = vector.broadcast %65 : vector<8x1xf32> to vector<8x128xf32>
    %181 = arith.addf %179, %180 : vector<8x128xf32>
    %182 = tpu.concatenate %123, %181 in 0 : vector<8x128xf32>, vector<8x128xf32> -> vector<16x128xf32>
    %183 = arith.addf %0, %182 : vector<16x128xf32>
    %c1 = arith.constant 1 : index
    %c0_67 = arith.constant 0 : index
    %c0_68 = arith.constant 0 : index
    %184 = vector.load %arg16[%c1, %c0_67, %c0_68] : memref<3x16x1xf32, #tpu.memory_space<vmem>>, vector<1x16x1xf32>
    %185 = vector.shape_cast %184 : vector<1x16x1xf32> to vector<16x1xf32>
    %c1_69 = arith.constant 1 : index
    %c0_70 = arith.constant 0 : index
    %c0_71 = arith.constant 0 : index
    %186 = vector.load %arg17[%c1_69, %c0_70, %c0_71] : memref<3x16x1xf32, #tpu.memory_space<vmem>>, vector<1x16x1xf32>
    %187 = vector.shape_cast %186 : vector<1x16x1xf32> to vector<16x1xf32>
    %cst_72 = arith.constant dense<0.000000e+00> : vector<16xf32>
    %188 = vector.multi_reduction <add>, %183, %cst_72 [1] : vector<16x128xf32> to vector<16xf32>
    %189 = vector.shape_cast %188 : vector<16xf32> to vector<16x1xf32>
    %cst_73 = arith.constant dense<0.000000e+00> : vector<16x1xf32>
    %190 = tpu.matmul %2, %189, %cst_73 {dimension_numbers = #tpu.dot_dimension_numbers<[1], [0], [0], [1], [0, 0, 1, 1], [], []>, precision = #tpu.contract_precision<fp32>} : vector<16x16xf32>, vector<16x1xf32>, vector<16x1xf32> -> vector<16x1xf32>
    %cst_74 = arith.constant 3.906250e-03 : f32
    %191 = vector.broadcast %cst_74 : f32 to vector<16x1xf32>
    %192 = arith.mulf %190, %191 : vector<16x1xf32>
    %193 = vector.broadcast %192 : vector<16x1xf32> to vector<16x128xf32>
    %194 = arith.subf %183, %193 : vector<16x128xf32>
    %195 = arith.mulf %194, %194 : vector<16x128xf32>
    %cst_75 = arith.constant dense<0.000000e+00> : vector<16xf32>
    %196 = vector.multi_reduction <add>, %195, %cst_75 [1] : vector<16x128xf32> to vector<16xf32>
    %197 = vector.shape_cast %196 : vector<16xf32> to vector<16x1xf32>
    %cst_76 = arith.constant dense<0.000000e+00> : vector<16x1xf32>
    %198 = tpu.matmul %2, %197, %cst_76 {dimension_numbers = #tpu.dot_dimension_numbers<[1], [0], [0], [1], [0, 0, 1, 1], [], []>, precision = #tpu.contract_precision<fp32>} : vector<16x16xf32>, vector<16x1xf32>, vector<16x1xf32> -> vector<16x1xf32>
    %cst_77 = arith.constant 3.906250e-03 : f32
    %199 = vector.broadcast %cst_77 : f32 to vector<16x1xf32>
    %200 = arith.mulf %198, %199 : vector<16x1xf32>
    %cst_78 = arith.constant 9.99999974E-6 : f32
    %201 = vector.broadcast %cst_78 : f32 to vector<16x1xf32>
    %202 = arith.addf %200, %201 : vector<16x1xf32>
    %203 = math.rsqrt %202 : vector<16x1xf32>
    %204 = arith.mulf %203, %185 : vector<16x1xf32>
    %205 = vector.broadcast %204 : vector<16x1xf32> to vector<16x128xf32>
    %206 = arith.mulf %194, %205 : vector<16x128xf32>
    %207 = vector.broadcast %187 : vector<16x1xf32> to vector<16x128xf32>
    %208 = arith.addf %206, %207 : vector<16x128xf32>
    %209 = arith.addf %44, %208 : vector<16x128xf32>
    %c0_79 = arith.constant 0 : index
    %c0_80 = arith.constant 0 : index
    %210 = vector.load %arg12[%c0_79, %c0_80] : memref<32x16xbf16, #tpu.memory_space<vmem>>, vector<32x16xbf16>
    %cst_81 = arith.constant dense<0.000000e+00> : vector<32x128xf32>
    %211 = tpu.matmul %210, %209, %cst_81 {dimension_numbers = #tpu.dot_dimension_numbers<[1], [0], [0], [1], [0, 0, 1, 1], [], []>} : vector<32x16xbf16>, vector<16x128xf32>, vector<32x128xf32> -> vector<32x128xf32>
    %c0_82 = arith.constant 0 : index
    %c0_83 = arith.constant 0 : index
    %212 = vector.load %arg13[%c0_82, %c0_83] : memref<32x1xf32, #tpu.memory_space<vmem>>, vector<32x1xf32>
    %213 = vector.broadcast %212 : vector<32x1xf32> to vector<32x128xf32>
    %214 = arith.addf %211, %213 : vector<32x128xf32>
    %cst_84 = arith.constant 0.000000e+00 : f32
    %215 = vector.broadcast %cst_84 : f32 to vector<32x128xf32>
    %216 = arith.maximumf %214, %215 : vector<32x128xf32>
    %c0_85 = arith.constant 0 : index
    %c0_86 = arith.constant 0 : index
    %217 = vector.load %arg14[%c0_85, %c0_86] : memref<16x32xbf16, #tpu.memory_space<vmem>>, vector<16x32xbf16>
    %cst_87 = arith.constant dense<0.000000e+00> : vector<16x128xf32>
    %218 = tpu.matmul %217, %216, %cst_87 {dimension_numbers = #tpu.dot_dimension_numbers<[1], [0], [0], [1], [0, 0, 1, 1], [], []>} : vector<16x32xbf16>, vector<32x128xf32>, vector<16x128xf32> -> vector<16x128xf32>
    %c0_88 = arith.constant 0 : index
    %c0_89 = arith.constant 0 : index
    %219 = vector.load %arg15[%c0_88, %c0_89] : memref<16x1xf32, #tpu.memory_space<vmem>>, vector<16x1xf32>
    %220 = vector.broadcast %219 : vector<16x1xf32> to vector<16x128xf32>
    %221 = arith.addf %218, %220 : vector<16x128xf32>
    %222 = arith.addf %221, %209 : vector<16x128xf32>
    %c2 = arith.constant 2 : index
    %c0_90 = arith.constant 0 : index
    %c0_91 = arith.constant 0 : index
    %223 = vector.load %arg16[%c2, %c0_90, %c0_91] : memref<3x16x1xf32, #tpu.memory_space<vmem>>, vector<1x16x1xf32>
    %224 = vector.shape_cast %223 : vector<1x16x1xf32> to vector<16x1xf32>
    %c2_92 = arith.constant 2 : index
    %c0_93 = arith.constant 0 : index
    %c0_94 = arith.constant 0 : index
    %225 = vector.load %arg17[%c2_92, %c0_93, %c0_94] : memref<3x16x1xf32, #tpu.memory_space<vmem>>, vector<1x16x1xf32>
    %226 = vector.shape_cast %225 : vector<1x16x1xf32> to vector<16x1xf32>
    %cst_95 = arith.constant dense<0.000000e+00> : vector<16xf32>
    %227 = vector.multi_reduction <add>, %222, %cst_95 [1] : vector<16x128xf32> to vector<16xf32>
    %228 = vector.shape_cast %227 : vector<16xf32> to vector<16x1xf32>
    %cst_96 = arith.constant dense<0.000000e+00> : vector<16x1xf32>
    %229 = tpu.matmul %2, %228, %cst_96 {dimension_numbers = #tpu.dot_dimension_numbers<[1], [0], [0], [1], [0, 0, 1, 1], [], []>, precision = #tpu.contract_precision<fp32>} : vector<16x16xf32>, vector<16x1xf32>, vector<16x1xf32> -> vector<16x1xf32>
    %cst_97 = arith.constant 3.906250e-03 : f32
    %230 = vector.broadcast %cst_97 : f32 to vector<16x1xf32>
    %231 = arith.mulf %229, %230 : vector<16x1xf32>
    %232 = vector.broadcast %231 : vector<16x1xf32> to vector<16x128xf32>
    %233 = arith.subf %222, %232 : vector<16x128xf32>
    %234 = arith.mulf %233, %233 : vector<16x128xf32>
    %cst_98 = arith.constant dense<0.000000e+00> : vector<16xf32>
    %235 = vector.multi_reduction <add>, %234, %cst_98 [1] : vector<16x128xf32> to vector<16xf32>
    %236 = vector.shape_cast %235 : vector<16xf32> to vector<16x1xf32>
    %cst_99 = arith.constant dense<0.000000e+00> : vector<16x1xf32>
    %237 = tpu.matmul %2, %236, %cst_99 {dimension_numbers = #tpu.dot_dimension_numbers<[1], [0], [0], [1], [0, 0, 1, 1], [], []>, precision = #tpu.contract_precision<fp32>} : vector<16x16xf32>, vector<16x1xf32>, vector<16x1xf32> -> vector<16x1xf32>
    %cst_100 = arith.constant 3.906250e-03 : f32
    %238 = vector.broadcast %cst_100 : f32 to vector<16x1xf32>
    %239 = arith.mulf %237, %238 : vector<16x1xf32>
    %cst_101 = arith.constant 9.99999974E-6 : f32
    %240 = vector.broadcast %cst_101 : f32 to vector<16x1xf32>
    %241 = arith.addf %239, %240 : vector<16x1xf32>
    %242 = math.rsqrt %241 : vector<16x1xf32>
    %243 = arith.mulf %242, %224 : vector<16x1xf32>
    %244 = vector.broadcast %243 : vector<16x1xf32> to vector<16x128xf32>
    %245 = arith.mulf %233, %244 : vector<16x128xf32>
    %246 = vector.broadcast %226 : vector<16x1xf32> to vector<16x128xf32>
    %247 = arith.addf %245, %246 : vector<16x128xf32>
    %c0_102 = arith.constant 0 : index
    %c0_103 = arith.constant 0 : index
    %248 = vector.load %arg22[%c0_102, %c0_103] : memref<16x128xf32, #tpu.memory_space<vmem>>, vector<16x128xf32>
    tpu.vector_store %arg22[%c0_102, %c0_103], %247 {strides = array<i32>} : memref<16x128xf32, #tpu.memory_space<vmem>>, vector<16x128xf32>,
    return
  }
  func.func @transform_0(%arg0: i32) -> (i32, i32) {
    %c0_i32 = arith.constant 0 : i32
    %c0_i32_0 = arith.constant 0 : i32
    %c0_i32_1 = arith.constant 0 : i32
    return %c0_i32, %c0_i32_0 : i32, i32
  }
  func.func @transform_1(%arg0: i32) -> (i32, i32) {
    %c0_i32 = arith.constant 0 : i32
    %c0_i32_0 = arith.constant 0 : i32
    %c0_i32_1 = arith.constant 0 : i32
    return %c0_i32, %c0_i32_0 : i32, i32
  }
  func.func @transform_2(%arg0: i32) -> (i32, i32) {
    %c0_i32 = arith.constant 0 : i32
    %c0_i32_0 = arith.constant 0 : i32
    %c0_i32_1 = arith.constant 0 : i32
    return %c0_i32, %c0_i32_0 : i32, i32
  }
  func.func @transform_3(%arg0: i32) -> (i32, i32) {
    %c0_i32 = arith.constant 0 : i32
    %c0_i32_0 = arith.constant 0 : i32
    %c0_i32_1 = arith.constant 0 : i32
    return %c0_i32, %c0_i32_0 : i32, i32
  }
  func.func @transform_4(%arg0: i32) -> (i32, i32) {
    %c0_i32 = arith.constant 0 : i32
    %c0_i32_0 = arith.constant 0 : i32
    %c0_i32_1 = arith.constant 0 : i32
    return %c0_i32, %c0_i32_0 : i32, i32
  }
  func.func @transform_5(%arg0: i32) -> (i32, i32) {
    %c0_i32 = arith.constant 0 : i32
    %c0_i32_0 = arith.constant 0 : i32
    %c0_i32_1 = arith.constant 0 : i32
    return %c0_i32, %c0_i32_0 : i32, i32
  }
  func.func @transform_6(%arg0: i32) -> (i32, i32) {
    %c0_i32 = arith.constant 0 : i32
    %c0_i32_0 = arith.constant 0 : i32
    %c0_i32_1 = arith.constant 0 : i32
    return %c0_i32, %c0_i32_0 : i32, i32
  }
  func.func @transform_7(%arg0: i32) -> (i32, i32) {
    %c0_i32 = arith.constant 0 : i32
    %c0_i32_0 = arith.constant 0 : i32
    %c0_i32_1 = arith.constant 0 : i32
    return %c0_i32, %c0_i32_0 : i32, i32
  }
  func.func @transform_8(%arg0: i32) -> (i32, i32) {
    %c0_i32 = arith.constant 0 : i32
    %c0_i32_0 = arith.constant 0 : i32
    %c0_i32_1 = arith.constant 0 : i32
    return %c0_i32, %c0_i32_0 : i32, i32
  }
  func.func @transform_9(%arg0: i32) -> (i32, i32) {
    %c0_i32 = arith.constant 0 : i32
    %c0_i32_0 = arith.constant 0 : i32
    %c0_i32_1 = arith.constant 0 : i32
    return %c0_i32, %c0_i32_0 : i32, i32
  }
  func.func @transform_10(%arg0: i32) -> (i32, i32) {
    %c0_i32 = arith.constant 0 : i32
    %c0_i32_0 = arith.constant 0 : i32
    %c0_i32_1 = arith.constant 0 : i32
    return %c0_i32, %c0_i32_0 : i32, i32
  }
  func.func @transform_11(%arg0: i32) -> (i32, i32) {
    %c0_i32 = arith.constant 0 : i32
    %c0_i32_0 = arith.constant 0 : i32
    %c0_i32_1 = arith.constant 0 : i32
    return %c0_i32, %c0_i32_0 : i32, i32
  }
  func.func @transform_12(%arg0: i32) -> (i32, i32) {
    %c0_i32 = arith.constant 0 : i32
    %c0_i32_0 = arith.constant 0 : i32
    %c0_i32_1 = arith.constant 0 : i32
    return %c0_i32, %c0_i32_0 : i32, i32
  }
  func.func @transform_13(%arg0: i32) -> (i32, i32) {
    %c0_i32 = arith.constant 0 : i32
    %c0_i32_0 = arith.constant 0 : i32
    %c0_i32_1 = arith.constant 0 : i32
    return %c0_i32, %c0_i32_0 : i32, i32
  }
  func.func @transform_14(%arg0: i32) -> (i32, i32) {
    %c0_i32 = arith.constant 0 : i32
    %c0_i32_0 = arith.constant 0 : i32
    %c0_i32_1 = arith.constant 0 : i32
    return %c0_i32, %c0_i32_0 : i32, i32
  }
  func.func @transform_15(%arg0: i32) -> (i32, i32, i32) {
    %c0_i32 = arith.constant 0 : i32
    %c0_i32_0 = arith.constant 0 : i32
    %c0_i32_1 = arith.constant 0 : i32
    %c0_i32_2 = arith.constant 0 : i32
    return %c0_i32, %c0_i32_0, %c0_i32_1 : i32, i32, i32
  }
  func.func @transform_16(%arg0: i32) -> (i32, i32, i32) {
    %c0_i32 = arith.constant 0 : i32
    %c0_i32_0 = arith.constant 0 : i32
    %c0_i32_1 = arith.constant 0 : i32
    %c0_i32_2 = arith.constant 0 : i32
    return %c0_i32, %c0_i32_0, %c0_i32_1 : i32, i32, i32
  }
  func.func @transform_17(%arg0: i32) -> (i32, i32) {
    %c0_i32 = arith.constant 0 : i32
    %c0_i32_0 = arith.constant 0 : i32
    %c0_i32_1 = arith.constant 0 : i32
    return %c0_i32, %c0_i32_0 : i32, i32
  }
  func.func @transform_18(%arg0: i32) -> (i32, i32) {
    %c0_i32 = arith.constant 0 : i32
    %c0_i32_0 = arith.constant 0 : i32
    %c0_i32_1 = arith.constant 0 : i32
    return %c0_i32, %c0_i32_0 : i32, i32
  }
  func.func @transform_19(%arg0: i32) -> (i32, i32) {
    %c0_i32 = arith.constant 0 : i32
    %c0_i32_0 = arith.constant 0 : i32
    %c0_i32_1 = arith.constant 0 : i32
    return %c0_i32, %c0_i32_0 : i32, i32
  }
  func.func @transform_20(%arg0: i32) -> (i32, i32) {
    %c0_i32 = arith.constant 0 : i32
    %c0_i32_0 = arith.constant 0 : i32
    %c0_i32_1 = arith.constant 0 : i32
    return %c0_i32, %c0_i32_0 : i32, i32
  }
  func.func @transform_21(%arg0: i32) -> (i32, i32) {
    %c0_i32 = arith.constant 0 : i32
    %c0_i32_0 = arith.constant 0 : i32
    %c0_i32_1 = arith.constant 0 : i32
    return %c0_i32, %c0_i32_0 : i32, i32
  }
}

</mosaic_0001>

<bundles_post_ra>
// kernel: mul.81
= control target key start
LH: loop header
LB: loop body
LE: loop exit
PB: predicated region body
PF: predicated region fallthrough
CT: control target
= control target key end

     0   :  { %vm3_vm0 = vcmask 64512   ;;  %s73_s8 = smov 120   ;;  %s74_s13 = smov 96   ;;  %s147_s0 = inlined_call_operand.vmem [shape: f32[8,56], index: 0, kind: input, shape index: {}]   ;;  %s148_s1 = inlined_call_operand.vmem [shape: f32[8,7,8], index: 1, kind: output, shape index: {}]  }
   0x1   :  { %v22_v0 = vld [vmem:[%s147_s0] sm:$0xff]   ;;  %s72_s0 = smov 104   ;;  %s75_s14 = smov 112  }
   0x2   :  { %23 = vrot.lane.b32.xlu1 %v22_v0, %s72_s0  ;;  %7 = vrot.lane.b32.xlu0 %v22_v0, %s73_s8  ;;  %4 = vst.msk [vmem:[%s148_s1] ss:$8 sm:$0xf] %vm3_vm0, %v22_v0   ;;  %5 = vst.msk [vmem:[%s148_s1] ss:$8 sm:$0xf0] %vm3_vm0, %v22_v0  }
   0x3   :  { %s76_s15 = smov 80   ;;  %s77_s16 = smov 88  }
   0x6   :  { %31 = vrot.lane.b32.xlu1 %v22_v0, %s74_s13  ;;  %15 = vrot.lane.b32.xlu0 %v22_v0, %s75_s14 }
   0xa   :  { %47 = vrot.lane.b32.xlu1 %v22_v0, %s76_s15  ;;  %39 = vrot.lane.b32.xlu0 %v22_v0, %s77_s16 }
  0x74   :  { %v24_v1 = vpop.permute.xlu1 %23   ;;  %v8_v2 = vpop.permute.xlu0 %7  }
  0x75   :  { %58 = vst.msk [vmem:[%s148_s1 + $0x3] ss:$8 sm:$0xf] %vm3_vm0, %v24_v1   ;;  %59 = vst.msk [vmem:[%s148_s1 + $0x3] ss:$8 sm:$0xf0] %vm3_vm0, %v24_v1  }
  0x76   :  { %54 = vst.msk [vmem:[%s148_s1 + $0x1] ss:$8 sm:$0xf] %vm3_vm0, %v8_v2   ;;  %55 = vst.msk [vmem:[%s148_s1 + $0x1] ss:$8 sm:$0xf0] %vm3_vm0, %v8_v2  }
  0x78   :  { %v32_v3 = vpop.permute.xlu1 %31   ;;  %v16_v4 = vpop.permute.xlu0 %15  }
  0x79   :  { %60 = vst.msk [vmem:[%s148_s1 + $0x4] ss:$8 sm:$0xf] %vm3_vm0, %v32_v3   ;;  %61 = vst.msk [vmem:[%s148_s1 + $0x4] ss:$8 sm:$0xf0] %vm3_vm0, %v32_v3  }
  0x7a   :  { %56 = vst.msk [vmem:[%s148_s1 + $0x2] ss:$8 sm:$0xf] %vm3_vm0, %v16_v4   ;;  %57 = vst.msk [vmem:[%s148_s1 + $0x2] ss:$8 sm:$0xf0] %vm3_vm0, %v16_v4  }
  0x7c   :  { %v48_v5 = vpop.permute.xlu1 %47   ;;  %v40_v6 = vpop.permute.xlu0 %39  }
  0x7d   :  { %64 = vst.msk [vmem:[%s148_s1 + $0x6] ss:$8 sm:$0xf] %vm3_vm0, %v48_v5   ;;  %65 = vst.msk [vmem:[%s148_s1 + $0x6] ss:$8 sm:$0xf0] %vm3_vm0, %v48_v5  }
  0x7e   :  { %62 = vst.msk [vmem:[%s148_s1 + $0x5] ss:$8 sm:$0xf] %vm3_vm0, %v40_v6   ;;  %63 = vst.msk [vmem:[%s148_s1 + $0x5] ss:$8 sm:$0xf0] %vm3_vm0, %v40_v6  }

// kernel: spatial_learning_forward.1
= control target key start
LH: loop header
LB: loop body
LE: loop exit
PB: predicated region body
PF: predicated region fallthrough
CT: control target
= control target key end

     0   :  { %s9214_s0 = inlined_call_operand.vmem [shape: f32[16,128], index: 0, kind: input, shape index: {}]   ;;  %s9215_s1 = inlined_call_operand.vmem [shape: f32[16,128], index: 1, kind: input, shape index: {}]   ;;  %s9216_s2 = inlined_call_operand.vmem [shape: bf16[128,768], index: 2, kind: input, shape index: {}]   ;;  %s9217_s3 = inlined_call_operand.vmem [shape: bf16[16,112], index: 3, kind: input, shape index: {}]   ;;  %s9218_s4 = inlined_call_operand.vmem [shape: f32[16,1], index: 4, kind: input, shape index: {}]   ;;  %s9219_s5 = inlined_call_operand.vmem [shape: bf16[32,16], index: 5, kind: input, shape index: {}]   ;;  %s9220_s6 = inlined_call_operand.vmem [shape: bf16[16,16], index: 6, kind: input, shape index: {}]   ;;  %s9221_s7 = inlined_call_operand.vmem [shape: bf16[128,128], index: 7, kind: input, shape index: {}]   ;;  %s9222_s8 = inlined_call_operand.vmem [shape: bf16[128,128], index: 8, kind: input, shape index: {}]   ;;  %s9223_s9 = inlined_call_operand.vmem [shape: bf16[8,8], index: 9, kind: input, shape index: {}]   ;;  %s9224_s10 = inlined_call_operand.vmem [shape: f32[8,1], index: 10, kind: input, shape index: {}]   ;;  %s9225_s11 = inlined_call_operand.vmem [shape: bf16[32,16], index: 11, kind: input, shape index: {}]   ;;  %s9226_s12 = inlined_call_operand.vmem [shape: f32[32,1], index: 12, kind: input, shape index: {}]   ;;  %s9227_s13 = inlined_call_operand.vmem [shape: bf16[16,32], index: 13, kind: input, shape index: {}]   ;;  %s9228_s14 = inlined_call_operand.vmem [shape: f32[16,1], index: 14, kind: input, shape index: {}]   ;;  %s9229_s15 = inlined_call_operand.vmem [shape: f32[3,16,1], index: 15, kind: input, shape index: {}]   ;;  %s9230_s16 = inlined_call_operand.vmem [shape: f32[3,16,1], index: 16, kind: input, shape index: {}]   ;;  %s9231_s17 = inlined_call_operand.vmem [shape: f32[16,16], index: 17, kind: input, shape index: {}]   ;;  %s9232_s18 = inlined_call_operand.vmem [shape: f32[16,128], index: 18, kind: input, shape index: {}]   ;;  %s9233_s19 = inlined_call_operand.vmem [shape: f32[128,128], index: 19, kind: input, shape index: {}]   ;;  %s9234_s20 = inlined_call_operand.vmem [shape: f32[2,128], index: 20, kind: input, shape index: {}]   ;;  %s9235_s21 = inlined_call_operand.hbm [shape: f32[16,128], index: 21, kind: output, shape index: {}]  }
   0x1   :  { %9241 = sst [smem:[#allocation5_spill]] %s9214_s0 }
   0x2   :  { %9242 = sst [smem:[#allocation6_spill]] %s9215_s1 }
   0x3   :  { %9243 = sst [smem:[#allocation7_spill]] %s9216_s2 }
   0x4   :  { %9244 = sst [smem:[#allocation8_spill]] %s9217_s3 }
   0x5   :  { %9245 = sst [smem:[#allocation9_spill]] %s9218_s4 }
   0x6   :  { %9246 = sst [smem:[#allocation10_spill]] %s9219_s5 }
   0x7   :  { %s9247_s26 = sld [smem:[#allocation7_spill]]  ;;  %v7782_v2 = vmov 0   ;;  %s9248_s2 = sld [smem:[#allocation5_spill]] }
   0x8   :  { %397 = vmatprep.mubr.bf16.mxu0 %v7782_v2  ;;  %440 = vmatprep.mubr.bf16.mxu1 %v7782_v2 }
   0x9   :  { %7503 = vset.pattern.permute.xlu0 %v7782_v2  ;;  %7504 = vset.pattern.permute.xlu1 %v7782_v2 }
   0xd   :  { %v7505_v0 = vld [vmem:[%s9247_s26 + $0x4] ss:$24 sps:$4 sm:$0xff]   ;;  %v7507_v1 = vld [vmem:[%s9247_s26] ss:$24 sps:$4 sm:$0xff]   ;;  %v7508_v3 = vld [vmem:[%s9247_s26 + $0x34] ss:$24 sps:$4 sm:$0xff]  }
   0xe   :  { %365 = vmatprep.subr.bf16.mxu0 %v7505_v0  ;;  %v7510_v4 = vld [vmem:[%s9247_s26 + $0x30] ss:$24 sps:$4 sm:$0xff]   ;;  %v7511_v5 = vld [vmem:[%s9247_s26 + $0x64] ss:$24 sps:$4 sm:$0xff]   ;;  %v7513_v6 = vld [vmem:[%s9247_s26 + $0x60] ss:$24 sps:$4 sm:$0xff]  }
   0xf   :  { %366 = vmatpush1.bf16.msra.mxu0 %v7507_v1  ;;  %v7520_v7 = vld [vmem:[%s9247_s26 + $0xc] ss:$24 sps:$4 sm:$0xff]   ;;  %v7522_v8 = vld [vmem:[%s9247_s26 + $0x8] ss:$24 sps:$4 sm:$0xff]   ;;  %v7526_v10 = vld [vmem:[%s9247_s26 + $0x3c] ss:$24 sps:$4 sm:$0xff]  }
  0x10   :  { %367 = vmatprep.subr.bf16.mxu0 %v7508_v3  ;;  %v7514_v9 = vld [vmem:[%s9247_s26 + $0x94] ss:$24 sps:$4 sm:$0xff]   ;;  %408 = vmatprep.subr.bf16.mxu1 %v7520_v7  ;;  %v7528_v11 = vld [vmem:[%s9247_s26 + $0x38] ss:$24 sps:$4 sm:$0xff]   ;;  %v7517_v13 = vld [vmem:[%s9247_s26 + $0xc4] ss:$24 sps:$4 sm:$0xff]  }
  0x11   :  { %409 = vmatpush1.bf16.msra.mxu1 %v7522_v8  ;;  %v7516_v12 = vld [vmem:[%s9247_s26 + $0x90] ss:$24 sps:$4 sm:$0xff]   ;;  %v7532_v14 = vld [vmem:[%s9247_s26 + $0x6c] ss:$24 sps:$4 sm:$0xff]   ;;  %v7519_v16 = vld [vmem:[%s9247_s26 + $0xc0] ss:$24 sps:$4 sm:$0xff]  }
  0x12   :  { %410 = vmatprep.subr.bf16.mxu1 %v7526_v10  ;;  %v7534_v15 = vld [vmem:[%s9247_s26 + $0x68] ss:$24 sps:$4 sm:$0xff]   ;;  %v7538_v17 = vld [vmem:[%s9247_s26 + $0x9c] ss:$24 sps:$4 sm:$0xff]   ;;  %v7540_v20 = vld [vmem:[%s9247_s26 + $0x98] ss:$24 sps:$4 sm:$0xff]  }
  0x13   :  { %368 = vmatpush1.bf16.msra.mxu0 %v7510_v4  ;;  %v7523_v18 = vld [vmem:[%s9247_s26 + $0xf4] ss:$24 sps:$4 sm:$0xff]   ;;  %v7525_v19 = vld [vmem:[%s9247_s26 + $0xf0] ss:$24 sps:$4 sm:$0xff]   ;;  %v7529_v22 = vld [vmem:[%s9247_s26 + $0x124] ss:$24 sps:$4 sm:$0xff]  }
  0x14   :  { %369 = vmatprep.subr.bf16.mxu0 %v7511_v5  ;;  %v7544_v21 = vld [vmem:[%s9247_s26 + $0xcc] ss:$24 sps:$4 sm:$0xff]   ;;  %v7531_v23 = vld [vmem:[%s9247_s26 + $0x120] ss:$24 sps:$4 sm:$0xff]   ;;  %v7550_v25 = vld [vmem:[%s9247_s26 + $0xfc] ss:$24 sps:$4 sm:$0xff]  }
  0x15   :  { %411 = vmatpush1.bf16.msra.mxu1 %v7528_v11  ;;  %v7546_v24 = vld [vmem:[%s9247_s26 + $0xc8] ss:$24 sps:$4 sm:$0xff]   ;;  %v7535_v26 = vld [vmem:[%s9247_s26 + $0x154] ss:$24 sps:$4 sm:$0xff]   ;;  %v7552_v30 = vld [vmem:[%s9247_s26 + $0xf8] ss:$24 sps:$4 sm:$0xff]  }
  0x16   :  { %412 = vmatprep.subr.bf16.mxu1 %v7532_v14  ;;  %v7537_v27 = vld [vmem:[%s9247_s26 + $0x150] ss:$24 sps:$4 sm:$0xff]   ;;  %v7987_v28 = vld [vmem:[%s9248_s2] sm:$0xff]  ;;  %v7543_v32 = vld [vmem:[%s9247_s26 + $0x14] ss:$24 sps:$4 sm:$0xff]  }
  0x17   :  { %370 = vmatpush1.bf16.msra.mxu0 %v7513_v6  ;;  %v7992_v29 = vld [vmem:[%s9248_s2 + $0x8] sm:$0xff]  ;;  %v7562_v36 = vld [vmem:[%s9247_s26 + $0x15c] ss:$24 sps:$4 sm:$0xff]   ;;  %v7564_v38 = vld [vmem:[%s9247_s26 + $0x158] ss:$24 sps:$4 sm:$0xff]  }
  0x18   :  { %371 = vmatprep.subr.bf16.mxu0 %v7514_v9  ;;  %v7556_v31 = vld [vmem:[%s9247_s26 + $0x12c] ss:$24 sps:$4 sm:$0xff]   ;;  %v7541_v33 = vld [vmem:[%s9247_s26 + $0x10] ss:$24 sps:$4 sm:$0xff]   ;;  %v8008_v34 = vpack.c.bf16 %v7992_v29, %v7987_v28  ;;  %v7547_v39 = vld [vmem:[%s9247_s26 + $0x40] ss:$24 sps:$4 sm:$0xff]  }
  0x19   :  { %413 = vmatpush1.bf16.msra.mxu1 %v7534_v15  ;;  %v7558_v35 = vld [vmem:[%s9247_s26 + $0x128] ss:$24 sps:$4 sm:$0xff]   ;;  %v7549_v37 = vld [vmem:[%s9247_s26 + $0x44] ss:$24 sps:$4 sm:$0xff]   ;;  %v7555_v40 = vld [vmem:[%s9247_s26 + $0x74] ss:$24 sps:$4 sm:$0xff]  }
  0x1a   :  { %414 = vmatprep.subr.bf16.mxu1 %v7538_v17  ;;  %v7553_v41 = vld [vmem:[%s9247_s26 + $0x70] ss:$24 sps:$4 sm:$0xff]   ;;  %v7561_v42 = vld [vmem:[%s9247_s26 + $0xa4] ss:$24 sps:$4 sm:$0xff]   ;;  %v7559_v43 = vld [vmem:[%s9247_s26 + $0xa0] ss:$24 sps:$4 sm:$0xff]  }
  0x1b   :  { %372 = vmatpush1.bf16.msra.mxu0 %v7516_v12  ;;  %v7567_v44 = vld [vmem:[%s9247_s26 + $0xd4] ss:$24 sps:$4 sm:$0xff]   ;;  %v7565_v45 = vld [vmem:[%s9247_s26 + $0xd0] ss:$24 sps:$4 sm:$0xff]   ;;  %v7570_v46 = vld [vmem:[%s9247_s26 + $0x104] ss:$24 sps:$4 sm:$0xff]  }
  0x1c   :  { %373 = vmatprep.subr.bf16.mxu0 %v7517_v13 }
  0x1d   :  { %415 = vmatpush1.bf16.msra.mxu1 %v7540_v20 }
  0x1e   :  { %416 = vmatprep.subr.bf16.mxu1 %v7544_v21 }
  0x1f   :  { %374 = vmatpush1.bf16.msra.mxu0 %v7519_v16 }
  0x20   :  { %375 = vmatprep.subr.bf16.mxu0 %v7523_v18 }
  0x21   :  { %417 = vmatpush1.bf16.msra.mxu1 %v7546_v24 }
  0x22   :  { %418 = vmatprep.subr.bf16.mxu1 %v7550_v25 }
  0x23   :  { %376 = vmatpush1.bf16.msra.mxu0 %v7525_v19 }
  0x24   :  { %377 = vmatprep.subr.bf16.mxu0 %v7529_v22 }
  0x25   :  { %419 = vmatpush1.bf16.msra.mxu1 %v7552_v30 }
  0x26   :  { %420 = vmatprep.subr.bf16.mxu1 %v7556_v31 }
  0x27   :  { %378 = vmatpush1.bf16.msra.mxu0 %v7531_v23 }
  0x28   :  { %379 = vmatprep.subr.bf16.mxu0 %v7535_v26 }
  0x29   :  { %421 = vmatpush1.bf16.msra.mxu1 %v7558_v35 }
  0x2a   :  { %422 = vmatprep.subr.bf16.mxu1 %v7562_v36 }
  0x2b   :  { %380 = vmatpush1.bf16.msra.mxu0 %v7537_v27 }
  0x2c   :  { %451 = vmatprep.subr.bf16.mxu0 %v7543_v32 }
  0x2d   :  { %423 = vmatpush1.bf16.msra.mxu1 %v7564_v38 }
  0x2e   :  { %398 = vmatmul.mubr.bf16.vlgmr.msra.gmra.mrb[0].mxu0 %v8008_v34 }
  0x2f   :  { %452 = vmatpush1.bf16.msra.mxu0 %v7541_v33  ;;  %483 = vmatprep.mubr.bf16.mxu0 %v7782_v2 }
  0x30   :  { %453 = vmatprep.subr.bf16.mxu0 %v7549_v37  ;;  %441 = vmatmul.mubr.bf16.vlgmr.msra.gmra.mrb[0].mxu1 %v8008_v34 }
  0x33   :  { %454 = vmatpush1.bf16.msra.mxu0 %v7547_v39 }
  0x34   :  { %455 = vmatprep.subr.bf16.mxu0 %v7555_v40 }
  0x37   :  { %456 = vmatpush1.bf16.msra.mxu0 %v7553_v41 }
  0x38   :  { %457 = vmatprep.subr.bf16.mxu0 %v7561_v42 }
  0x3b   :  { %458 = vmatpush1.bf16.msra.mxu0 %v7559_v43 }
  0x3c   :  { %459 = vmatprep.subr.bf16.mxu0 %v7567_v44 }
  0x3d   :  { %26 = vsyncpa [#allocation3], 0  ;;  %v7568_v47 = vld [vmem:[%s9247_s26 + $0x100] ss:$24 sps:$4 sm:$0xff]   ;;  %v7573_v48 = vld [vmem:[%s9247_s26 + $0x134] ss:$24 sps:$4 sm:$0xff]  }
  0x3e   :  { %v7571_v49 = vld [vmem:[%s9247_s26 + $0x130] ss:$24 sps:$4 sm:$0xff]   ;;  %v7576_v50 = vld [vmem:[%s9247_s26 + $0x164] ss:$24 sps:$4 sm:$0xff]   ;;  %v7574_v51 = vld [vmem:[%s9247_s26 + $0x160] ss:$24 sps:$4 sm:$0xff]  }
  0x3f   :  { %460 = vmatpush1.bf16.msra.mxu0 %v7565_v45  ;;  %v7783_v52 = vmov 0.0   ;;  %vm7784_vm0 = vmmov 0   ;;  %s9249_s30 = sld [smem:[#allocation9_spill]]  ;;  %s9250_s1 = sld [smem:[#allocation8_spill]]  ;;  %vm519_vm1 = vcmask 916480   ;;  %v74_v20 = vld [vmem:[%s9231_s17] sm:$0xff] }
  0x40   :  { %461 = vmatprep.subr.bf16.mxu0 %v7570_v46  ;;  %6691 = vmatprep.subr.bf16.mxu1 %v7783_v52  ;;  %vm574_vm2 = vcmask 130048   ;;  %v75_v27 = vld [vmem:[%s9231_s17 + $0x8] sm:$0xff]  ;;  %s9251_s29 = sld [smem:[#allocation6_spill]]  ;;  %s9252_s5 = sld [smem:[#allocation10_spill]]  ;;  %vm2094_vm3 = vcmask 64512   ;;  %vm5085_vm5 = vcmask 261120  }
  0x41   :  { %6692 = vmatpush3.bf16.msra.mxu1 %v8008_v34  ;;  %6705 = vmatprep.mubr.msk.bf16.mxu1 %vm7784_vm0, %v7783_v52  ;;  %v576_v21 = vsel %vm574_vm2, %v74_v20, 0  ;;  %vm8647_vm4 = vmpackc.low %vm2094_vm3, %vm2094_vm3 }
  0x42   :  { %6693 = vmatprep.subr.bf16.mxu1 %v7783_v52  ;;  %v8096_v22 = vand.u32 4294901760, %v576_v21 }
  0x43   :  { %462 = vmatpush1.bf16.msra.mxu0 %v7568_v47 }
  0x44   :  { %463 = vmatprep.subr.bf16.mxu0 %v7573_v48  ;;  %v8099_v23 = vsub.f32 %v576_v21, %v8096_v22 }
  0x45   :  { %v502_v53 = vld [vmem:[%s9249_s30] sm:$0xff]  ;;  %v503_v54 = vld [vmem:[%s9249_s30 + $0x8] sm:$0xff] }
  0x46   :  { %506 = vperm.xlu0 %7503, %v502_v53   ;;  %v7577_v9 = vld [vmem:[%s9250_s1] sm:$0xff]   ;;  %v8102_v24 = vand.u32 4294901760, %v8099_v23  ;;  %v73_v53 = vld [vmem:[%s9251_s29 + $0x8] sm:$0xff] }
  0x47   :  { %464 = vmatpush1.bf16.msra.mxu0 %v7571_v49 }
  0x48   :  { %465 = vmatprep.subr.bf16.mxu0 %v7576_v50  ;;  %v651_v25 = vsub.f32 %v8099_v23, %v8102_v24 }
  0x4a   :  { %511 = vperm.xlu0 %7503, %v503_v54   ;;  %v8106_v26 = vand.u32 4294901760, %v651_v25 }
  0x4b   :  { %466 = vmatpush1.bf16.msra.mxu0 %v7574_v51  ;;  %v72_v51 = vld [vmem:[%s9251_s29] sm:$0xff] }
  0x4c   :  { %v7259_v54 = vpack.c.bf16 %v73_v53, %v72_v51  ;;  %v7588_v51 = vld [vmem:[%s9220_s6] sm:$0xff]   ;;  %v7590_v53 = vld [vmem:[%s9222_s8 + $0x8] sm:$0xff]  }
  0x4e   :  { %484 = vmatmul.mubr.bf16.vlgmr.msra.gmra.mrb[4].mxu0 %v8008_v34 }
  0x4f   :  { %6755 = vmatprep.mubr.f32.mxu0 %v8106_v26 }
  0xc5   :  { %v507_v10 = vpop.permute.xlu0 %506 }
  0xc9   :  { %v512_v14 = vpop.permute.xlu0 %511 }
 0x101   :  { %v399_v55 = vpop.f32.mrb[0].mxu0 }
 0x102   :  { %v401_v56 = vpop.f32.mrb[1].mxu0 }
 0x103   :  { %v403_v57 = vpop.f32.mrb[2].mxu0  ;;  %v442_v61 = vpop.f32.mrb[0].mxu1 }
 0x104   :  { %v494_v58 = vpack.c.bf16 %v403_v57, %v399_v55  ;;  %v405_v59 = vpop.f32.mrb[3].mxu0  ;;  %v444_v62 = vpop.f32.mrb[1].mxu1  ;;  %v7578_v55 = vld [vmem:[%s9252_s5] sm:$0xff]  }
 0x105   :  { %v495_v60 = vpack.c.bf16 %v405_v59, %v401_v56  ;;  %v446_v63 = vpop.f32.mrb[2].mxu1  ;;  %v7579_v56 = vld [vmem:[%s9252_s5 + $0x8] sm:$0xff]   ;;  %v7580_v57 = vld [vmem:[%s9221_s7] sm:$0xff]   ;;  %v7582_v59 = vld [vmem:[%s9221_s7 + $0x10] sm:$0xff]  }
 0x106   :  { %6694 = vmatpush3.bf16.msra.mxu1 %v494_v58  ;;  %v496_v0 = vpack.c.bf16 %v446_v63, %v442_v61  ;;  %v448_v1 = vpop.f32.mrb[3].mxu1  ;;  %v7581_v58 = vld [vmem:[%s9221_s7 + $0x8] sm:$0xff]   ;;  %v7584_v61 = vld [vmem:[%s9221_s7 + $0x20] sm:$0xff]   ;;  %v7586_v63 = vld [vmem:[%s9221_s7 + $0x30] sm:$0xff]  }
 0x107   :  { %6695 = vmatprep.subr.bf16.mxu1 %v7783_v52  ;;  %v497_v2 = vpack.c.bf16 %v448_v1, %v444_v62  ;;  %v7585_v62 = vld [vmem:[%s9221_s7 + $0x28] sm:$0xff]  }
 0x10a   :  { %6696 = vmatpush3.bf16.msra.mxu1 %v495_v60  ;;  %v7583_v60 = vld [vmem:[%s9221_s7 + $0x18] sm:$0xff]  }
 0x10b   :  { %6697 = vmatprep.subr.bf16.mxu1 %v7783_v52 }
 0x10e   :  { %6698 = vmatpush3.bf16.msra.mxu1 %v496_v0  ;;  %v7587_v0 = vld [vmem:[%s9221_s7 + $0x38] sm:$0xff]  }
 0x10f   :  { %6699 = vmatprep.subr.bf16.mxu1 %v7783_v52 }
 0x112   :  { %6700 = vmatpush3.bf16.msra.mxu1 %v497_v2 }
 0x113   :  { %6701 = vmatprep.subr.bf16.mxu1 %v7783_v52 }
 0x121   :  { %v485_v3 = vpop.f32.mrb[4].mxu0 }
 0x122   :  { %v487_v4 = vpop.f32.mrb[5].mxu0 }
 0x123   :  { %v489_v5 = vpop.f32.mrb[6].mxu0 }
 0x124   :  { %v498_v6 = vpack.c.bf16 %v489_v5, %v485_v3  ;;  %v491_v7 = vpop.f32.mrb[7].mxu0 }
 0x125   :  { %v499_v8 = vpack.c.bf16 %v491_v7, %v487_v4 }
 0x126   :  { %6702 = vmatpush3.bf16.msra.mxu1 %v498_v6 }
 0x127   :  { %6703 = vmatprep.subr.bf16.mxu1 %v7783_v52 }
 0x12a   :  { %6704 = vmatpush3.bf16.msra.mxu1 %v499_v8 }
 0x12d   :  { %6706 = vmatmul.mubr.msk.bf16.vlgmr.msra.gmra.mrb[4].mxu1 %vm519_vm1, %v7577_v9 }
 0x12e   :  { %6713 = vmatprep.mubr.f32.mxu1 %v8106_v26 }
 0x200   :  { %v557_v11 = vpop.f32.mrb[4].mxu1 }
 0x201   :  { %v558_v12 = vadd.f32 %v557_v11, %v507_v10  ;;  %v6707_v13 = vpop.f32.mrb[5].mxu1 }
 0x202   :  { %v560_v15 = vpop.f32.mrb[6].mxu1 }
 0x203   :  { %v561_v16 = vadd.f32 %v560_v15, %v512_v14  ;;  %v6708_v17 = vpop.f32.mrb[7].mxu1  ;;  %v8085_v18 = vadd.f32 %v558_v12, %v7987_v28  ;;  %v579_v28 = vsel %vm574_vm2, %v75_v27, 0  ;;  %v8190_v15 = vld [vmem:[%s9232_s18] sm:$0xff] }
 0x205   :  { %570 = vadd.xlane.f32.xlu1 %v8085_v18  ;;  %v8089_v19 = vadd.f32 %v561_v16, %v7992_v29  ;;  %v8114_v29 = vand.u32 4294901760, %v579_v28 }
 0x207   :  { %v8117_v30 = vsub.f32 %v579_v28, %v8114_v29 }
 0x209   :  { %572 = vadd.xlane.f32.xlu1 %v8089_v19  ;;  %v8120_v33 = vand.u32 4294901760, %v8117_v30 }
 0x20b   :  { %v661_v39 = vsub.f32 %v8117_v30, %v8120_v33 }
 0x20d   :  { %v8124_v43 = vand.u32 4294901760, %v661_v39 }
 0x292   :  { %v571_v31 = vpop.xlane.xlu1 %570 }
 0x293   :  { %v582_v32 = vand.u32 4294901760, %v571_v31 }
 0x295   :  { %v670_v35 = vsub.f32 %v571_v31, %v582_v32 }
 0x296   :  { %v573_v36 = vpop.xlane.xlu1 %572 }
 0x297   :  { %v671_v37 = vand.u32 4294901760, %v670_v35  ;;  %v585_v38 = vand.u32 4294901760, %v573_v36 }
 0x299   :  { %v7211_v40 = vpack.c.bf16 %v585_v38, %v582_v32  ;;  %v677_v41 = vsub.f32 %v573_v36, %v585_v38  ;;  %v672_v44 = vsub.f32 %v670_v35, %v671_v37 }
 0x29b   :  { %v678_v42 = vand.u32 4294901760, %v677_v41  ;;  %7212 = vmatprep.subr.bf16.mxu1 %v7211_v40  ;;  %v673_v46 = vand.u32 4294901760, %v672_v44  ;;  %v7219_v49 = vpack.c.bf16 %v677_v41, %v670_v35 }
 0x29c   :  { %7214 = vmatpush3.bf16.msra.mxu1 %v7211_v40 }
 0x29d   :  { %v679_v45 = vsub.f32 %v677_v41, %v678_v42  ;;  %v7227_v50 = vpack.c.bf16 %v678_v42, %v671_v37 }
 0x29f   :  { %6714 = vmatmul.mubr.f32.vlgmr.msra.gmra.mrb[8].mxu1 %v8124_v43  ;;  %v680_v47 = vand.u32 4294901760, %v679_v45 }
 0x2a0   :  { %6720 = vmatprep.mubr.f32.mxu1 %v8096_v22 }
 0x2a1   :  { %v7215_v48 = vpack.c.bf16 %v680_v47, %v673_v46 }
 0x2a3   :  { %7216 = vmatprep.subr.bf16.mxu1 %v7215_v48 }
 0x2a4   :  { %7218 = vmatpush3.bf16.msra.mxu1 %v7215_v48 }
 0x2a5   :  { %7220 = vmatprep.subr.bf16.mxu1 %v7219_v49 }
 0x2a7   :  { %6721 = vmatmul.mubr.f32.vlgmr.msra.gmra.mrb[8].mxu1 %v8114_v29 }
 0x2a8   :  { %7222 = vmatpush3.bf16.msra.mxu1 %v7219_v49  ;;  %6727 = vmatprep.mubr.f32.mxu1 %v8099_v23  ;;  %v7589_v49 = vld [vmem:[%s9222_s8] sm:$0xff]  }
 0x2a9   :  { %7224 = vmatprep.subr.bf16.mxu1 %v7211_v40 }
 0x2af   :  { %6728 = vmatmul.mubr.f32.vlgmr.msra.gmra.mrb[8].mxu1 %v8117_v30 }
 0x2b0   :  { %7226 = vmatpush3.bf16.msra.mxu1 %v7211_v40  ;;  %6734 = vmatprep.mubr.f32.mxu1 %v8102_v24 }
 0x2b1   :  { %7228 = vmatprep.subr.bf16.mxu1 %v7227_v50 }
 0x2b7   :  { %6735 = vmatmul.mubr.f32.vlgmr.msra.gmra.mrb[8].mxu1 %v8120_v33 }
 0x2b8   :  { %7230 = vmatpush3.bf16.msra.mxu1 %v7227_v50  ;;  %6741 = vmatprep.mubr.f32.mxu1 %v8096_v22 }
 0x2b9   :  { %7232 = vmatprep.subr.bf16.mxu1 %v7211_v40 }
 0x2bf   :  { %6742 = vmatmul.mubr.f32.vlgmr.msra.gmra.mrb[8].mxu1 %v8114_v29 }
 0x2c0   :  { %7234 = vmatpush3.bf16.msra.mxu1 %v7211_v40  ;;  %6748 = vmatprep.mubr.f32.mxu1 %v8096_v22 }
 0x2c1   :  { %7260 = vmatprep.subr.bf16.mxu1 %v7259_v54 }
 0x2c7   :  { %6749 = vmatmul.mubr.f32.vlgmr.msra.gmra.mrb[8].mxu1 %v8114_v29 }
 0x2c8   :  { %7262 = vmatpush3.bf16.msra.mxu1 %v7259_v54  ;;  %6797 = vmatprep.mubr.msk.bf16.mxu1 %vm574_vm2, %v7578_v55  ;;  %v7591_v55 = vld [vmem:[%s9222_s8 + $0x10] sm:$0xff]  }
 0x2c9   :  { %6809 = vmatprep.subr.bf16.mxu1 %v7580_v57 }
 0x2cb   :  { %6798 = vmatmul.mubr.msk.bf16.vlgmr.msra.gmra.mrb[12].mxu1 %vm574_vm2, %v7579_v56  ;;  %v7592_v56 = vld [vmem:[%s9222_s8 + $0x18] sm:$0xff]  }
 0x2cc   :  { %6810 = vmatpush3.bf16.msra.mxu1 %v7580_v57 }
 0x2cd   :  { %6811 = vmatprep.subr.bf16.mxu1 %v7581_v58 }
 0x2d0   :  { %6812 = vmatpush3.bf16.msra.mxu1 %v7581_v58 }
 0x2d1   :  { %6813 = vmatprep.subr.bf16.mxu1 %v7582_v59 }
 0x2d4   :  { %6814 = vmatpush3.bf16.msra.mxu1 %v7582_v59 }
 0x2d5   :  { %6815 = vmatprep.subr.bf16.mxu1 %v7583_v60 }
 0x2d8   :  { %6816 = vmatpush3.bf16.msra.mxu1 %v7583_v60 }
 0x2d9   :  { %6817 = vmatprep.subr.bf16.mxu1 %v7584_v61 }
 0x2dc   :  { %6818 = vmatpush3.bf16.msra.mxu1 %v7584_v61 }
 0x2dd   :  { %6819 = vmatprep.subr.bf16.mxu1 %v7585_v62 }
 0x2e0   :  { %6820 = vmatpush3.bf16.msra.mxu1 %v7585_v62 }
 0x2e1   :  { %6821 = vmatprep.subr.bf16.mxu1 %v7586_v63 }
 0x2e4   :  { %6822 = vmatpush3.bf16.msra.mxu1 %v7586_v63 }
 0x2e5   :  { %6823 = vmatprep.subr.bf16.mxu1 %v7587_v0 }
 0x2e8   :  { %6824 = vmatpush3.bf16.msra.mxu1 %v7587_v0 }
 0x39a   :  { %v6750_v1 = vpop.f32.mrb[8].mxu1 }
 0x39b   :  { %v1084_v2 = vmul.f32 0.00390625, %v6750_v1  ;;  %v1073_v3 = vpop.f32.mrb[9].mxu1 }
 0x39c   :  { %v1083_v4 = vmul.f32 0.00390625, %v1073_v3 }
 0x39d   :  { %1092 = vperm.xlu1 %7504, %v1084_v2   ;;  %v2288_v2 = vlaneseq }
 0x39e   :  { %1087 = vperm.xlu0 %7503, %v1083_v4   ;;  %v6799_v5 = vpop.f32.mrb[12].mxu1 }
 0x39f   :  { %v1744_v6 = vpop.f32.mrb[13].mxu1  ;;  %6825 = vmatprep.mubr.f32.mxu1 %v6799_v5  ;;  %v2289_v3 = vshrl.u32 %v2288_v2, 7  ;;  %v7593_v5 = vld [vmem:[%s9222_s8 + $0x20] sm:$0xff]  }
 0x3a0   :  { %v6800_v7 = vpop.f32.mrb[14].mxu1 }
 0x3a1   :  { %6826 = vmatmul.mubr.f32.vlgmr.msra.gmra.mrb[10].mxu1 %v6800_v7  ;;  %v8175_v8 = vpop.f32.mrb[15].mxu1  ;;  %v2290_v4 = vsub.s32 0, %v2289_v3 }
 0x41c   :  { %v1093_v9 = vpop.permute.xlu1 %1092 }
 0x41d   :  { %v8178_v10 = vsub.f32 %v8089_v19, %v1093_v9  ;;  %v1088_v11 = vpop.permute.xlu0 %1087  ;;  %v7785_v19 = vmov 0.0|0.0   ;;  %v2378_v9 = vsub.s32 1, %v2289_v3 }
 0x41e   :  { %v8181_v12 = vsub.f32 %v8085_v18, %v1088_v11  ;;  %v7594_v11 = vld [vmem:[%s9222_s8 + $0x28] sm:$0xff]  }
 0x41f   :  { %v1098_v13 = vmul.f32 %v8178_v10, %v8178_v10 }
 0x420   :  { %v1097_v14 = vmul.f32 %v8181_v12, %v8181_v12 }
 0x421   :  { %1101 = vadd.xlane.f32.xlu1 %v1098_v13 }
 0x422   :  { %1099 = vadd.xlane.f32.xlu0 %v1097_v14  ;;  %v7595_v14 = vld [vmem:[%s9222_s8 + $0x30] sm:$0xff]  }
 0x44f   :  { %2062 = vxpose.xlu0.b32.start.end [1/1] (short) %v1744_v6, 128  ;;  %v1655_v6 = vld [vmem:[%s9234_s20] sm:$0x3] }
 0x450   :  { %v8251_v7 = vrot.slane %v1655_v6, %v2290_v4  ;;  %v8256_v13 = vrot.slane %v1655_v6, %v2378_v9 }
 0x474   :  { %v8192_v16 = vpop.f32.mrb[10].mxu1 }
 0x475   :  { %v1940_v17 = vpop.f32.mrb[11].mxu1 }
 0x476   :  { %v1949_v18 = vmul.f32 %v1940_v17, %v8190_v15  ;;  %v7596_v17 = vld [vmem:[%s9222_s8 + $0x38] sm:$0xff]  }
 0x478   :  { %6847 = vmatprep.subr.mxu1 %v1949_v18 }
 0x479   :  { %6848 = vmatpush3.msra.mxu1 %v1949_v18  ;;  %v6298_v18 = vadd.f32 -1.0, %v1655_v6  ;;  %v1646_v6 = vld [vmem:[%s9233_s19 + $0x38] sm:$0xff] }
 0x47a   :  { %7266 = vmatprep.subr.bf16.mxu1 %v7785_v19 }
 0x4ae   :  { %v1102_v20 = vpop.xlane.xlu1 %1101 }
 0x4af   :  { %v1107_v21 = vand.u32 4294901760, %v1102_v20  ;;  %v1100_v25 = vpop.xlane.xlu0 %1099 }
 0x4b0   :  { %v1104_v27 = vand.u32 4294901760, %v1100_v25 }
 0x4b1   :  { %v1199_v28 = vsub.f32 %v1102_v20, %v1107_v21  ;;  %v1657_v20 = vmul.f32 1e+09, %v6298_v18 }
 0x4b2   :  { %v7235_v31 = vpack.c.bf16 %v1107_v21, %v1104_v27  ;;  %v1192_v32 = vsub.f32 %v1100_v25, %v1104_v27  ;;  %v1640_v21 = vld [vmem:[%s9233_s19 + $0x8] sm:$0xff] }
 0x4b3   :  { %v1200_v35 = vand.u32 4294901760, %v1199_v28  ;;  %v8267_v25 = vrot.slane %v1657_v20, %v2290_v4 }
 0x4b4   :  { %v1193_v36 = vand.u32 4294901760, %v1192_v32  ;;  %7236 = vmatprep.subr.bf16.mxu0 %v7235_v31  ;;  %v7243_v42 = vpack.c.bf16 %v1199_v28, %v1192_v32 }
 0x4b5   :  { %7238 = vmatpush3.bf16.msra.mxu0 %v7235_v31  ;;  %v1201_v37 = vsub.f32 %v1199_v28, %v1200_v35 }
 0x4b6   :  { %v1194_v38 = vsub.f32 %v1192_v32, %v1193_v36  ;;  %v7251_v44 = vpack.c.bf16 %v1200_v35, %v1193_v36  ;;  %v8273_v35 = vrot.slane %v1657_v20, %v2378_v9  ;;  %v1639_v36 = vld [vmem:[%s9233_s19] sm:$0xff] }
 0x4b7   :  { %v1202_v39 = vand.u32 4294901760, %v1201_v37  ;;  %v1642_v37 = vld [vmem:[%s9233_s19 + $0x18] sm:$0xff] }
 0x4b8   :  { %6756 = vmatmul.mubr.f32.vlgmr.msra.gmra.mrb[8].mxu0 %v8124_v43  ;;  %v1195_v40 = vand.u32 4294901760, %v1194_v38 }
 0x4b9   :  { %6762 = vmatprep.mubr.f32.mxu0 %v8096_v22 }
 0x4ba   :  { %v7239_v41 = vpack.c.bf16 %v1202_v39, %v1195_v40 }
 0x4bc   :  { %7240 = vmatprep.subr.bf16.mxu0 %v7239_v41 }
 0x4bd   :  { %7242 = vmatpush3.bf16.msra.mxu0 %v7239_v41 }
 0x4be   :  { %7244 = vmatprep.subr.bf16.mxu0 %v7243_v42 }
 0x4c0   :  { %6763 = vmatmul.mubr.f32.vlgmr.msra.gmra.mrb[8].mxu0 %v8114_v29 }
 0x4c1   :  { %7246 = vmatpush3.bf16.msra.mxu0 %v7243_v42  ;;  %6769 = vmatprep.mubr.f32.mxu0 %v8099_v23 }
 0x4c2   :  { %7248 = vmatprep.subr.bf16.mxu0 %v7235_v31 }
 0x4c8   :  { %6770 = vmatmul.mubr.f32.vlgmr.msra.gmra.mrb[8].mxu0 %v8117_v30 }
 0x4c9   :  { %7250 = vmatpush3.bf16.msra.mxu0 %v7235_v31  ;;  %6776 = vmatprep.mubr.f32.mxu0 %v8102_v24 }
 0x4ca   :  { %7252 = vmatprep.subr.bf16.mxu0 %v7251_v44 }
 0x4cf   :  { %v2078_v45 = vpop.trf.xlu0 }
 0x4d0   :  { %6777 = vmatmul.mubr.f32.vlgmr.msra.gmra.mrb[8].mxu0 %v8120_v33  ;;  %6849 = vmatprep.mubr.msk.f32.mxu1 %vm2094_vm3, %v2078_v45 }
 0x4d1   :  { %7254 = vmatpush3.bf16.msra.mxu0 %v7251_v44  ;;  %6783 = vmatprep.mubr.f32.mxu0 %v8096_v22 }
 0x4d2   :  { %7256 = vmatprep.subr.bf16.mxu0 %v7235_v31 }
 0x4d3   :  { %v2079_v46 = vpop.trf.xlu0 }
 0x4d4   :  { %6850 = vmatmul.mubr.msk.f32.vlgmr.msra.gmra.mrb[16].mxu1 %vm2094_vm3, %v2079_v46 }
 0x4d7   :  { %v2080_v47 = vpop.trf.xlu0 }
 0x4d8   :  { %6784 = vmatmul.mubr.f32.vlgmr.msra.gmra.mrb[8].mxu0 %v8114_v29  ;;  %6852 = vmatprep.mubr.msk.f32.mxu1 %vm2094_vm3, %v2080_v47 }
 0x4d9   :  { %7258 = vmatpush3.bf16.msra.mxu0 %v7235_v31  ;;  %6790 = vmatprep.mubr.f32.mxu0 %v8096_v22 }
 0x4da   :  { %7263 = vmatprep.subr.bf16.mxu0 %v7785_v19 }
 0x4db   :  { %v2081_v48 = vpop.trf.xlu0 }
 0x4dc   :  { %6853 = vmatmul.mubr.msk.f32.gmra.mrb[18].mxu1 %vm2094_vm3, %v2081_v48 }
 0x4df   :  { %v2082_v50 = vpop.trf.xlu0 }
 0x4e0   :  { %6791 = vmatmul.mubr.f32.vlgmr.msra.gmra.mrb[8].mxu0 %v8114_v29  ;;  %6855 = vmatprep.mubr.msk.f32.mxu1 %vm2094_vm3, %v2082_v50  ;;  %v1641_v50 = vld [vmem:[%s9233_s19 + $0x10] sm:$0xff] }
 0x4e1   :  { %7265 = vmatpush3.bf16.msra.mxu0 %v8008_v34  ;;  %6805 = vmatprep.mubr.msk.bf16.mxu0 %vm7784_vm0, %v7783_v52 }
 0x4e2   :  { %6828 = vmatprep.subr.bf16.mxu0 %v7589_v49 }
 0x4e3   :  { %v2083_v54 = vpop.trf.xlu0 }
 0x4e4   :  { %6806 = vmatmul.mubr.msk.bf16.vlgmr.msra.gmra.mrb[12].mxu0 %vm574_vm2, %v7588_v51  ;;  %6856 = vmatmul.mubr.msk.f32.gmra.mrb[20].mxu1 %vm2094_vm3, %v2083_v54 }
 0x4e5   :  { %6829 = vmatpush3.bf16.msra.mxu0 %v7589_v49 }
 0x4e6   :  { %6830 = vmatprep.subr.bf16.mxu0 %v7590_v53 }
 0x4e7   :  { %v2084_v34 = vpop.trf.xlu0 }
 0x4e8   :  { %6858 = vmatprep.mubr.msk.f32.mxu1 %vm2094_vm3, %v2084_v34 }
 0x4e9   :  { %6831 = vmatpush3.bf16.msra.mxu0 %v7590_v53 }
 0x4ea   :  { %6832 = vmatprep.subr.bf16.mxu0 %v7591_v55 }
 0x4eb   :  { %v2085_v57 = vpop.trf.xlu0 }
 0x4ec   :  { %6859 = vmatmul.mubr.msk.f32.gmra.mrb[22].mxu1 %vm2094_vm3, %v2085_v57 }
 0x4ed   :  { %6833 = vmatpush3.bf16.msra.mxu0 %v7591_v55 }
 0x4ee   :  { %6834 = vmatprep.subr.bf16.mxu0 %v7592_v56 }
 0x4ef   :  { %v2086_v58 = vpop.trf.xlu0 }
 0x4f0   :  { %6861 = vmatprep.mubr.msk.f32.mxu1 %vm2094_vm3, %v2086_v58  ;;  %v1644_v58 = vld [vmem:[%s9233_s19 + $0x28] sm:$0xff] }
 0x4f1   :  { %6835 = vmatpush3.bf16.msra.mxu0 %v7592_v56 }
 0x4f2   :  { %6836 = vmatprep.subr.bf16.mxu0 %v7593_v5 }
 0x4f3   :  { %v2087_v59 = vpop.trf.xlu0 }
 0x4f4   :  { %6862 = vmatmul.mubr.msk.f32.gmra.mrb[24].mxu1 %vm2094_vm3, %v2087_v59 }
 0x4f5   :  { %6837 = vmatpush3.bf16.msra.mxu0 %v7593_v5 }
 0x4f6   :  { %6838 = vmatprep.subr.bf16.mxu0 %v7594_v11 }
 0x4f7   :  { %v2088_v60 = vpop.trf.xlu0 }
 0x4f8   :  { %6864 = vmatprep.mubr.msk.f32.mxu1 %vm2094_vm3, %v2088_v60 }
 0x4f9   :  { %6839 = vmatpush3.bf16.msra.mxu0 %v7594_v11 }
 0x4fa   :  { %6840 = vmatprep.subr.bf16.mxu0 %v7595_v14 }
 0x4fb   :  { %v2089_v61 = vpop.trf.xlu0 }
 0x4fc   :  { %6865 = vmatmul.mubr.msk.f32.gmra.mrb[26].mxu1 %vm2094_vm3, %v2089_v61 }
 0x4fd   :  { %6841 = vmatpush3.bf16.msra.mxu0 %v7595_v14 }
 0x4fe   :  { %6842 = vmatprep.subr.bf16.mxu0 %v7596_v17 }
 0x4ff   :  { %v2090_v62 = vpop.trf.xlu0 }
 0x500   :  { %6867 = vmatprep.mubr.msk.f32.mxu1 %vm2094_vm3, %v2090_v62 }
 0x501   :  { %6843 = vmatpush3.bf16.msra.mxu0 %v7596_v17 }
 0x503   :  { %v2091_v63 = vpop.trf.xlu0 }
 0x504   :  { %6868 = vmatmul.mubr.msk.f32.gmra.mrb[28].mxu1 %vm2094_vm3, %v2091_v63 }
 0x507   :  { %v2092_v0 = vpop.trf.xlu0 }
 0x508   :  { %6870 = vmatprep.mubr.msk.f32.mxu1 %vm2094_vm3, %v2092_v0 }
 0x50b   :  { %v2093_v1 = vpop.trf.xlu0 }
 0x50c   :  { %6871 = vmatmul.mubr.msk.f32.gmra.mrb[30].mxu1 %vm2094_vm3, %v2093_v1  ;;  %v1643_v1 = vld [vmem:[%s9233_s19 + $0x20] sm:$0xff] }
 0x50d   :  { %6931 = vmatprep.mubr.msk.bf16.mxu1 %vm7784_vm0, %v7783_v52 }
 0x5a7   :  { %v6851_v27 = vpop.f32.mrb[16].mxu1 }
 0x5a8   :  { %v8269_v28 = vadd.f32 %v6851_v27, %v1640_v21  ;;  %v2209_v31 = vpop.f32.mrb[17].mxu1  ;;  %v1645_v21 = vld [vmem:[%s9233_s19 + $0x30] sm:$0xff] }
 0x5a9   :  { %v8281_v38 = vadd.f32 %v2209_v31, %v1639_v36 }
 0x5aa   :  { %v2293_v32 = vadd.f32 %v8267_v25, %v8269_v28  ;;  %v2381_v39 = vadd.f32 %v8273_v35, %v8269_v28 }
 0x5ab   :  { %v2292_v44 = vadd.f32 %v8267_v25, %v8281_v38  ;;  %v2380_v48 = vadd.f32 %v8273_v35, %v8281_v38 }
 0x5ac   :  { %2310 = vmax.xlane.f32.xlu1 %v2293_v32 }
 0x5af   :  { %v6854_v40 = vpop.f32.mrb[18].mxu1 }
 0x5b0   :  { %2398 = vmax.xlane.f32.xlu1 %v2381_v39  ;;  %v8285_v41 = vadd.f32 %v6854_v40, %v1642_v37  ;;  %v2219_v42 = vpop.f32.mrb[19].mxu1  ;;  %v1648_v37 = vld [vmem:[%s9233_s19 + $0x48] sm:$0xff] }
 0x5b1   :  { %v8302_v56 = vadd.f32 %v2219_v42, %v1641_v50 }
 0x5b2   :  { %v2383_v45 = vadd.f32 %v8273_v35, %v8285_v41  ;;  %v2295_v54 = vadd.f32 %v8267_v25, %v8285_v41 }
 0x5b3   :  { %v8291_v46 = vpop.f32.mrb[8].mxu0  ;;  %v2294_v59 = vadd.f32 %v8267_v25, %v8302_v56  ;;  %v2382_v63 = vadd.f32 %v8273_v35, %v8302_v56 }
 0x5b4   :  { %2308 = vmax.xlane.f32.xlu1 %v2292_v44  ;;  %v8293_v47 = vpop.f32.mrb[9].mxu0  ;;  %2402 = vmax.xlane.f32.xlu0 %v2383_v45 }
 0x5b7   :  { %v1835_v49 = vpop.f32.mrb[12].mxu0  ;;  %v6857_v51 = vpop.f32.mrb[20].mxu1 }
 0x5b8   :  { %v6807_v53 = vpop.f32.mrb[13].mxu0  ;;  %2396 = vmax.xlane.f32.xlu1 %v2380_v48  ;;  %6844 = vmatprep.mubr.f32.mxu0 %v1835_v49  ;;  %v2229_v55 = vpop.f32.mrb[21].mxu1  ;;  %v8309_v61 = vadd.f32 %v6857_v51, %v1644_v58  ;;  %v1647_v49 = vld [vmem:[%s9233_s19 + $0x40] sm:$0xff]  ;;  %v1649_v58 = vld [vmem:[%s9233_s19 + $0x50] sm:$0xff] }
 0x5b9   :  { %v1838_v34 = vpop.f32.mrb[14].mxu0  ;;  %v8318_v4 = vadd.f32 %v2229_v55, %v1643_v1  ;;  %v1650_v53 = vld [vmem:[%s9233_s19 + $0x58] sm:$0xff] }
 0x5ba   :  { %6845 = vmatmul.mubr.f32.vlgmr.msra.gmra.mrb[10].mxu0 %v1838_v34  ;;  %v6808_v57 = vpop.f32.mrb[15].mxu0  ;;  %v2297_v0 = vadd.f32 %v8267_v25, %v8309_v61  ;;  %v2385_v5 = vadd.f32 %v8273_v35, %v8309_v61 }
 0x5bb   :  { %v2296_v9 = vadd.f32 %v8267_v25, %v8318_v4  ;;  %v2384_v18 = vadd.f32 %v8273_v35, %v8318_v4 }
 0x5bc   :  { %2314 = vmax.xlane.f32.xlu1 %v2295_v54 }
 0x5bf   :  { %v6860_v60 = vpop.f32.mrb[22].mxu1 }
 0x5c0   :  { %2312 = vmax.xlane.f32.xlu1 %v2294_v59  ;;  %v2239_v62 = vpop.f32.mrb[23].mxu1  ;;  %v8327_v14 = vadd.f32 %v6860_v60, %v1646_v6 }
 0x5c1   :  { %v8336_v32 = vadd.f32 %v2239_v62, %v1645_v21  ;;  %v1652_v62 = vld [vmem:[%s9233_s19 + $0x68] sm:$0xff] }
 0x5c2   :  { %v2299_v20 = vadd.f32 %v8267_v25, %v8327_v14  ;;  %v2387_v36 = vadd.f32 %v8273_v35, %v8327_v14 }
 0x5c3   :  { %v2298_v39 = vadd.f32 %v8267_v25, %v8336_v32  ;;  %v2386_v45 = vadd.f32 %v8273_v35, %v8336_v32 }
 0x5c4   :  { %2400 = vmax.xlane.f32.xlu1 %v2382_v63 }
 0x5c7   :  { %v6863_v2 = vpop.f32.mrb[24].mxu1 }
 0x5c8   :  { %2318 = vmax.xlane.f32.xlu1 %v2297_v0  ;;  %v2249_v3 = vpop.f32.mrb[25].mxu1  ;;  %v8345_v42 = vadd.f32 %v6863_v2, %v1648_v37 }
 0x5c9   :  { %v8354_v50 = vadd.f32 %v2249_v3, %v1647_v49  ;;  %v1651_v3 = vld [vmem:[%s9233_s19 + $0x60] sm:$0xff] }
 0x5ca   :  { %v2301_v48 = vadd.f32 %v8267_v25, %v8345_v42  ;;  %v2389_v51 = vadd.f32 %v8273_v35, %v8345_v42 }
 0x5cb   :  { %v2300_v54 = vadd.f32 %v8267_v25, %v8354_v50  ;;  %v2388_v34 = vadd.f32 %v8273_v35, %v8354_v50 }
 0x5cc   :  { %2406 = vmax.xlane.f32.xlu1 %v2385_v5 }
 0x5cf   :  { %v6866_v11 = vpop.f32.mrb[26].mxu1 }
 0x5d0   :  { %2316 = vmax.xlane.f32.xlu1 %v2296_v9  ;;  %v2259_v17 = vpop.f32.mrb[27].mxu1  ;;  %v8363_v55 = vadd.f32 %v6866_v11, %v1650_v53  ;;  %v1654_v9 = vld [vmem:[%s9233_s19 + $0x78] sm:$0xff] }
 0x5d1   :  { %v8372_v59 = vadd.f32 %v2259_v17, %v1649_v58 }
 0x5d2   :  { %v2303_v57 = vadd.f32 %v8267_v25, %v8363_v55  ;;  %v2391_v60 = vadd.f32 %v8273_v35, %v8363_v55 }
 0x5d3   :  { %v2302_v63 = vadd.f32 %v8267_v25, %v8372_v59  ;;  %v2390_v1 = vadd.f32 %v8273_v35, %v8372_v59 }
 0x5d4   :  { %2404 = vmax.xlane.f32.xlu1 %v2384_v18 }
 0x5d7   :  { %v6869_v27 = vpop.f32.mrb[28].mxu1 }
 0x5d8   :  { %2322 = vmax.xlane.f32.xlu1 %v2299_v20  ;;  %v2269_v31 = vpop.f32.mrb[29].mxu1  ;;  %v8381_v0 = vadd.f32 %v6869_v27, %v1652_v62  ;;  %v1653_v20 = vld [vmem:[%s9233_s19 + $0x70] sm:$0xff] }
 0x5d9   :  { %v8390_v5 = vadd.f32 %v2269_v31, %v1651_v3 }
 0x5da   :  { %v2305_v2 = vadd.f32 %v8267_v25, %v8381_v0  ;;  %v2393_v6 = vadd.f32 %v8273_v35, %v8381_v0 }
 0x5db   :  { %v2304_v11 = vadd.f32 %v8267_v25, %v8390_v5  ;;  %v2392_v18 = vadd.f32 %v8273_v35, %v8390_v5 }
 0x5dc   :  { %2410 = vmax.xlane.f32.xlu1 %v2387_v36 }
 0x5df   :  { %v6872_v40 = vpop.f32.mrb[30].mxu1 }
 0x5e0   :  { %2320 = vmax.xlane.f32.xlu1 %v2298_v39  ;;  %v2279_v44 = vpop.f32.mrb[31].mxu1  ;;  %v8399_v17 = vadd.f32 %v6872_v40, %v1654_v9 }
 0x5e1   :  { %v8408_v27 = vadd.f32 %v2279_v44, %v1653_v20 }
 0x5e2   :  { %v2307_v21 = vadd.f32 %v8267_v25, %v8399_v17  ;;  %v2395_v37 = vadd.f32 %v8273_v35, %v8399_v17 }
 0x5e3   :  { %v2306_v31 = vadd.f32 %v8267_v25, %v8408_v27  ;;  %v2394_v36 = vadd.f32 %v8273_v35, %v8408_v27 }
 0x5e4   :  { %2408 = vmax.xlane.f32.xlu1 %v2386_v45 }
 0x5e8   :  { %2326 = vmax.xlane.f32.xlu1 %v2301_v48 }
 0x5ec   :  { %2414 = vmax.xlane.f32.xlu1 %v2389_v51 }
 0x5f0   :  { %2324 = vmax.xlane.f32.xlu1 %v2300_v54 }
 0x5f4   :  { %2412 = vmax.xlane.f32.xlu1 %v2388_v34 }
 0x5f8   :  { %2330 = vmax.xlane.f32.xlu1 %v2303_v57 }
 0x5fc   :  { %2418 = vmax.xlane.f32.xlu1 %v2391_v60 }
 0x600   :  { %2328 = vmax.xlane.f32.xlu1 %v2302_v63 }
 0x604   :  { %2416 = vmax.xlane.f32.xlu1 %v2390_v1 }
 0x608   :  { %2334 = vmax.xlane.f32.xlu1 %v2305_v2 }
 0x60c   :  { %2422 = vmax.xlane.f32.xlu1 %v2393_v6 }
 0x610   :  { %2332 = vmax.xlane.f32.xlu1 %v2304_v11 }
 0x614   :  { %2420 = vmax.xlane.f32.xlu1 %v2392_v18 }
 0x618   :  { %2338 = vmax.xlane.f32.xlu1 %v2307_v21 }
 0x61c   :  { %2336 = vmax.xlane.f32.xlu1 %v2306_v31 }
 0x620   :  { %2424 = vmax.xlane.f32.xlu1 %v2394_v36 }
 0x624   :  { %2426 = vmax.xlane.f32.xlu1 %v2395_v37 }
 0x639   :  { %v2311_v39 = vpop.xlane.xlu1 %2310 }
 0x63a   :  { %v2345_v45 = vmul.f32 %v8251_v7, %v2311_v39 }
 0x63d   :  { %v2399_v40 = vpop.xlane.xlu1 %2398 }
 0x63e   :  { %v2433_v44 = vmul.f32 %v8256_v13, %v2399_v40 }
 0x640   :  { %v2449_v48 = vadd.f32 %v2433_v44, %v2345_v45 }
 0x641   :  { %v2309_v49 = vpop.xlane.xlu1 %2308  ;;  %v2403_v34 = vpop.xlane.xlu0 %2402 }
 0x642   :  { %v2465_v51 = vsub.f32 %v8269_v28, %v2449_v48  ;;  %v2344_v57 = vmul.f32 %v8251_v7, %v2309_v49  ;;  %v2435_v62 = vmul.f32 %v8256_v13, %v2403_v34 }
 0x644   :  { %v2482_v53 = vmul.f32 1.442695, %v2465_v51 }
 0x645   :  { %v2397_v54 = vpop.xlane.xlu1 %2396 }
 0x646   :  { %7600 = vpow2.f32 %v2482_v53  ;;  %v2432_v58 = vmul.f32 %v8256_v13, %v2397_v54 }
 0x648   :  { %v2448_v60 = vadd.f32 %v2432_v58, %v2344_v57 }
 0x649   :  { %v2315_v63 = vpop.xlane.xlu1 %2314 }
 0x64a   :  { %v2464_v1 = vsub.f32 %v8281_v38, %v2448_v60  ;;  %v2347_v2 = vmul.f32 %v8251_v7, %v2315_v63 }
 0x64c   :  { %v2480_v3 = vmul.f32 1.442695, %v2464_v1  ;;  %v2451_v6 = vadd.f32 %v2435_v62, %v2347_v2 }
 0x64d   :  { %v2313_v9 = vpop.xlane.xlu1 %2312 }
 0x64e   :  { %7602 = vpow2.f32 %v2480_v3  ;;  %v2467_v28 = vsub.f32 %v8285_v41, %v2451_v6  ;;  %v2346_v38 = vmul.f32 %v8251_v7, %v2313_v9 }
 0x650   :  { %v8425_v11 = vpop.eup %7600  ;;  %v2486_v18 = vmul.f32 1.442695, %v2467_v28 }
 0x651   :  { %v2401_v20 = vpop.xlane.xlu1 %2400  ;;  %v2513_v21 = vmul.f32 %v8425_v11, %v8251_v7  ;;  %v2593_v31 = vmul.f32 %v8425_v11, %v8256_v13 }
 0x652   :  { %7604 = vpow2.f32 %v2486_v18  ;;  %v2434_v36 = vmul.f32 %v8256_v13, %v2401_v20 }
 0x653   :  { %2530 = vadd.xlane.f32.xlu0 %v2513_v21  ;;  %2610 = vadd.xlane.f32.xlu1 %v2593_v31 }
 0x654   :  { %v2450_v37 = vadd.f32 %v2434_v36, %v2346_v38 }
 0x655   :  { %v2319_v39 = vpop.xlane.xlu1 %2318 }
 0x656   :  { %v2466_v41 = vsub.f32 %v8302_v56, %v2450_v37  ;;  %v2349_v49 = vmul.f32 %v8251_v7, %v2319_v39 }
 0x658   :  { %v8434_v40 = vpop.eup %7602  ;;  %v2484_v45 = vmul.f32 1.442695, %v2466_v41 }
 0x659   :  { %v2407_v44 = vpop.xlane.xlu1 %2406  ;;  %v2512_v48 = vmul.f32 %v8434_v40, %v8251_v7  ;;  %v2592_v56 = vmul.f32 %v8434_v40, %v8256_v13 }
 0x65a   :  { %7606 = vpow2.f32 %v2484_v45  ;;  %v2437_v51 = vmul.f32 %v8256_v13, %v2407_v44 }
 0x65b   :  { %2528 = vadd.xlane.f32.xlu1 %v2512_v48 }
 0x65c   :  { %v8440_v53 = vpop.eup %7604  ;;  %v2453_v54 = vadd.f32 %v2437_v51, %v2349_v49 }
 0x65d   :  { %v2317_v34 = vpop.xlane.xlu1 %2316  ;;  %v2515_v57 = vmul.f32 %v8440_v53, %v8251_v7  ;;  %v2595_v63 = vmul.f32 %v8440_v53, %v8256_v13 }
 0x65e   :  { %v2469_v58 = vsub.f32 %v8309_v61, %v2453_v54  ;;  %v2348_v1 = vmul.f32 %v8251_v7, %v2317_v34 }
 0x65f   :  { %2608 = vadd.xlane.f32.xlu1 %v2592_v56  ;;  %2534 = vadd.xlane.f32.xlu0 %v2515_v57 }
 0x660   :  { %v2490_v60 = vmul.f32 1.442695, %v2469_v58 }
 0x661   :  { %v2405_v62 = vpop.xlane.xlu1 %2404 }
 0x662   :  { %7608 = vpow2.f32 %v2490_v60  ;;  %v2436_v2 = vmul.f32 %v8256_v13, %v2405_v62 }
 0x663   :  { %2614 = vadd.xlane.f32.xlu1 %v2595_v63 }
 0x664   :  { %v8451_v3 = vpop.eup %7606  ;;  %v2452_v6 = vadd.f32 %v2436_v2, %v2348_v1 }
 0x665   :  { %v2323_v9 = vpop.xlane.xlu1 %2322  ;;  %v2594_v61 = vmul.f32 %v8451_v3, %v8256_v13  ;;  %v2514_v28 = vmul.f32 %v8451_v3, %v8251_v7 }
 0x666   :  { %v2468_v18 = vsub.f32 %v8318_v4, %v2452_v6  ;;  %v2351_v31 = vmul.f32 %v8251_v7, %v2323_v9 }
 0x667   :  { %2612 = vadd.xlane.f32.xlu1 %v2594_v61  ;;  %2532 = vadd.xlane.f32.xlu0 %v2514_v28 }
 0x668   :  { %v2488_v20 = vmul.f32 1.442695, %v2468_v18 }
 0x669   :  { %v2411_v21 = vpop.xlane.xlu1 %2410 }
 0x66a   :  { %7610 = vpow2.f32 %v2488_v20  ;;  %v2439_v38 = vmul.f32 %v8256_v13, %v2411_v21 }
 0x66c   :  { %v8460_v36 = vpop.eup %7608  ;;  %v2455_v37 = vadd.f32 %v2439_v38, %v2351_v31 }
 0x66d   :  { %v2321_v39 = vpop.xlane.xlu1 %2320  ;;  %v2597_v41 = vmul.f32 %v8460_v36, %v8256_v13  ;;  %v2517_v45 = vmul.f32 %v8460_v36, %v8251_v7 }
 0x66e   :  { %v2471_v4 = vsub.f32 %v8327_v14, %v2455_v37  ;;  %v2350_v49 = vmul.f32 %v8251_v7, %v2321_v39 }
 0x66f   :  { %2618 = vadd.xlane.f32.xlu1 %v2597_v41  ;;  %2538 = vadd.xlane.f32.xlu0 %v2517_v45 }
 0x670   :  { %v2494_v44 = vmul.f32 1.442695, %v2471_v4 }
 0x671   :  { %v2409_v48 = vpop.xlane.xlu1 %2408 }
 0x672   :  { %7612 = vpow2.f32 %v2494_v44  ;;  %v2438_v51 = vmul.f32 %v8256_v13, %v2409_v48 }
 0x674   :  { %v8469_v54 = vpop.eup %7610  ;;  %v2454_v34 = vadd.f32 %v2438_v51, %v2350_v49 }
 0x675   :  { %v2327_v56 = vpop.xlane.xlu1 %2326  ;;  %v2596_v57 = vmul.f32 %v8469_v54, %v8256_v13  ;;  %v2516_v58 = vmul.f32 %v8469_v54, %v8251_v7 }
 0x676   :  { %v2470_v14 = vsub.f32 %v8336_v32, %v2454_v34  ;;  %v2353_v63 = vmul.f32 %v8251_v7, %v2327_v56 }
 0x677   :  { %2616 = vadd.xlane.f32.xlu1 %v2596_v57  ;;  %2536 = vadd.xlane.f32.xlu0 %v2516_v58 }
 0x678   :  { %v2492_v60 = vmul.f32 1.442695, %v2470_v14  ;;  %v8507_v14 = vld [vmem:[%s9232_s18 + $0x8] sm:$0xff] }
 0x679   :  { %v2415_v62 = vpop.xlane.xlu1 %2414 }
 0x67a   :  { %7614 = vpow2.f32 %v2492_v60  ;;  %v2441_v1 = vmul.f32 %v8256_v13, %v2415_v62 }
 0x67c   :  { %v8478_v2 = vpop.eup %7612  ;;  %v2457_v6 = vadd.f32 %v2441_v1, %v2353_v63 }
 0x67d   :  { %v2325_v9 = vpop.xlane.xlu1 %2324  ;;  %v2599_v61 = vmul.f32 %v8478_v2, %v8256_v13  ;;  %v2519_v28 = vmul.f32 %v8478_v2, %v8251_v7 }
 0x67e   :  { %v2473_v32 = vsub.f32 %v8345_v42, %v2457_v6  ;;  %v2352_v21 = vmul.f32 %v8251_v7, %v2325_v9  ;;  %v8513_v6 = vmul.f32 %v8192_v16, %v8507_v14 }
 0x67f   :  { %2622 = vadd.xlane.f32.xlu1 %v2599_v61  ;;  %2542 = vadd.xlane.f32.xlu0 %v2519_v28 }
 0x680   :  { %v2498_v18 = vmul.f32 1.442695, %v2473_v32 }
 0x681   :  { %v2413_v20 = vpop.xlane.xlu1 %2412 }
 0x682   :  { %7616 = vpow2.f32 %v2498_v18  ;;  %v2440_v31 = vmul.f32 %v8256_v13, %v2413_v20 }
 0x684   :  { %v8487_v38 = vpop.eup %7614  ;;  %v2456_v37 = vadd.f32 %v2440_v31, %v2352_v21 }
 0x685   :  { %v2331_v39 = vpop.xlane.xlu1 %2330  ;;  %v2598_v41 = vmul.f32 %v8487_v38, %v8256_v13  ;;  %v2518_v45 = vmul.f32 %v8487_v38, %v8251_v7 }
 0x686   :  { %v2472_v42 = vsub.f32 %v8354_v50, %v2456_v37  ;;  %v2355_v48 = vmul.f32 %v8251_v7, %v2331_v39 }
 0x687   :  { %2620 = vadd.xlane.f32.xlu1 %v2598_v41  ;;  %2540 = vadd.xlane.f32.xlu0 %v2518_v45 }
 0x688   :  { %v2496_v4 = vmul.f32 1.442695, %v2472_v42 }
 0x689   :  { %v2419_v44 = vpop.xlane.xlu1 %2418 }
 0x68a   :  { %7618 = vpow2.f32 %v2496_v4  ;;  %v2443_v49 = vmul.f32 %v8256_v13, %v2419_v44 }
 0x68c   :  { %v8496_v51 = vpop.eup %7616  ;;  %v2459_v34 = vadd.f32 %v2443_v49, %v2355_v48 }
 0x68d   :  { %v8498_v56 = vpop.f32.mrb[10].mxu0  ;;  %v2329_v57 = vpop.xlane.xlu1 %2328  ;;  %v2601_v58 = vmul.f32 %v8496_v51, %v8256_v13  ;;  %v2521_v50 = vmul.f32 %v8496_v51, %v8251_v7 }
 0x68e   :  { %v2475_v60 = vsub.f32 %v8363_v55, %v2459_v34  ;;  %v2049_v62 = vpop.f32.mrb[11].mxu0  ;;  %v2354_v61 = vmul.f32 %v8251_v7, %v2329_v57 }
 0x68f   :  { %v2058_v63 = vmul.f32 %v2049_v62, %v8190_v15  ;;  %2626 = vadd.xlane.f32.xlu1 %v2601_v58  ;;  %2546 = vadd.xlane.f32.xlu0 %v2521_v50 }
 0x690   :  { %v2502_v1 = vmul.f32 1.442695, %v2475_v60 }
 0x691   :  { %6873 = vmatprep.subr.mxu0 %v2058_v63  ;;  %v2417_v9 = vpop.xlane.xlu1 %2416 }
 0x692   :  { %7620 = vpow2.f32 %v2502_v1  ;;  %v2442_v28 = vmul.f32 %v8256_v13, %v2417_v9  ;;  %6874 = vmatpush3.xpose.msra.mxu0 %v2058_v63 }
 0x693   :  { %6935 = vmatprep.subr.mxu0 %v8513_v6 }
 0x694   :  { %v8518_v55 = vpop.eup %7618  ;;  %v2458_v15 = vadd.f32 %v2442_v28, %v2354_v61 }
 0x695   :  { %v2335_v32 = vpop.xlane.xlu1 %2334  ;;  %v2600_v18 = vmul.f32 %v8518_v55, %v8256_v13  ;;  %v2520_v16 = vmul.f32 %v8518_v55, %v8251_v7 }
 0x696   :  { %v2474_v20 = vsub.f32 %v8372_v59, %v2458_v15  ;;  %v2357_v37 = vmul.f32 %v8251_v7, %v2335_v32 }
 0x697   :  { %2624 = vadd.xlane.f32.xlu1 %v2600_v18  ;;  %2544 = vadd.xlane.f32.xlu0 %v2520_v16 }
 0x698   :  { %v2500_v21 = vmul.f32 1.442695, %v2474_v20 }
 0x699   :  { %v2423_v31 = vpop.xlane.xlu1 %2422 }
 0x69a   :  { %7622 = vpow2.f32 %v2500_v21  ;;  %v2445_v39 = vmul.f32 %v8256_v13, %v2423_v31 }
 0x69c   :  { %v8527_v41 = vpop.eup %7620  ;;  %v2461_v45 = vadd.f32 %v2445_v39, %v2357_v37 }
 0x69d   :  { %v2333_v42 = vpop.xlane.xlu1 %2332  ;;  %v2603_v4 = vmul.f32 %v8527_v41, %v8256_v13  ;;  %v2523_v44 = vmul.f32 %v8527_v41, %v8251_v7 }
 0x69e   :  { %v2477_v59 = vsub.f32 %v8381_v0, %v2461_v45  ;;  %v2356_v34 = vmul.f32 %v8251_v7, %v2333_v42 }
 0x69f   :  { %2630 = vadd.xlane.f32.xlu1 %v2603_v4  ;;  %2550 = vadd.xlane.f32.xlu0 %v2523_v44 }
 0x6a0   :  { %v2506_v48 = vmul.f32 1.442695, %v2477_v59 }
 0x6a1   :  { %v2421_v49 = vpop.xlane.xlu1 %2420 }
 0x6a2   :  { %7624 = vpow2.f32 %v2506_v48  ;;  %v2444_v57 = vmul.f32 %v8256_v13, %v2421_v49 }
 0x6a4   :  { %v8536_v58 = vpop.eup %7622  ;;  %v2460_v50 = vadd.f32 %v2444_v57, %v2356_v34 }
 0x6a5   :  { %v2339_v60 = vpop.xlane.xlu1 %2338  ;;  %v2602_v62 = vmul.f32 %v8536_v58, %v8256_v13  ;;  %v2522_v63 = vmul.f32 %v8536_v58, %v8251_v7 }
 0x6a6   :  { %v2476_v0 = vsub.f32 %v8390_v5, %v2460_v50  ;;  %v2359_v21 = vmul.f32 %v8251_v7, %v2339_v60 }
 0x6a7   :  { %2628 = vadd.xlane.f32.xlu1 %v2602_v62  ;;  %2548 = vadd.xlane.f32.xlu0 %v2522_v63 }
 0x6a8   :  { %v2504_v1 = vmul.f32 1.442695, %v2476_v0 }
 0x6a9   :  { %v2337_v9 = vpop.xlane.xlu1 %2336 }
 0x6aa   :  { %7626 = vpow2.f32 %v2504_v1  ;;  %v2358_v18 = vmul.f32 %v8251_v7, %v2337_v9 }
 0x6ac   :  { %v8543_v61 = vpop.eup %7624 }
 0x6ad   :  { %v2425_v28 = vpop.xlane.xlu1 %2424  ;;  %v2605_v15 = vmul.f32 %v8543_v61, %v8256_v13  ;;  %v2525_v32 = vmul.f32 %v8543_v61, %v8251_v7 }
 0x6ae   :  { %v2446_v16 = vmul.f32 %v8256_v13, %v2425_v28 }
 0x6af   :  { %2634 = vadd.xlane.f32.xlu1 %v2605_v15  ;;  %2554 = vadd.xlane.f32.xlu0 %v2525_v32 }
 0x6b0   :  { %v2462_v5 = vadd.f32 %v2446_v16, %v2358_v18 }
 0x6b1   :  { %v2427_v20 = vpop.xlane.xlu1 %2426 }
 0x6b2   :  { %v2478_v31 = vsub.f32 %v8408_v27, %v2462_v5  ;;  %v2447_v37 = vmul.f32 %v8256_v13, %v2427_v20 }
 0x6b4   :  { %v8554_v39 = vpop.eup %7626  ;;  %v2508_v45 = vmul.f32 1.442695, %v2478_v31  ;;  %v2463_v42 = vadd.f32 %v2447_v37, %v2359_v21 }
 0x6b5   :  { %v2604_v4 = vmul.f32 %v8554_v39, %v8256_v13  ;;  %v2524_v44 = vmul.f32 %v8554_v39, %v8251_v7 }
 0x6b6   :  { %7628 = vpow2.f32 %v2508_v45  ;;  %v2479_v59 = vsub.f32 %v8399_v17, %v2463_v42 }
 0x6b7   :  { %2632 = vadd.xlane.f32.xlu1 %v2604_v4  ;;  %2552 = vadd.xlane.f32.xlu0 %v2524_v44 }
 0x6b8   :  { %v2510_v48 = vmul.f32 1.442695, %v2479_v59 }
 0x6ba   :  { %7630 = vpow2.f32 %v2510_v48 }
 0x6c0   :  { %v8561_v27 = vpop.eup %7628 }
 0x6c1   :  { %v2606_v49 = vmul.f32 %v8561_v27, %v8256_v13  ;;  %v2526_v34 = vmul.f32 %v8561_v27, %v8251_v7 }
 0x6c3   :  { %2636 = vadd.xlane.f32.xlu1 %v2606_v49  ;;  %2556 = vadd.xlane.f32.xlu0 %v2526_v34  ;;  %v8585_v34 = vmul.f32 %v8498_v56, %v8507_v14 }
 0x6c4   :  { %v8567_v57 = vpop.eup %7630 }
 0x6c5   :  { %v2607_v50 = vmul.f32 %v8567_v57, %v8256_v13  ;;  %v2527_v17 = vmul.f32 %v8567_v57, %v8251_v7 }
 0x6c7   :  { %2638 = vadd.xlane.f32.xlu1 %v2607_v50  ;;  %2558 = vadd.xlane.f32.xlu0 %v2527_v17 }
 0x6e0   :  { %v2611_v60 = vpop.xlane.xlu1 %2610  ;;  %v2531_v62 = vpop.xlane.xlu0 %2530 }
 0x6e1   :  { %v2641_v63 = vmul.f32 %v2611_v60, %v8256_v13  ;;  %v2561_v0 = vmul.f32 %v2531_v62, %v8251_v7 }
 0x6e3   :  { %v2657_v9 = vadd.f32 %v2641_v63, %v2561_v0 }
 0x6e5   :  { %7632 = vrcp.f32 %v2657_v9 }
 0x6e8   :  { %v2529_v1 = vpop.xlane.xlu1 %2528 }
 0x6e9   :  { %v2560_v15 = vmul.f32 %v2529_v1, %v8251_v7 }
 0x6ec   :  { %v2609_v28 = vpop.xlane.xlu1 %2608  ;;  %v2535_v16 = vpop.xlane.xlu0 %2534 }
 0x6ed   :  { %v2640_v32 = vmul.f32 %v2609_v28, %v8256_v13  ;;  %v2563_v21 = vmul.f32 %v2535_v16, %v8251_v7 }
 0x6ef   :  { %v2656_v18 = vadd.f32 %v2640_v32, %v2560_v15  ;;  %v7633_v59 = vpop.eup %7632 }
 0x6f0   :  { %v2615_v5 = vpop.xlane.xlu1 %2614 }
 0x6f1   :  { %7634 = vrcp.f32 %v2656_v18  ;;  %v2643_v20 = vmul.f32 %v2615_v5, %v8256_v13 }
 0x6f3   :  { %v2659_v31 = vadd.f32 %v2643_v20, %v2563_v21 }
 0x6f4   :  { %v2613_v37 = vpop.xlane.xlu1 %2612  ;;  %2977 = vxpose.xlu0.b32.start.end [1/1] (short) %v8175_v8, 128  ;;  %v2533_v45 = vpop.xlane.xlu0 %2532  ;;  %v2689_v8 = vmul.f32 %v7633_v59, %v8425_v11 }
 0x6f5   :  { %v2642_v42 = vmul.f32 %v2613_v37, %v8256_v13  ;;  %v2562_v4 = vmul.f32 %v2533_v45, %v8251_v7  ;;  %7636 = vrcp.f32 %v2659_v31 }
 0x6f7   :  { %v2658_v44 = vadd.f32 %v2642_v42, %v2562_v4 }
 0x6f9   :  { %7638 = vrcp.f32 %v2658_v44 }
 0x6fb   :  { %v7635_v48 = vpop.eup %7634 }
 0x6fc   :  { %v2688_v49 = vmul.f32 %v7635_v48, %v8434_v40  ;;  %v2619_v50 = vpop.xlane.xlu1 %2618  ;;  %v2539_v17 = vpop.xlane.xlu0 %2538 }
 0x6fd   :  { %v2645_v60 = vmul.f32 %v2619_v50, %v8256_v13  ;;  %v2565_v62 = vmul.f32 %v2539_v17, %v8251_v7 }
 0x6fe   :  { %6875 = vmatprep.mubr.f32.mxu0 %v2688_v49 }
 0x6ff   :  { %6876 = vmatmul.mubr.f32.vlgmr.msra.gmra.mrb[16].mxu0 %v2689_v8  ;;  %v7637_v63 = vpop.eup %7636  ;;  %v2661_v0 = vadd.f32 %v2645_v60, %v2565_v62 }
 0x700   :  { %6936 = vmatpush3.msra.mxu0 %v8513_v6  ;;  %v2691_v28 = vmul.f32 %v7637_v63, %v8440_v53 }
 0x701   :  { %6961 = vmatprep.subr.mxu0 %v8585_v34  ;;  %7640 = vrcp.f32 %v2661_v0 }
 0x703   :  { %v7639_v40 = vpop.eup %7638 }
 0x704   :  { %v2617_v1 = vpop.xlane.xlu1 %2616  ;;  %v2537_v56 = vpop.xlane.xlu0 %2536  ;;  %v2690_v14 = vmul.f32 %v7639_v40, %v8451_v3 }
 0x705   :  { %v2644_v9 = vmul.f32 %v2617_v1, %v8256_v13  ;;  %v2564_v11 = vmul.f32 %v2537_v56, %v8251_v7 }
 0x706   :  { %6878 = vmatprep.mubr.f32.mxu0 %v2690_v14 }
 0x707   :  { %v2660_v15 = vadd.f32 %v2644_v9, %v2564_v11  ;;  %6879 = vmatmul.mubr.f32.gmra.mrb[18].mxu0 %v2691_v28 }
 0x709   :  { %7642 = vrcp.f32 %v2660_v15 }
 0x70b   :  { %v7641_v5 = vpop.eup %7640 }
 0x70c   :  { %v2623_v6 = vpop.xlane.xlu1 %2622  ;;  %v2543_v32 = vpop.xlane.xlu0 %2542  ;;  %v2693_v42 = vmul.f32 %v7641_v5, %v8460_v36 }
 0x70d   :  { %v2647_v18 = vmul.f32 %v2623_v6, %v8256_v13  ;;  %v2567_v16 = vmul.f32 %v2543_v32, %v8251_v7 }
 0x70f   :  { %v2663_v3 = vadd.f32 %v2647_v18, %v2567_v16 }
 0x711   :  { %7644 = vrcp.f32 %v2663_v3 }
 0x713   :  { %v7643_v20 = vpop.eup %7642 }
 0x714   :  { %v2621_v21 = vpop.xlane.xlu1 %2620  ;;  %v2541_v31 = vpop.xlane.xlu0 %2540  ;;  %v2692_v37 = vmul.f32 %v7643_v20, %v8469_v54 }
 0x715   :  { %v2646_v53 = vmul.f32 %v2621_v21, %v8256_v13  ;;  %v2566_v45 = vmul.f32 %v2541_v31, %v8251_v7 }
 0x716   :  { %6881 = vmatprep.mubr.f32.mxu0 %v2692_v37 }
 0x717   :  { %v2662_v4 = vadd.f32 %v2646_v53, %v2566_v45  ;;  %6882 = vmatmul.mubr.f32.gmra.mrb[20].mxu0 %v2693_v42 }
 0x719   :  { %7646 = vrcp.f32 %v2662_v4 }
 0x71b   :  { %v7645_v50 = vpop.eup %7644 }
 0x71c   :  { %v2627_v44 = vpop.xlane.xlu1 %2626  ;;  %v2547_v59 = vpop.xlane.xlu0 %2546  ;;  %v2695_v40 = vmul.f32 %v7645_v50, %v8478_v2 }
 0x71d   :  { %v2649_v48 = vmul.f32 %v2627_v44, %v8256_v13  ;;  %v2569_v49 = vmul.f32 %v2547_v59, %v8251_v7 }
 0x71f   :  { %v2665_v54 = vadd.f32 %v2649_v48, %v2569_v49 }
 0x721   :  { %7648 = vrcp.f32 %v2665_v54 }
 0x723   :  { %v7647_v17 = vpop.eup %7646 }
 0x724   :  { %v2625_v8 = vpop.xlane.xlu1 %2624  ;;  %v2545_v60 = vpop.xlane.xlu0 %2544  ;;  %v2694_v62 = vmul.f32 %v7647_v17, %v8487_v38 }
 0x725   :  { %v2648_v36 = vmul.f32 %v2625_v8, %v8256_v13  ;;  %v2568_v63 = vmul.f32 %v2545_v60, %v8251_v7 }
 0x726   :  { %6884 = vmatprep.mubr.f32.mxu0 %v2694_v62 }
 0x727   :  { %v2664_v0 = vadd.f32 %v2648_v36, %v2568_v63  ;;  %6885 = vmatmul.mubr.f32.gmra.mrb[22].mxu0 %v2695_v40 }
 0x729   :  { %7650 = vrcp.f32 %v2664_v0 }
 0x72b   :  { %v7649_v11 = vpop.eup %7648 }
 0x72c   :  { %v2631_v1 = vpop.xlane.xlu1 %2630  ;;  %v2551_v56 = vpop.xlane.xlu0 %2550  ;;  %v2697_v16 = vmul.f32 %v7649_v11, %v8496_v51 }
 0x72d   :  { %v2651_v14 = vmul.f32 %v2631_v1, %v8256_v13  ;;  %v2571_v9 = vmul.f32 %v2551_v56, %v8251_v7 }
 0x72f   :  { %v2667_v38 = vadd.f32 %v2651_v14, %v2571_v9 }
 0x731   :  { %7652 = vrcp.f32 %v2667_v38 }
 0x733   :  { %v7651_v28 = vpop.eup %7650 }
 0x734   :  { %v2629_v15 = vpop.xlane.xlu1 %2628  ;;  %v2549_v6 = vpop.xlane.xlu0 %2548  ;;  %v2696_v32 = vmul.f32 %v7651_v28, %v8518_v55 }
 0x735   :  { %v2650_v2 = vmul.f32 %v2629_v15, %v8256_v13  ;;  %v2570_v18 = vmul.f32 %v2549_v6, %v8251_v7 }
 0x736   :  { %6887 = vmatprep.mubr.f32.mxu0 %v2696_v32 }
 0x737   :  { %v2666_v5 = vadd.f32 %v2650_v2, %v2570_v18  ;;  %6888 = vmatmul.mubr.f32.gmra.mrb[24].mxu0 %v2697_v16 }
 0x739   :  { %7654 = vrcp.f32 %v2666_v5 }
 0x73b   :  { %v7653_v37 = vpop.eup %7652 }
 0x73c   :  { %v2635_v20 = vpop.xlane.xlu1 %2634  ;;  %v2555_v3 = vpop.xlane.xlu0 %2554  ;;  %v2699_v59 = vmul.f32 %v7653_v37, %v8527_v41 }
 0x73d   :  { %v2653_v21 = vmul.f32 %v2635_v20, %v8256_v13  ;;  %v2573_v31 = vmul.f32 %v2555_v3, %v8251_v7 }
 0x73f   :  { %v2669_v55 = vadd.f32 %v2653_v21, %v2573_v31 }
 0x741   :  { %7656 = vrcp.f32 %v2669_v55 }
 0x743   :  { %v7655_v53 = vpop.eup %7654 }
 0x744   :  { %v2633_v45 = vpop.xlane.xlu1 %2632  ;;  %v2553_v42 = vpop.xlane.xlu0 %2552  ;;  %v2698_v4 = vmul.f32 %v7655_v53, %v8536_v58 }
 0x745   :  { %v2652_v51 = vmul.f32 %v2633_v45, %v8256_v13  ;;  %v2572_v44 = vmul.f32 %v2553_v42, %v8251_v7 }
 0x746   :  { %6890 = vmatprep.mubr.f32.mxu0 %v2698_v4 }
 0x747   :  { %v2668_v48 = vadd.f32 %v2652_v51, %v2572_v44  ;;  %6891 = vmatmul.mubr.f32.gmra.mrb[26].mxu0 %v2699_v59 }
 0x749   :  { %7658 = vrcp.f32 %v2668_v48 }
 0x74b   :  { %v7657_v8 = vpop.eup %7656 }
 0x74c   :  { %v2701_v0 = vmul.f32 %v7657_v8, %v8543_v61 }
 0x750   :  { %v2637_v49 = vpop.xlane.xlu1 %2636  ;;  %v2557_v50 = vpop.xlane.xlu0 %2556 }
 0x751   :  { %v2654_v17 = vmul.f32 %v2637_v49, %v8256_v13  ;;  %v2574_v54 = vmul.f32 %v2557_v50, %v8251_v7 }
 0x753   :  { %v7659_v60 = vpop.eup %7658  ;;  %v2670_v58 = vadd.f32 %v2654_v17, %v2574_v54 }
 0x754   :  { %v2639_v62 = vpop.xlane.xlu1 %2638  ;;  %v2559_v36 = vpop.xlane.xlu0 %2558  ;;  %v2700_v63 = vmul.f32 %v7659_v60, %v8554_v39 }
 0x755   :  { %7660 = vrcp.f32 %v2670_v58  ;;  %v2655_v41 = vmul.f32 %v2639_v62, %v8256_v13  ;;  %v2575_v40 = vmul.f32 %v2559_v36, %v8251_v7 }
 0x756   :  { %6893 = vmatprep.mubr.f32.mxu0 %v2700_v63 }
 0x757   :  { %v2671_v1 = vadd.f32 %v2655_v41, %v2575_v40  ;;  %6894 = vmatmul.mubr.f32.gmra.mrb[28].mxu0 %v2701_v0 }
 0x759   :  { %7662 = vrcp.f32 %v2671_v1 }
 0x75f   :  { %v7661_v56 = vpop.eup %7660 }
 0x760   :  { %v2702_v14 = vmul.f32 %v7661_v56, %v8561_v27  ;;  %v7740_v56 = vld [vmem:[%s9233_s19 + $0x8] sm:$0xff] }
 0x762   :  { %6896 = vmatprep.mubr.f32.mxu0 %v2702_v14 }
 0x763   :  { %v7663_v9 = vpop.eup %7662 }
 0x764   :  { %v2703_v11 = vmul.f32 %v7663_v9, %v8567_v57 }
 0x766   :  { %6897 = vmatmul.mubr.f32.gmra.mrb[30].mxu0 %v2703_v11 }
 0x774   :  { %v2993_v39 = vpop.trf.xlu0 }
 0x775   :  { %6937 = vmatprep.mubr.msk.f32.mxu0 %vm2094_vm3, %v2993_v39  ;;  %v7741_v39 = vld [vmem:[%s9233_s19] sm:$0xff] }
 0x778   :  { %v2994_v28 = vpop.trf.xlu0 }
 0x779   :  { %6938 = vmatmul.mubr.msk.f32.vlgmr.msra.gmra.mrb[32].mxu0 %vm2094_vm3, %v2994_v28 }
 0x77a   :  { %6962 = vmatpush3.xpose.msra.mxu0 %v8585_v34 }
 0x77c   :  { %v2995_v61 = vpop.trf.xlu0 }
 0x77d   :  { %6940 = vmatprep.mubr.msk.f32.mxu0 %vm2094_vm3, %v2995_v61 }
 0x780   :  { %v2996_v38 = vpop.trf.xlu0 }
 0x781   :  { %6941 = vmatmul.mubr.msk.f32.gmra.mrb[34].mxu0 %vm2094_vm3, %v2996_v38 }
 0x784   :  { %v2997_v27 = vpop.trf.xlu0 }
 0x785   :  { %6943 = vmatprep.mubr.msk.f32.mxu0 %vm2094_vm3, %v2997_v27 }
 0x788   :  { %v2998_v15 = vpop.trf.xlu0 }
 0x789   :  { %6944 = vmatmul.mubr.msk.f32.gmra.mrb[36].mxu0 %vm2094_vm3, %v2998_v15 }
 0x78c   :  { %v2999_v57 = vpop.trf.xlu0 }
 0x78d   :  { %6946 = vmatprep.mubr.msk.f32.mxu0 %vm2094_vm3, %v2999_v57  ;;  %v7742_v57 = vld [vmem:[%s9233_s19 + $0x18] sm:$0xff] }
 0x790   :  { %v3000_v6 = vpop.trf.xlu0 }
 0x791   :  { %6947 = vmatmul.mubr.msk.f32.gmra.mrb[38].mxu0 %vm2094_vm3, %v3000_v6 }
 0x794   :  { %v3001_v32 = vpop.trf.xlu0 }
 0x795   :  { %6949 = vmatprep.mubr.msk.f32.mxu0 %vm2094_vm3, %v3001_v32 }
 0x798   :  { %v3002_v34 = vpop.trf.xlu0 }
 0x799   :  { %6950 = vmatmul.mubr.msk.f32.gmra.mrb[40].mxu0 %vm2094_vm3, %v3002_v34 }
 0x79c   :  { %v3003_v2 = vpop.trf.xlu0 }
 0x79d   :  { %6952 = vmatprep.mubr.msk.f32.mxu0 %vm2094_vm3, %v3003_v2 }
 0x7a0   :  { %v3004_v18 = vpop.trf.xlu0 }
 0x7a1   :  { %6953 = vmatmul.mubr.msk.f32.gmra.mrb[42].mxu0 %vm2094_vm3, %v3004_v18 }
 0x7a4   :  { %v3005_v16 = vpop.trf.xlu0 }
 0x7a5   :  { %6955 = vmatprep.mubr.msk.f32.mxu0 %vm2094_vm3, %v3005_v16  ;;  %v7743_v16 = vld [vmem:[%s9233_s19 + $0x10] sm:$0xff] }
 0x7a8   :  { %v3006_v5 = vpop.trf.xlu0 }
 0x7a9   :  { %6956 = vmatmul.mubr.msk.f32.gmra.mrb[44].mxu0 %vm2094_vm3, %v3006_v5 }
 0x7ac   :  { %v3007_v20 = vpop.trf.xlu0 }
 0x7ad   :  { %6958 = vmatprep.mubr.msk.f32.mxu0 %vm2094_vm3, %v3007_v20 }
 0x7b0   :  { %v3008_v3 = vpop.trf.xlu0 }
 0x7b1   :  { %6959 = vmatmul.mubr.msk.f32.gmra.mrb[46].mxu0 %vm2094_vm3, %v3008_v3 }
 0x7d2   :  { %v6877_v21 = vpop.f32.mrb[16].mxu0 }
 0x7d3   :  { %v2770_v31 = vpop.f32.mrb[17].mxu0 }
 0x7d4   :  { %v7267_v53 = vpack.c.bf16 %v6877_v21, %v2770_v31  ;;  %v7744_v31 = vld [vmem:[%s9233_s19 + $0x30] sm:$0xff] }
 0x7d6   :  { %7269 = vmatpush3.bf16.xpose.msk.msra.mxu1 %vm8647_vm4, %v7267_v53 }
 0x7d7   :  { %7270 = vmatprep.subr.bf16.mxu1 %v7785_v19 }
 0x7da   :  { %v6880_v55 = vpop.f32.mrb[18].mxu0 }
 0x7db   :  { %v2780_v45 = vpop.f32.mrb[19].mxu0 }
 0x7dc   :  { %v7271_v42 = vpack.c.bf16 %v6880_v55, %v2780_v45 }
 0x7de   :  { %7273 = vmatpush3.bf16.xpose.msk.msra.mxu1 %vm8647_vm4, %v7271_v42  ;;  %v7745_v42 = vld [vmem:[%s9233_s19 + $0x28] sm:$0xff] }
 0x7df   :  { %7274 = vmatprep.subr.bf16.mxu1 %v7785_v19 }
 0x7ea   :  { %v6883_v4 = vpop.f32.mrb[20].mxu0 }
 0x7eb   :  { %v2790_v51 = vpop.f32.mrb[21].mxu0 }
 0x7ec   :  { %v7275_v44 = vpack.c.bf16 %v6883_v4, %v2790_v51 }
 0x7ee   :  { %7277 = vmatpush3.bf16.xpose.msk.msra.mxu1 %vm8647_vm4, %v7275_v44 }
 0x7ef   :  { %7278 = vmatprep.subr.bf16.mxu1 %v7785_v19 }
 0x7fa   :  { %v6886_v59 = vpop.f32.mrb[22].mxu0 }
 0x7fb   :  { %v2800_v48 = vpop.f32.mrb[23].mxu0 }
 0x7fc   :  { %v7279_v49 = vpack.c.bf16 %v6886_v59, %v2800_v48 }
 0x7fe   :  { %7281 = vmatpush3.bf16.xpose.msk.msra.mxu1 %vm8647_vm4, %v7279_v49  ;;  %v7746_v49 = vld [vmem:[%s9233_s19 + $0x20] sm:$0xff] }
 0x7ff   :  { %7282 = vmatprep.subr.bf16.mxu1 %v7785_v19 }
 0x80a   :  { %v6889_v50 = vpop.f32.mrb[24].mxu0 }
 0x80b   :  { %v2810_v17 = vpop.f32.mrb[25].mxu0 }
 0x80c   :  { %v7283_v54 = vpack.c.bf16 %v6889_v50, %v2810_v17 }
 0x80e   :  { %7285 = vmatpush3.bf16.xpose.msk.msra.mxu1 %vm8647_vm4, %v7283_v54 }
 0x80f   :  { %7286 = vmatprep.subr.bf16.mxu1 %v7785_v19 }
 0x81a   :  { %v6892_v8 = vpop.f32.mrb[26].mxu0 }
 0x81b   :  { %v2820_v60 = vpop.f32.mrb[27].mxu0 }
 0x81c   :  { %v7287_v58 = vpack.c.bf16 %v6892_v8, %v2820_v60 }
 0x81e   :  { %7289 = vmatpush3.bf16.xpose.msk.msra.mxu1 %vm8647_vm4, %v7287_v58  ;;  %v7747_v58 = vld [vmem:[%s9233_s19 + $0x38] sm:$0xff] }
 0x81f   :  { %7290 = vmatprep.subr.bf16.mxu1 %v7785_v19 }
 0x82a   :  { %v6895_v62 = vpop.f32.mrb[28].mxu0 }
 0x82b   :  { %v2830_v36 = vpop.f32.mrb[29].mxu0 }
 0x82c   :  { %v7291_v63 = vpack.c.bf16 %v6895_v62, %v2830_v36 }
 0x82e   :  { %7293 = vmatpush3.bf16.xpose.msk.msra.mxu1 %vm8647_vm4, %v7291_v63 }
 0x82f   :  { %7294 = vmatprep.subr.bf16.mxu1 %v7785_v19 }
 0x839   :  { %v6898_v41 = vpop.f32.mrb[30].mxu0 }
 0x83a   :  { %v2840_v40 = vpop.f32.mrb[31].mxu0 }
 0x83b   :  { %v7295_v0 = vpack.c.bf16 %v6898_v41, %v2840_v40 }
 0x83d   :  { %7297 = vmatpush3.bf16.xpose.msk.msra.mxu1 %vm8647_vm4, %v7295_v0 }
 0x83e   :  { %7298 = vmatprep.subr.bf16.mxu1 %v7785_v19 }
 0x84c   :  { %v6939_v1 = vpop.f32.mrb[32].mxu0 }
 0x84d   :  { %v8678_v14 = vadd.f32 %v7740_v56, %v6939_v1  ;;  %v3123_v9 = vpop.f32.mrb[33].mxu0  ;;  %v7748_v56 = vld [vmem:[%s9233_s19 + $0x48] sm:$0xff] }
 0x84e   :  { %v8685_v28 = vadd.f32 %v7741_v39, %v3123_v9 }
 0x84f   :  { %v3203_v11 = vadd.f32 %v8678_v14, %v8267_v25  ;;  %v3283_v61 = vadd.f32 %v8678_v14, %v8273_v35 }
 0x850   :  { %v3202_v15 = vadd.f32 %v8685_v28, %v8267_v25  ;;  %v3282_v32 = vadd.f32 %v8685_v28, %v8273_v35 }
 0x851   :  { %3220 = vmax.xlane.f32.xlu1 %v3203_v11 }
 0x854   :  { %v6942_v38 = vpop.f32.mrb[34].mxu0 }
 0x855   :  { %3300 = vmax.xlane.f32.xlu1 %v3283_v61  ;;  %v3133_v27 = vpop.f32.mrb[35].mxu0  ;;  %v8694_v6 = vadd.f32 %v7742_v57, %v6942_v38  ;;  %v7749_v38 = vld [vmem:[%s9233_s19 + $0x40] sm:$0xff] }
 0x856   :  { %v8703_v5 = vadd.f32 %v7743_v16, %v3133_v27  ;;  %v7751_v16 = vld [vmem:[%s9233_s19 + $0x50] sm:$0xff] }
 0x857   :  { %v3205_v2 = vadd.f32 %v8694_v6, %v8267_v25  ;;  %v3285_v20 = vadd.f32 %v8694_v6, %v8273_v35 }
 0x858   :  { %v3204_v55 = vadd.f32 %v8703_v5, %v8267_v25  ;;  %v3284_v51 = vadd.f32 %v8703_v5, %v8273_v35 }
 0x859   :  { %3218 = vmax.xlane.f32.xlu1 %v3202_v15 }
 0x85c   :  { %v6945_v34 = vpop.f32.mrb[36].mxu0 }
 0x85d   :  { %3298 = vmax.xlane.f32.xlu1 %v3282_v32  ;;  %v3143_v18 = vpop.f32.mrb[37].mxu0  ;;  %v8719_v4 = vadd.f32 %v7745_v42, %v6945_v34  ;;  %v7750_v32 = vld [vmem:[%s9233_s19 + $0x58] sm:$0xff] }
 0x85e   :  { %v8728_v50 = vadd.f32 %v7746_v49, %v3143_v18 }
 0x85f   :  { %v3207_v59 = vadd.f32 %v8719_v4, %v8267_v25  ;;  %v3287_v17 = vadd.f32 %v8719_v4, %v8273_v35 }
 0x860   :  { %v3206_v60 = vadd.f32 %v8728_v50, %v8267_v25  ;;  %v3286_v36 = vadd.f32 %v8728_v50, %v8273_v35 }
 0x861   :  { %3224 = vmax.xlane.f32.xlu1 %v3205_v2 }
 0x864   :  { %v6948_v3 = vpop.f32.mrb[38].mxu0 }
 0x865   :  { %3304 = vmax.xlane.f32.xlu1 %v3285_v20  ;;  %v3153_v21 = vpop.f32.mrb[39].mxu0  ;;  %v8737_v62 = vadd.f32 %v7747_v58, %v6948_v3  ;;  %v7755_v58 = vld [vmem:[%s9233_s19 + $0x70] sm:$0xff] }
 0x866   :  { %v8710_v53 = vadd.f32 %v7744_v31, %v3153_v21  ;;  %v7752_v31 = vld [vmem:[%s9233_s19 + $0x68] sm:$0xff] }
 0x867   :  { %v3209_v41 = vadd.f32 %v8737_v62, %v8267_v25  ;;  %v3289_v0 = vadd.f32 %v8737_v62, %v8273_v35 }
 0x868   :  { %v3208_v45 = vadd.f32 %v8710_v53, %v8267_v25  ;;  %v3288_v39 = vadd.f32 %v8710_v53, %v8273_v35 }
 0x869   :  { %3222 = vmax.xlane.f32.xlu1 %v3204_v55 }
 0x86a   :  { %3230 = vmax.xlane.f32.xlu0 %v3208_v45 }
 0x86c   :  { %v6951_v44 = vpop.f32.mrb[40].mxu0 }
 0x86d   :  { %3302 = vmax.xlane.f32.xlu1 %v3284_v51  ;;  %v3163_v48 = vpop.f32.mrb[41].mxu0  ;;  %v8748_v9 = vadd.f32 %v7748_v56, %v6951_v44  ;;  %v8793_v51 = vld [vmem:[%s9223_s9] sm:$0xf] }
 0x86e   :  { %v8757_v27 = vadd.f32 %v7749_v38, %v3163_v48  ;;  %6932 = vmatmul.mubr.msk.bf16.vlgmr.msra.gmra.mrb[32].mxu1 %vm2094_vm3, %v8793_v51  ;;  %v7753_v44 = vld [vmem:[%s9233_s19 + $0x60] sm:$0xff] }
 0x86f   :  { %v3211_v61 = vadd.f32 %v8748_v9, %v8267_v25  ;;  %v3291_v15 = vadd.f32 %v8748_v9, %v8273_v35  ;;  %7019 = vmatprep.mubr.msk.bf16.mxu1 %vm7784_vm0, %v7783_v52 }
 0x870   :  { %v3210_v57 = vadd.f32 %v8757_v27, %v8267_v25  ;;  %v3290_v2 = vadd.f32 %v8757_v27, %v8273_v35 }
 0x871   :  { %3228 = vmax.xlane.f32.xlu1 %v3207_v59 }
 0x874   :  { %v6954_v54 = vpop.f32.mrb[42].mxu0 }
 0x875   :  { %3308 = vmax.xlane.f32.xlu1 %v3287_v17  ;;  %v3173_v8 = vpop.f32.mrb[43].mxu0  ;;  %v8766_v34 = vadd.f32 %v7750_v32, %v6954_v54  ;;  %v7754_v17 = vld [vmem:[%s9233_s19 + $0x78] sm:$0xff] }
 0x876   :  { %v8775_v20 = vadd.f32 %v7751_v16, %v3173_v8 }
 0x877   :  { %v3213_v18 = vadd.f32 %v8766_v34, %v8267_v25  ;;  %v3293_v3 = vadd.f32 %v8766_v34, %v8273_v35 }
 0x878   :  { %v3212_v21 = vadd.f32 %v8775_v20, %v8267_v25  ;;  %v3292_v45 = vadd.f32 %v8775_v20, %v8273_v35 }
 0x879   :  { %3226 = vmax.xlane.f32.xlu1 %v3206_v60 }
 0x87c   :  { %v6957_v63 = vpop.f32.mrb[44].mxu0 }
 0x87d   :  { %3306 = vmax.xlane.f32.xlu1 %v3286_v36  ;;  %v3183_v40 = vpop.f32.mrb[45].mxu0  ;;  %v8784_v55 = vadd.f32 %v7752_v31, %v6957_v63 }
 0x87e   :  { %v8802_v59 = vadd.f32 %v7753_v44, %v3183_v40 }
 0x87f   :  { %v3215_v42 = vadd.f32 %v8784_v55, %v8267_v25  ;;  %v3295_v48 = vadd.f32 %v8784_v55, %v8273_v35 }
 0x880   :  { %v3214_v49 = vadd.f32 %v8802_v59, %v8267_v25  ;;  %v3294_v8 = vadd.f32 %v8802_v59, %v8273_v35 }
 0x881   :  { %3232 = vmax.xlane.f32.xlu1 %v3209_v41 }
 0x884   :  { %v6960_v1 = vpop.f32.mrb[46].mxu0 }
 0x885   :  { %3312 = vmax.xlane.f32.xlu1 %v3289_v0  ;;  %v3193_v11 = vpop.f32.mrb[47].mxu0  ;;  %v8811_v54 = vadd.f32 %v7754_v17, %v6960_v1 }
 0x886   :  { %v8820_v36 = vadd.f32 %v7755_v58, %v3193_v11 }
 0x887   :  { %v3217_v60 = vadd.f32 %v8811_v54, %v8267_v25  ;;  %v3297_v40 = vadd.f32 %v8811_v54, %v8273_v35 }
 0x888   :  { %v3216_v63 = vadd.f32 %v8820_v36, %v8267_v25  ;;  %v3296_v41 = vadd.f32 %v8820_v36, %v8273_v35 }
 0x889   :  { %3310 = vmax.xlane.f32.xlu1 %v3288_v39 }
 0x88d   :  { %3236 = vmax.xlane.f32.xlu1 %v3211_v61 }
 0x891   :  { %3316 = vmax.xlane.f32.xlu1 %v3291_v15 }
 0x895   :  { %3234 = vmax.xlane.f32.xlu1 %v3210_v57 }
 0x899   :  { %3314 = vmax.xlane.f32.xlu1 %v3290_v2 }
 0x89d   :  { %3240 = vmax.xlane.f32.xlu1 %v3213_v18 }
 0x8a1   :  { %3320 = vmax.xlane.f32.xlu1 %v3293_v3 }
 0x8a5   :  { %3238 = vmax.xlane.f32.xlu1 %v3212_v21 }
 0x8a9   :  { %3318 = vmax.xlane.f32.xlu1 %v3292_v45 }
 0x8ad   :  { %3244 = vmax.xlane.f32.xlu1 %v3215_v42 }
 0x8b1   :  { %3324 = vmax.xlane.f32.xlu1 %v3295_v48 }
 0x8b5   :  { %3242 = vmax.xlane.f32.xlu1 %v3214_v49 }
 0x8b9   :  { %3322 = vmax.xlane.f32.xlu1 %v3294_v8 }
 0x8bd   :  { %3248 = vmax.xlane.f32.xlu1 %v3217_v60 }
 0x8c1   :  { %3246 = vmax.xlane.f32.xlu1 %v3216_v63 }
 0x8c5   :  { %3326 = vmax.xlane.f32.xlu1 %v3296_v41 }
 0x8c9   :  { %3328 = vmax.xlane.f32.xlu1 %v3297_v40 }
 0x8de   :  { %v3221_v0 = vpop.xlane.xlu1 %3220 }
 0x8df   :  { %v3251_v56 = vmul.f32 %v3221_v0, %v8251_v7 }
 0x8e2   :  { %v3301_v1 = vpop.xlane.xlu1 %3300 }
 0x8e3   :  { %v3331_v11 = vmul.f32 %v3301_v1, %v8256_v13 }
 0x8e5   :  { %v3347_v39 = vadd.f32 %v3331_v11, %v3251_v56 }
 0x8e6   :  { %v3219_v61 = vpop.xlane.xlu1 %3218 }
 0x8e7   :  { %v3363_v38 = vsub.f32 %v8678_v14, %v3347_v39  ;;  %v3250_v57 = vmul.f32 %v3219_v61, %v8251_v7 }
 0x8e9   :  { %v3380_v25 = vmul.f32 1.442695, %v3363_v38 }
 0x8ea   :  { %v3299_v15 = vpop.xlane.xlu1 %3298 }
 0x8eb   :  { %7664 = vpow2.f32 %v3380_v25  ;;  %v3330_v32 = vmul.f32 %v3299_v15, %v8256_v13 }
 0x8ed   :  { %v3346_v2 = vadd.f32 %v3330_v32, %v3250_v57 }
 0x8ee   :  { %v3225_v35 = vpop.xlane.xlu1 %3224 }
 0x8ef   :  { %v3362_v18 = vsub.f32 %v8685_v28, %v3346_v2  ;;  %v3253_v21 = vmul.f32 %v3225_v35, %v8251_v7 }
 0x8f1   :  { %v3378_v16 = vmul.f32 1.442695, %v3362_v18 }
 0x8f2   :  { %v3305_v3 = vpop.xlane.xlu1 %3304 }
 0x8f3   :  { %7666 = vpow2.f32 %v3378_v16  ;;  %v3333_v31 = vmul.f32 %v3305_v3, %v8256_v13 }
 0x8f5   :  { %v8836_v45 = vpop.eup %7664  ;;  %v3349_v14 = vadd.f32 %v3333_v31, %v3253_v21 }
 0x8f6   :  { %v3223_v42 = vpop.xlane.xlu1 %3222  ;;  %v3411_v44 = vmul.f32 %v8836_v45, %v8251_v7  ;;  %v3491_v28 = vmul.f32 %v8836_v45, %v8256_v13 }
 0x8f7   :  { %v3365_v48 = vsub.f32 %v8694_v6, %v3349_v14  ;;  %v3252_v8 = vmul.f32 %v3223_v42, %v8251_v7 }
 0x8f8   :  { %3428 = vadd.xlane.f32.xlu1 %v3411_v44 }
 0x8f9   :  { %v3384_v49 = vmul.f32 1.442695, %v3365_v48 }
 0x8fa   :  { %v3303_v17 = vpop.xlane.xlu1 %3302 }
 0x8fb   :  { %7668 = vpow2.f32 %v3384_v49  ;;  %v3332_v60 = vmul.f32 %v3303_v17, %v8256_v13 }
 0x8fc   :  { %3508 = vadd.xlane.f32.xlu1 %v3491_v28 }
 0x8fd   :  { %v8845_v58 = vpop.eup %7666  ;;  %v3348_v63 = vadd.f32 %v3332_v60, %v3252_v8 }
 0x8fe   :  { %v3229_v41 = vpop.xlane.xlu1 %3228  ;;  %v3410_v40 = vmul.f32 %v8845_v58, %v8251_v7  ;;  %v3490_v56 = vmul.f32 %v8845_v58, %v8256_v13 }
 0x8ff   :  { %v3364_v6 = vsub.f32 %v8703_v5, %v3348_v63  ;;  %v3255_v25 = vmul.f32 %v3229_v41, %v8251_v7 }
 0x900   :  { %3426 = vadd.xlane.f32.xlu1 %v3410_v40 }
 0x901   :  { %v3382_v0 = vmul.f32 1.442695, %v3364_v6 }
 0x902   :  { %v3309_v1 = vpop.xlane.xlu1 %3308 }
 0x903   :  { %7670 = vpow2.f32 %v3382_v0  ;;  %v3335_v39 = vmul.f32 %v3309_v1, %v8256_v13 }
 0x904   :  { %3506 = vadd.xlane.f32.xlu1 %v3490_v56 }
 0x905   :  { %v8852_v11 = vpop.eup %7668  ;;  %v3351_v5 = vadd.f32 %v3335_v39, %v3255_v25 }
 0x906   :  { %v3227_v61 = vpop.xlane.xlu1 %3226  ;;  %v3493_v38 = vmul.f32 %v8852_v11, %v8256_v13 }
 0x907   :  { %v3254_v57 = vmul.f32 %v3227_v61, %v8251_v7  ;;  %v3367_v35 = vsub.f32 %v8719_v4, %v3351_v5  ;;  %v3231_v4 = vpop.xlane.xlu0 %3230 }
 0x908   :  { %3512 = vadd.xlane.f32.xlu0 %v3493_v38  ;;  %v3256_v8 = vmul.f32 %v3231_v4, %v8251_v7 }
 0x909   :  { %v3388_v31 = vmul.f32 1.442695, %v3367_v35 }
 0x90a   :  { %v3307_v15 = vpop.xlane.xlu1 %3306 }
 0x90b   :  { %v3334_v32 = vmul.f32 %v3307_v15, %v8256_v13 }
 0x90d   :  { %v8860_v2 = vpop.eup %7670  ;;  %v3350_v18 = vadd.f32 %v3334_v32, %v3254_v57 }
 0x90e   :  { %v3233_v16 = vpop.xlane.xlu1 %3232  ;;  %v3412_v3 = vmul.f32 %v8860_v2, %v8251_v7  ;;  %v3492_v44 = vmul.f32 %v8860_v2, %v8256_v13 }
 0x90f   :  { %v3366_v21 = vsub.f32 %v8728_v50, %v3350_v18  ;;  %v3257_v48 = vmul.f32 %v3233_v16, %v8251_v7  ;;  %v3413_v50 = vmul.f32 %v8852_v11, %v8251_v7 }
 0x910   :  { %3430 = vadd.xlane.f32.xlu1 %v3412_v3 }
 0x911   :  { %v3386_v14 = vmul.f32 1.442695, %v3366_v21 }
 0x912   :  { %v3313_v42 = vpop.xlane.xlu1 %3312 }
 0x913   :  { %7672 = vpow2.f32 %v3386_v14  ;;  %v3337_v49 = vmul.f32 %v3313_v42, %v8256_v13 }
 0x914   :  { %3510 = vadd.xlane.f32.xlu1 %v3492_v44  ;;  %7674 = vpow2.f32 %v3388_v31 }
 0x915   :  { %v3353_v17 = vadd.f32 %v3337_v49, %v3257_v48 }
 0x916   :  { %v3311_v28 = vpop.xlane.xlu1 %3310 }
 0x917   :  { %v3336_v60 = vmul.f32 %v3311_v28, %v8256_v13  ;;  %v3369_v63 = vsub.f32 %v8737_v62, %v3353_v17 }
 0x918   :  { %3432 = vadd.xlane.f32.xlu1 %v3413_v50 }
 0x919   :  { %v3352_v41 = vadd.f32 %v3336_v60, %v3256_v8  ;;  %v3392_v1 = vmul.f32 1.442695, %v3369_v63 }
 0x91a   :  { %v3237_v40 = vpop.xlane.xlu1 %3236 }
 0x91b   :  { %v3368_v6 = vsub.f32 %v8710_v53, %v3352_v41  ;;  %v3259_v57 = vmul.f32 %v3237_v40, %v8251_v7 }
 0x91d   :  { %v8876_v0 = vpop.eup %7672  ;;  %v3390_v56 = vmul.f32 1.442695, %v3368_v6 }
 0x91e   :  { %v3317_v39 = vpop.xlane.xlu1 %3316  ;;  %v3494_v61 = vmul.f32 %v8876_v0, %v8256_v13  ;;  %v3414_v38 = vmul.f32 %v8876_v0, %v8251_v7  ;;  %v8882_v25 = vpop.eup %7674 }
 0x91f   :  { %7676 = vpow2.f32 %v3390_v56  ;;  %v3339_v62 = vmul.f32 %v3317_v39, %v8256_v13  ;;  %v3495_v5 = vmul.f32 %v8882_v25, %v8256_v13  ;;  %v3415_v15 = vmul.f32 %v8882_v25, %v8251_v7 }
 0x920   :  { %3514 = vadd.xlane.f32.xlu0 %v3494_v61  ;;  %3434 = vadd.xlane.f32.xlu1 %v3414_v38  ;;  %7678 = vpow2.f32 %v3392_v1 }
 0x921   :  { %v3355_v32 = vadd.f32 %v3339_v62, %v3259_v57 }
 0x922   :  { %v3235_v53 = vpop.xlane.xlu1 %3234 }
 0x923   :  { %v3258_v18 = vmul.f32 %v3235_v53, %v8251_v7  ;;  %v3371_v21 = vsub.f32 %v8748_v9, %v3355_v32 }
 0x924   :  { %3516 = vadd.xlane.f32.xlu0 %v3495_v5  ;;  %3436 = vadd.xlane.f32.xlu1 %v3415_v15 }
 0x925   :  { %v3396_v4 = vmul.f32 1.442695, %v3371_v21 }
 0x926   :  { %v3315_v35 = vpop.xlane.xlu1 %3314 }
 0x927   :  { %v3338_v16 = vmul.f32 %v3315_v35, %v8256_v13 }
 0x929   :  { %v8892_v3 = vpop.eup %7676  ;;  %v3354_v31 = vadd.f32 %v3338_v16, %v3258_v18 }
 0x92a   :  { %v3241_v14 = vpop.xlane.xlu1 %3240  ;;  %v3496_v42 = vmul.f32 %v8892_v3, %v8256_v13  ;;  %v3416_v44 = vmul.f32 %v8892_v3, %v8251_v7  ;;  %v8899_v48 = vpop.eup %7678 }
 0x92b   :  { %v3370_v49 = vsub.f32 %v8757_v27, %v3354_v31  ;;  %v3497_v9 = vmul.f32 %v8899_v48, %v8256_v13  ;;  %v3417_v50 = vmul.f32 %v8899_v48, %v8251_v7  ;;  %v3261_v27 = vmul.f32 %v3241_v14, %v8251_v7 }
 0x92c   :  { %3518 = vadd.xlane.f32.xlu0 %v3496_v42  ;;  %3438 = vadd.xlane.f32.xlu1 %v3416_v44 }
 0x92d   :  { %v3394_v17 = vmul.f32 1.442695, %v3370_v49 }
 0x92e   :  { %v3321_v28 = vpop.xlane.xlu1 %3320 }
 0x92f   :  { %7680 = vpow2.f32 %v3394_v17  ;;  %v3341_v8 = vmul.f32 %v3321_v28, %v8256_v13 }
 0x930   :  { %3520 = vadd.xlane.f32.xlu0 %v3497_v9  ;;  %3440 = vadd.xlane.f32.xlu1 %v3417_v50  ;;  %7682 = vpow2.f32 %v3396_v4 }
 0x931   :  { %v3357_v63 = vadd.f32 %v3341_v8, %v3261_v27 }
 0x932   :  { %v3239_v60 = vpop.xlane.xlu1 %3238 }
 0x933   :  { %v3260_v40 = vmul.f32 %v3239_v60, %v8251_v7  ;;  %v3373_v56 = vsub.f32 %v8766_v34, %v3357_v63 }
 0x935   :  { %v3400_v15 = vmul.f32 1.442695, %v3373_v56 }
 0x936   :  { %v3319_v41 = vpop.xlane.xlu1 %3318 }
 0x937   :  { %v3340_v6 = vmul.f32 %v3319_v41, %v8256_v13 }
 0x939   :  { %v8910_v1 = vpop.eup %7680  ;;  %v3356_v39 = vadd.f32 %v3340_v6, %v3260_v40 }
 0x93a   :  { %v3245_v61 = vpop.xlane.xlu1 %3244  ;;  %v3498_v38 = vmul.f32 %v8910_v1, %v8256_v13  ;;  %v3418_v62 = vmul.f32 %v8910_v1, %v8251_v7  ;;  %v8917_v53 = vpop.eup %7682 }
 0x93b   :  { %v3372_v5 = vsub.f32 %v8775_v20, %v3356_v39  ;;  %v3499_v34 = vmul.f32 %v8917_v53, %v8256_v13  ;;  %v3419_v35 = vmul.f32 %v8917_v53, %v8251_v7  ;;  %v3263_v20 = vmul.f32 %v3245_v61, %v8251_v7 }
 0x93c   :  { %3522 = vadd.xlane.f32.xlu0 %v3498_v38  ;;  %3442 = vadd.xlane.f32.xlu1 %v3418_v62 }
 0x93d   :  { %v3398_v57 = vmul.f32 1.442695, %v3372_v5 }
 0x93e   :  { %v3325_v32 = vpop.xlane.xlu1 %3324 }
 0x93f   :  { %7684 = vpow2.f32 %v3398_v57  ;;  %v3343_v18 = vmul.f32 %v3325_v32, %v8256_v13 }
 0x940   :  { %3524 = vadd.xlane.f32.xlu0 %v3499_v34  ;;  %3444 = vadd.xlane.f32.xlu1 %v3419_v35  ;;  %7686 = vpow2.f32 %v3400_v15 }
 0x941   :  { %v3359_v21 = vadd.f32 %v3343_v18, %v3263_v20 }
 0x942   :  { %v3243_v16 = vpop.xlane.xlu1 %3242 }
 0x943   :  { %v3262_v14 = vmul.f32 %v3243_v16, %v8251_v7  ;;  %v3375_v49 = vsub.f32 %v8784_v55, %v3359_v21 }
 0x945   :  { %v3404_v60 = vmul.f32 1.442695, %v3375_v49 }
 0x946   :  { %v3323_v31 = vpop.xlane.xlu1 %3322 }
 0x947   :  { %v3342_v42 = vmul.f32 %v3323_v31, %v8256_v13 }
 0x949   :  { %v8928_v44 = vpop.eup %7684  ;;  %v3358_v4 = vadd.f32 %v3342_v42, %v3262_v14 }
 0x94a   :  { %v3249_v17 = vpop.xlane.xlu1 %3248  ;;  %v3500_v28 = vmul.f32 %v8928_v44, %v8256_v13  ;;  %v3420_v9 = vmul.f32 %v8928_v44, %v8251_v7  ;;  %v8935_v50 = vpop.eup %7686 }
 0x94b   :  { %v3374_v8 = vsub.f32 %v8802_v59, %v3358_v4  ;;  %v3501_v55 = vmul.f32 %v8935_v50, %v8256_v13  ;;  %v3421_v41 = vmul.f32 %v8935_v50, %v8251_v7  ;;  %v3265_v61 = vmul.f32 %v3249_v17, %v8251_v7  ;;  %v2061_v4 = vld [vmem:[%s9224_s10] sm:$0xff]  ;;  %v8975_v17 = vpop.f32.mrb[32].mxu1 }
 0x94c   :  { %3526 = vadd.xlane.f32.xlu0 %v3500_v28  ;;  %3446 = vadd.xlane.f32.xlu1 %v3420_v9  ;;  %v6933_v28 = vpop.f32.mrb[33].mxu1 }
 0x94d   :  { %v3402_v27 = vmul.f32 1.442695, %v3374_v8  ;;  %v2974_v9 = vpop.f32.mrb[34].mxu1 }
 0x94e   :  { %v3247_v63 = vpop.xlane.xlu1 %3246  ;;  %v6934_v8 = vpop.f32.mrb[35].mxu1 }
 0x94f   :  { %7688 = vpow2.f32 %v3402_v27  ;;  %v3264_v6 = vmul.f32 %v3247_v63, %v8251_v7 }
 0x950   :  { %3528 = vadd.xlane.f32.xlu0 %v3501_v55  ;;  %3448 = vadd.xlane.f32.xlu1 %v3421_v41  ;;  %7690 = vpow2.f32 %v3404_v60 }
 0x952   :  { %v3327_v40 = vpop.xlane.xlu1 %3326 }
 0x953   :  { %v3344_v59 = vmul.f32 %v3327_v40, %v8256_v13 }
 0x955   :  { %v3360_v56 = vadd.f32 %v3344_v59, %v3264_v6 }
 0x956   :  { %v3329_v39 = vpop.xlane.xlu1 %3328 }
 0x957   :  { %v3376_v38 = vsub.f32 %v8820_v36, %v3360_v56  ;;  %v3345_v62 = vmul.f32 %v3329_v39, %v8256_v13 }
 0x959   :  { %v8947_v5 = vpop.eup %7688  ;;  %v3406_v15 = vmul.f32 1.442695, %v3376_v38  ;;  %v3361_v57 = vadd.f32 %v3345_v62, %v3265_v61 }
 0x95a   :  { %v3502_v32 = vmul.f32 %v8947_v5, %v8256_v13  ;;  %v3422_v34 = vmul.f32 %v8947_v5, %v8251_v7  ;;  %v8953_v35 = vpop.eup %7690 }
 0x95b   :  { %7692 = vpow2.f32 %v3406_v15  ;;  %v3377_v18 = vsub.f32 %v8811_v54, %v3361_v57  ;;  %v3503_v16 = vmul.f32 %v8953_v35, %v8256_v13  ;;  %v3423_v20 = vmul.f32 %v8953_v35, %v8251_v7 }
 0x95c   :  { %3530 = vadd.xlane.f32.xlu0 %v3502_v32  ;;  %3450 = vadd.xlane.f32.xlu1 %v3422_v34 }
 0x95d   :  { %v3408_v36 = vmul.f32 1.442695, %v3377_v18 }
 0x95f   :  { %7694 = vpow2.f32 %v3408_v36 }
 0x960   :  { %3532 = vadd.xlane.f32.xlu0 %v3503_v16  ;;  %3452 = vadd.xlane.f32.xlu1 %v3423_v20 }
 0x965   :  { %v8960_v21 = vpop.eup %7692 }
 0x966   :  { %v3504_v31 = vmul.f32 %v8960_v21, %v8256_v13  ;;  %v3424_v54 = vmul.f32 %v8960_v21, %v8251_v7 }
 0x968   :  { %3534 = vadd.xlane.f32.xlu0 %v3504_v31  ;;  %3454 = vadd.xlane.f32.xlu1 %v3424_v54 }
 0x969   :  { %v8966_v14 = vpop.eup %7694 }
 0x96a   :  { %v3505_v42 = vmul.f32 %v8966_v14, %v8256_v13  ;;  %v3425_v49 = vmul.f32 %v8966_v14, %v8251_v7 }
 0x96c   :  { %3536 = vadd.xlane.f32.xlu0 %v3505_v42  ;;  %3456 = vadd.xlane.f32.xlu1 %v3425_v49 }
 0x97d   :  { %2851 = vperm.xlu1 %7504, %v2061_v4  }
 0x985   :  { %v3429_v60 = vpop.xlane.xlu1 %3428 }
 0x986   :  { %v3459_v41 = vmul.f32 %v3429_v60, %v8251_v7 }
 0x989   :  { %v3509_v27 = vpop.xlane.xlu1 %3508 }
 0x98a   :  { %v3539_v63 = vmul.f32 %v3509_v27, %v8256_v13 }
 0x98c   :  { %v3555_v40 = vadd.f32 %v3539_v63, %v3459_v41 }
 0x98d   :  { %v3427_v55 = vpop.xlane.xlu1 %3426 }
 0x98e   :  { %v3458_v59 = vmul.f32 %v3427_v55, %v8251_v7  ;;  %7696 = vrcp.f32 %v3555_v40 }
 0x991   :  { %v3507_v6 = vpop.xlane.xlu1 %3506 }
 0x992   :  { %v3538_v56 = vmul.f32 %v3507_v6, %v8256_v13 }
 0x994   :  { %v3554_v39 = vadd.f32 %v3538_v56, %v3458_v59 }
 0x995   :  { %v3513_v36 = vpop.xlane.xlu0 %3512 }
 0x996   :  { %7698 = vrcp.f32 %v3554_v39  ;;  %v3541_v31 = vmul.f32 %v3513_v36, %v8256_v13 }
 0x998   :  { %v7697_v38 = vpop.eup %7696 }
 0x999   :  { %v3587_v18 = vmul.f32 %v7697_v38, %v8836_v45 }
 0x99d   :  { %v3431_v61 = vpop.xlane.xlu1 %3430 }
 0x99e   :  { %v3460_v32 = vmul.f32 %v3431_v61, %v8251_v7 }
 0x9a0   :  { %v7699_v62 = vpop.eup %7698 }
 0x9a1   :  { %v3511_v15 = vpop.xlane.xlu1 %3510  ;;  %v3586_v57 = vmul.f32 %v7699_v62, %v8845_v58 }
 0x9a2   :  { %v3540_v34 = vmul.f32 %v3511_v15, %v8256_v13 }
 0x9a3   :  { %6963 = vmatprep.mubr.f32.mxu0 %v3586_v57 }
 0x9a4   :  { %v3556_v16 = vadd.f32 %v3540_v34, %v3460_v32  ;;  %6964 = vmatmul.mubr.f32.vlgmr.msra.gmra.mrb[48].mxu0 %v3587_v18 }
 0x9a5   :  { %v3433_v20 = vpop.xlane.xlu1 %3432 }
 0x9a6   :  { %7700 = vrcp.f32 %v3556_v16  ;;  %v3461_v54 = vmul.f32 %v3433_v20, %v8251_v7 }
 0x9a8   :  { %v3557_v42 = vadd.f32 %v3541_v31, %v3461_v54 }
 0x9aa   :  { %7702 = vrcp.f32 %v3557_v42 }
 0x9ad   :  { %v3435_v49 = vpop.xlane.xlu1 %3434  ;;  %v3515_v58 = vpop.xlane.xlu0 %3514 }
 0x9ae   :  { %v3462_v4 = vmul.f32 %v3435_v49, %v8251_v7  ;;  %v3542_v28 = vmul.f32 %v3515_v58, %v8256_v13 }
 0x9b0   :  { %v7701_v9 = vpop.eup %7700  ;;  %v3558_v45 = vadd.f32 %v3542_v28, %v3462_v4 }
 0x9b1   :  { %v3437_v8 = vpop.xlane.xlu1 %3436  ;;  %v3517_v60 = vpop.xlane.xlu0 %3516  ;;  %v3588_v27 = vmul.f32 %v7701_v9, %v8860_v2 }
 0x9b2   :  { %7704 = vrcp.f32 %v3558_v45  ;;  %v3463_v63 = vmul.f32 %v3437_v8, %v8251_v7  ;;  %v3543_v55 = vmul.f32 %v3517_v60, %v8256_v13 }
 0x9b3   :  { %6966 = vmatprep.mubr.f32.mxu0 %v3588_v27 }
 0x9b4   :  { %v7703_v41 = vpop.eup %7702  ;;  %v3559_v40 = vadd.f32 %v3543_v55, %v3463_v63 }
 0x9b5   :  { %v3589_v6 = vmul.f32 %v7703_v41, %v8852_v11 }
 0x9b6   :  { %7706 = vrcp.f32 %v3559_v40 }
 0x9b7   :  { %6967 = vmatmul.mubr.f32.gmra.mrb[50].mxu0 %v3589_v6 }
 0x9b9   :  { %v3439_v59 = vpop.xlane.xlu1 %3438  ;;  %v3519_v56 = vpop.xlane.xlu0 %3518 }
 0x9ba   :  { %v3464_v39 = vmul.f32 %v3439_v59, %v8251_v7  ;;  %v3544_v61 = vmul.f32 %v3519_v56, %v8256_v13 }
 0x9bc   :  { %v7705_v38 = vpop.eup %7704  ;;  %v3560_v2 = vadd.f32 %v3544_v61, %v3464_v39 }
 0x9bd   :  { %v3441_v62 = vpop.xlane.xlu1 %3440  ;;  %v3521_v15 = vpop.xlane.xlu0 %3520  ;;  %v3590_v57 = vmul.f32 %v7705_v38, %v8876_v0 }
 0x9be   :  { %7708 = vrcp.f32 %v3560_v2  ;;  %v3465_v32 = vmul.f32 %v3441_v62, %v8251_v7  ;;  %v3545_v34 = vmul.f32 %v3521_v15, %v8256_v13 }
 0x9bf   :  { %6969 = vmatprep.mubr.f32.mxu0 %v3590_v57 }
 0x9c0   :  { %v7707_v11 = vpop.eup %7706  ;;  %v3561_v18 = vadd.f32 %v3545_v34, %v3465_v32 }
 0x9c1   :  { %v3591_v36 = vmul.f32 %v7707_v11, %v8882_v25 }
 0x9c2   :  { %7710 = vrcp.f32 %v3561_v18 }
 0x9c3   :  { %6970 = vmatmul.mubr.f32.gmra.mrb[52].mxu0 %v3591_v36 }
 0x9c8   :  { %v7709_v16 = vpop.eup %7708 }
 0x9c9   :  { %v3443_v20 = vpop.xlane.xlu1 %3442  ;;  %v3523_v31 = vpop.xlane.xlu0 %3522  ;;  %v3592_v54 = vmul.f32 %v7709_v16, %v8892_v3 }
 0x9ca   :  { %v3466_v42 = vmul.f32 %v3443_v20, %v8251_v7  ;;  %v3546_v0 = vmul.f32 %v3523_v31, %v8256_v13 }
 0x9cb   :  { %6972 = vmatprep.mubr.f32.mxu0 %v3592_v54 }
 0x9cc   :  { %v7711_v49 = vpop.eup %7710  ;;  %v3562_v58 = vadd.f32 %v3546_v0, %v3466_v42 }
 0x9cd   :  { %v3445_v4 = vpop.xlane.xlu1 %3444  ;;  %v3525_v28 = vpop.xlane.xlu0 %3524  ;;  %v3593_v9 = vmul.f32 %v7711_v49, %v8899_v48 }
 0x9ce   :  { %7712 = vrcp.f32 %v3562_v58  ;;  %v3467_v25 = vmul.f32 %v3445_v4, %v8251_v7  ;;  %v3547_v45 = vmul.f32 %v3525_v28, %v8256_v13 }
 0x9cf   :  { %6973 = vmatmul.mubr.f32.gmra.mrb[54].mxu0 %v3593_v9 }
 0x9d0   :  { %v3563_v8 = vadd.f32 %v3547_v45, %v3467_v25 }
 0x9d2   :  { %7714 = vrcp.f32 %v3563_v8 }
 0x9d8   :  { %v7713_v3 = vpop.eup %7712 }
 0x9d9   :  { %v3447_v60 = vpop.xlane.xlu1 %3446  ;;  %v3527_v27 = vpop.xlane.xlu0 %3526  ;;  %v3594_v63 = vmul.f32 %v7713_v3, %v8910_v1 }
 0x9da   :  { %v3468_v55 = vmul.f32 %v3447_v60, %v8251_v7  ;;  %v3548_v41 = vmul.f32 %v3527_v27, %v8256_v13 }
 0x9db   :  { %6975 = vmatprep.mubr.f32.mxu0 %v3594_v63  ;;  %v7756_v63 = vld [vmem:[%s9248_s2] sm:$0xff] }
 0x9dc   :  { %v7715_v40 = vpop.eup %7714  ;;  %v3564_v48 = vadd.f32 %v3548_v41, %v3468_v55 }
 0x9dd   :  { %v3449_v6 = vpop.xlane.xlu1 %3448  ;;  %v3529_v59 = vpop.xlane.xlu0 %3528  ;;  %v3595_v56 = vmul.f32 %v7715_v40, %v8917_v53 }
 0x9de   :  { %7716 = vrcp.f32 %v3564_v48  ;;  %v3469_v39 = vmul.f32 %v3449_v6, %v8251_v7  ;;  %v3549_v61 = vmul.f32 %v3529_v59, %v8256_v13 }
 0x9df   :  { %6976 = vmatmul.mubr.f32.gmra.mrb[56].mxu0 %v3595_v56 }
 0x9e0   :  { %v3565_v38 = vadd.f32 %v3549_v61, %v3469_v39 }
 0x9e2   :  { %7718 = vrcp.f32 %v3565_v38 }
 0x9e8   :  { %v7717_v1 = vpop.eup %7716 }
 0x9e9   :  { %v3451_v2 = vpop.xlane.xlu1 %3450  ;;  %v3531_v62 = vpop.xlane.xlu0 %3530  ;;  %v3596_v15 = vmul.f32 %v7717_v1, %v8928_v44 }
 0x9ea   :  { %v3470_v57 = vmul.f32 %v3451_v2, %v8251_v7  ;;  %v3550_v32 = vmul.f32 %v3531_v62, %v8256_v13 }
 0x9eb   :  { %6978 = vmatprep.mubr.f32.mxu0 %v3596_v15 }
 0x9ec   :  { %v7719_v34 = vpop.eup %7718  ;;  %v3566_v53 = vadd.f32 %v3550_v32, %v3470_v57 }
 0x9ed   :  { %v3453_v11 = vpop.xlane.xlu1 %3452  ;;  %v3533_v18 = vpop.xlane.xlu0 %3532  ;;  %v3597_v36 = vmul.f32 %v7719_v34, %v8935_v50 }
 0x9ee   :  { %7720 = vrcp.f32 %v3566_v53  ;;  %v3471_v16 = vmul.f32 %v3453_v11, %v8251_v7  ;;  %v3551_v20 = vmul.f32 %v3533_v18, %v8256_v13 }
 0x9ef   :  { %6979 = vmatmul.mubr.f32.gmra.mrb[58].mxu0 %v3597_v36 }
 0x9f0   :  { %v3567_v31 = vadd.f32 %v3551_v20, %v3471_v16 }
 0x9f2   :  { %7722 = vrcp.f32 %v3567_v31 }
 0x9f5   :  { %v3455_v44 = vpop.xlane.xlu1 %3454  ;;  %v3535_v54 = vpop.xlane.xlu0 %3534 }
 0x9f6   :  { %v3472_v42 = vmul.f32 %v3455_v44, %v8251_v7  ;;  %v3552_v0 = vmul.f32 %v3535_v54, %v8256_v13 }
 0x9f8   :  { %v7721_v49 = vpop.eup %7720  ;;  %v3568_v58 = vadd.f32 %v3552_v0, %v3472_v42  ;;  %v7757_v42 = vld [vmem:[%s9248_s2 + $0x8] sm:$0xff] }
 0x9f9   :  { %v3457_v4 = vpop.xlane.xlu1 %3456  ;;  %v3537_v28 = vpop.xlane.xlu0 %3536  ;;  %v3598_v50 = vmul.f32 %v7721_v49, %v8947_v5 }
 0x9fa   :  { %7724 = vrcp.f32 %v3568_v58  ;;  %v3473_v9 = vmul.f32 %v3457_v4, %v8251_v7  ;;  %v3553_v25 = vmul.f32 %v3537_v28, %v8256_v13 }
 0x9fb   :  { %6981 = vmatprep.mubr.f32.mxu0 %v3598_v50 }
 0x9fc   :  { %v7723_v45 = vpop.eup %7722  ;;  %v3569_v8 = vadd.f32 %v3553_v25, %v3473_v9 }
 0x9fd   :  { %v2852_v3 = vpop.permute.xlu1 %2851  ;;  %v3599_v60 = vmul.f32 %v7723_v45, %v8953_v35 }
 0x9fe   :  { %7726 = vrcp.f32 %v3569_v8  ;;  %v2972_v27 = vadd.f32 %v8975_v17, %v2852_v3 }
 0x9ff   :  { %6982 = vmatmul.mubr.f32.gmra.mrb[60].mxu0 %v3599_v60 }
 0xa00   :  { %v9027_v5 = vadd.f32 %v7756_v63, %v2972_v27 }
 0xa02   :  { %3875 = vadd.xlane.f32.xlu0 %v9027_v5 }
 0xa04   :  { %v7725_v7 = vpop.eup %7724 }
 0xa05   :  { %v3600_v13 = vmul.f32 %v7725_v7, %v8960_v21 }
 0xa07   :  { %6984 = vmatprep.mubr.f32.mxu0 %v3600_v13 }
 0xa08   :  { %v7727_v55 = vpop.eup %7726 }
 0xa09   :  { %v3601_v41 = vmul.f32 %v7727_v55, %v8966_v14 }
 0xa0b   :  { %6985 = vmatmul.mubr.f32.gmra.mrb[62].mxu0 %v3601_v41 }
 0xa0c   :  { %7027 = vmatprep.mubr.f32.mxu0 %v8106_v26 }
 0xa77   :  { %v6965_v35 = vpop.f32.mrb[48].mxu0 }
 0xa78   :  { %v3668_v17 = vpop.f32.mrb[49].mxu0 }
 0xa79   :  { %v7299_v40 = vpack.c.bf16 %v6965_v35, %v3668_v17 }
 0xa7b   :  { %7301 = vmatpush3.bf16.xpose.msk.msra.mxu1 %vm8647_vm4, %v7299_v40  ;;  %v1605_v40 = vmul.f32 0.00390625, %v8293_v47 }
 0xa7c   :  { %7302 = vmatprep.subr.bf16.mxu1 %v7785_v19 }
 0xa8a   :  { %v6968_v48 = vpop.f32.mrb[50].mxu0 }
 0xa8b   :  { %v3678_v6 = vpop.f32.mrb[51].mxu0 }
 0xa8c   :  { %v7303_v59 = vpack.c.bf16 %v6968_v48, %v3678_v6 }
 0xa8e   :  { %7305 = vmatpush3.bf16.xpose.msk.msra.mxu1 %vm8647_vm4, %v7303_v59 }
 0xa8f   :  { %7306 = vmatprep.subr.bf16.mxu1 %v7785_v19  ;;  %v3876_v58 = vpop.xlane.xlu0 %3875 }
 0xa90   :  { %v3880_v4 = vand.u32 4294901760, %v3876_v58 }
 0xa92   :  { %v3968_v28 = vsub.f32 %v3876_v58, %v3880_v4 }
 0xa94   :  { %v3969_v37 = vand.u32 4294901760, %v3968_v28 }
 0xa96   :  { %v6971_v21 = vpop.f32.mrb[52].mxu0 }
 0xa97   :  { %v3688_v14 = vpop.f32.mrb[53].mxu0 }
 0xa98   :  { %v7307_v56 = vpack.c.bf16 %v6971_v21, %v3688_v14 }
 0xa9a   :  { %7309 = vmatpush3.bf16.xpose.msk.msra.mxu1 %vm8647_vm4, %v7307_v56  ;;  %v1606_v56 = vmul.f32 0.00390625, %v8291_v46  ;;  %v567_v46 = vld [vmem:[%s9229_s15 + $0x8] sm:$0xff] }
 0xa9b   :  { %7310 = vmatprep.subr.bf16.mxu1 %v7785_v19 }
 0xaa2   :  { %v6974_v39 = vpop.f32.mrb[54].mxu0 }
 0xaa3   :  { %v3698_v61 = vpop.f32.mrb[55].mxu0 }
 0xaa4   :  { %v7311_v38 = vpack.c.bf16 %v6974_v39, %v3698_v61  ;;  %v1607_v39 = vadd.f32 1e-05, %v1605_v40  ;;  %v4943_v40 = vld [vmem:[%s9226_s12 + $0x10] sm:$0xff] }
 0xaa6   :  { %7313 = vmatpush3.bf16.xpose.msk.msra.mxu1 %vm8647_vm4, %v7311_v38  ;;  %v1608_v38 = vadd.f32 1e-05, %v1606_v56  ;;  %7728 = vrsqrt.f32 %v1607_v39 }
 0xaa7   :  { %7314 = vmatprep.subr.bf16.mxu1 %v7785_v19 }
 0xaa8   :  { %7730 = vrsqrt.f32 %v1608_v38 }
 0xab0   :  { %v7729_v47 = vpop.eup %7728 }
 0xab2   :  { %v6977_v1 = vpop.f32.mrb[56].mxu0 }
 0xab3   :  { %v3708_v2 = vpop.f32.mrb[57].mxu0 }
 0xab4   :  { %v7315_v62 = vpack.c.bf16 %v6977_v1, %v3708_v2  ;;  %v7731_v2 = vpop.eup %7730 }
 0xab6   :  { %7317 = vmatpush3.bf16.xpose.msk.msra.mxu1 %vm8647_vm4, %v7315_v62  ;;  %v568_v62 = vld [vmem:[%s9230_s16] sm:$0xff] }
 0xab7   :  { %7318 = vmatprep.subr.bf16.mxu1 %v7785_v19 }
 0xac2   :  { %v6980_v15 = vpop.f32.mrb[58].mxu0 }
 0xac3   :  { %v3718_v57 = vpop.f32.mrb[59].mxu0 }
 0xac4   :  { %v7319_v32 = vpack.c.bf16 %v6980_v15, %v3718_v57  ;;  %v1612_v15 = vmul.f32 %v7731_v2, %v567_v46  ;;  %v569_v57 = vld [vmem:[%s9230_s16 + $0x8] sm:$0xff] }
 0xac6   :  { %7321 = vmatpush3.bf16.xpose.msk.msra.mxu1 %vm8647_vm4, %v7319_v32  ;;  %v6390_v32 = vld [vmem:[%s9230_s16 + $0x18] sm:$0xff] }
 0xac7   :  { %7322 = vmatprep.subr.bf16.mxu1 %v7785_v19 }
 0xad2   :  { %v6983_v34 = vpop.f32.mrb[60].mxu0 }
 0xad3   :  { %v3728_v53 = vpop.f32.mrb[61].mxu0 }
 0xad4   :  { %v7323_v11 = vpack.c.bf16 %v6983_v34, %v3728_v53  ;;  %v4942_v34 = vld [vmem:[%s9226_s12 + $0x8] sm:$0xff]  ;;  %v4944_v53 = vld [vmem:[%s9226_s12 + $0x18] sm:$0xff] }
 0xad6   :  { %7325 = vmatpush3.bf16.xpose.msk.msra.mxu1 %vm8647_vm4, %v7323_v11  ;;  %v5069_v11 = vld [vmem:[%s9228_s14 + $0x8] sm:$0xff] }
 0xad7   :  { %7326 = vmatprep.subr.bf16.mxu1 %v7785_v19 }
 0xade   :  { %v6986_v18 = vpop.f32.mrb[62].mxu0 }
 0xadf   :  { %v3738_v36 = vpop.f32.mrb[63].mxu0 }
 0xae0   :  { %v7327_v16 = vpack.c.bf16 %v6986_v18, %v3738_v36 }
 0xae2   :  { %7329 = vmatpush3.bf16.xpose.msk.msra.mxu1 %vm8647_vm4, %v7327_v16 }
 0xae9   :  { %7020 = vmatmul.mubr.msk.bf16.vlgmr.msra.gmra.mrb[36].mxu1 %vm2094_vm3, %v8793_v51  ;;  %v3970_v51 = vsub.f32 %v3968_v28, %v3969_v37 }
 0xaeb   :  { %v3971_v60 = vand.u32 4294901760, %v3970_v51 }
 0xbbc   :  { %v3861_v20 = vpop.f32.mrb[36].mxu1 }
 0xbbd   :  { %v3862_v31 = vadd.f32 %v3861_v20, %v2852_v3  ;;  %v7021_v44 = vpop.f32.mrb[37].mxu1 }
 0xbbe   :  { %v3864_v54 = vpop.f32.mrb[38].mxu1 }
 0xbbf   :  { %v3868_v0 = vadd.f32 %v7757_v42, %v3862_v31  ;;  %v7022_v49 = vpop.f32.mrb[39].mxu1 }
 0xbc1   :  { %3877 = vadd.xlane.f32.xlu0 %v3868_v0 }
 0xc4e   :  { %v3878_v50 = vpop.xlane.xlu0 %3877 }
 0xc4f   :  { %v3883_v9 = vand.u32 4294901760, %v3878_v50 }
 0xc51   :  { %v7330_v25 = vpack.c.bf16 %v3883_v9, %v3880_v4  ;;  %v3975_v45 = vsub.f32 %v3878_v50, %v3883_v9 }
 0xc53   :  { %v3976_v8 = vand.u32 4294901760, %v3975_v45  ;;  %7331 = vmatprep.subr.bf16.mxu0 %v7330_v25  ;;  %v7338_v7 = vpack.c.bf16 %v3975_v45, %v3968_v28 }
 0xc54   :  { %7333 = vmatpush3.bf16.msra.mxu0 %v7330_v25 }
 0xc55   :  { %v3977_v3 = vsub.f32 %v3975_v45, %v3976_v8  ;;  %v7346_v13 = vpack.c.bf16 %v3976_v8, %v3969_v37 }
 0xc57   :  { %7028 = vmatmul.mubr.f32.vlgmr.msra.gmra.mrb[64].mxu0 %v8124_v43  ;;  %v3978_v27 = vand.u32 4294901760, %v3977_v3 }
 0xc58   :  { %7034 = vmatprep.mubr.f32.mxu0 %v8096_v22 }
 0xc59   :  { %v7334_v63 = vpack.c.bf16 %v3978_v27, %v3971_v60  ;;  %v6388_v27 = vld [vmem:[%s9229_s15 + $0x18] sm:$0xff] }
 0xc5b   :  { %7335 = vmatprep.subr.bf16.mxu0 %v7334_v63 }
 0xc5c   :  { %7337 = vmatpush3.bf16.msra.mxu0 %v7334_v63 }
 0xc5d   :  { %7339 = vmatprep.subr.bf16.mxu0 %v7338_v7 }
 0xc5f   :  { %7035 = vmatmul.mubr.f32.vlgmr.msra.gmra.mrb[64].mxu0 %v8114_v29 }
 0xc60   :  { %7341 = vmatpush3.bf16.msra.mxu0 %v7338_v7  ;;  %7041 = vmatprep.mubr.f32.mxu0 %v8099_v23 }
 0xc61   :  { %7343 = vmatprep.subr.bf16.mxu0 %v7330_v25 }
 0xc67   :  { %7042 = vmatmul.mubr.f32.vlgmr.msra.gmra.mrb[64].mxu0 %v8117_v30 }
 0xc68   :  { %7345 = vmatpush3.bf16.msra.mxu0 %v7330_v25  ;;  %7048 = vmatprep.mubr.f32.mxu0 %v8102_v24 }
 0xc69   :  { %7347 = vmatprep.subr.bf16.mxu0 %v7346_v13 }
 0xc6f   :  { %7049 = vmatmul.mubr.f32.vlgmr.msra.gmra.mrb[64].mxu0 %v8120_v33 }
 0xc70   :  { %7349 = vmatpush3.bf16.msra.mxu0 %v7346_v13  ;;  %7055 = vmatprep.mubr.f32.mxu0 %v8096_v22 }
 0xc71   :  { %7351 = vmatprep.subr.bf16.mxu0 %v7330_v25 }
 0xc77   :  { %7056 = vmatmul.mubr.f32.vlgmr.msra.gmra.mrb[64].mxu0 %v8114_v29 }
 0xc78   :  { %7353 = vmatpush3.bf16.msra.mxu0 %v7330_v25  ;;  %7062 = vmatprep.mubr.f32.mxu0 %v8096_v22 }
 0xc7f   :  { %7063 = vmatmul.mubr.f32.vlgmr.msra.gmra.mrb[64].mxu0 %v8114_v29 }
 0xc80   :  { %7069 = vmatprep.mubr.f32.mxu0 %v8106_v26 }
 0xd52   :  { %v7064_v55 = vpop.f32.mrb[64].mxu0 }
 0xd53   :  { %v4382_v41 = vmul.f32 0.00390625, %v7064_v55  ;;  %v4371_v35 = vpop.f32.mrb[65].mxu0  ;;  %v6387_v55 = vld [vmem:[%s9229_s15 + $0x10] sm:$0xff] }
 0xd54   :  { %v4381_v17 = vmul.f32 0.00390625, %v4371_v35  ;;  %v6389_v35 = vld [vmem:[%s9230_s16 + $0x10] sm:$0xff] }
 0xd55   :  { %4390 = vperm.xlu1 %7504, %v4382_v41  }
 0xd56   :  { %4385 = vperm.xlu0 %7503, %v4381_v17   ;;  %v4941_v17 = vld [vmem:[%s9226_s12] sm:$0xff] }
 0xdd4   :  { %v4391_v48 = vpop.permute.xlu1 %4390 }
 0xdd5   :  { %v9074_v6 = vsub.f32 %v3868_v0, %v4391_v48  ;;  %v4386_v59 = vpop.permute.xlu0 %4385  ;;  %v7597_v48 = vld [vmem:[%s9225_s11] sm:$0xff]  }
 0xdd6   :  { %v9077_v21 = vsub.f32 %v9027_v5, %v4386_v59  ;;  %v566_v5 = vld [vmem:[%s9229_s15] sm:$0xff]  ;;  %7111 = vmatprep.mubr.msk.bf16.mxu1 %vm574_vm2, %v7597_v48 }
 0xdd7   :  { %v4396_v14 = vmul.f32 %v9074_v6, %v9074_v6  ;;  %v1611_v1 = vmul.f32 %v7729_v47, %v566_v5  ;;  %v5068_v59 = vld [vmem:[%s9228_s14] sm:$0xff] }
 0xdd8   :  { %v4395_v61 = vmul.f32 %v9077_v21, %v9077_v21 }
 0xdd9   :  { %4399 = vadd.xlane.f32.xlu0 %v4396_v14 }
 0xdda   :  { %4397 = vadd.xlane.f32.xlu1 %v4395_v61 }
 0xdeb   :  { %1615 = vperm.xlu1 %7504, %v1611_v1  }
 0xdef   :  { %1620 = vperm.xlu0 %7503, %v1612_v15   ;;  %1627 = vperm.xlu1 %7504, %v568_v62  }
 0xdf3   :  { %1632 = vperm.xlu0 %7503, %v569_v57  }
 0xdf7   :  { %4930 = vperm.xlu0 %7503, %v6390_v32  }
 0xdfb   :  { %4952 = vperm.xlu0 %7503, %v4942_v34  }
 0xdff   :  { %4962 = vperm.xlu0 %7503, %v4944_v53  }
 0xe03   :  { %5077 = vperm.xlu0 %7503, %v5069_v11  }
 0xe66   :  { %v4400_v18 = vpop.xlane.xlu0 %4399 }
 0xe67   :  { %v4405_v36 = vand.u32 4294901760, %v4400_v18  ;;  %v4398_v16 = vpop.xlane.xlu1 %4397 }
 0xe68   :  { %v4402_v20 = vand.u32 4294901760, %v4398_v16 }
 0xe69   :  { %v4497_v31 = vsub.f32 %v4400_v18, %v4405_v36 }
 0xe6a   :  { %v7354_v44 = vpack.c.bf16 %v4405_v36, %v4402_v20  ;;  %v4490_v54 = vsub.f32 %v4398_v16, %v4402_v20 }
 0xe6b   :  { %v4498_v42 = vand.u32 4294901760, %v4497_v31  ;;  %v1616_v14 = vpop.permute.xlu1 %1615 }
 0xe6c   :  { %v4491_v0 = vand.u32 4294901760, %v4490_v54  ;;  %7355 = vmatprep.subr.bf16.mxu0 %v7354_v44  ;;  %v7362_v37 = vpack.c.bf16 %v4497_v31, %v4490_v54  ;;  %v1623_v2 = vmul.f32 %v1616_v14, %v8181_v12 }
 0xe6d   :  { %v4499_v49 = vsub.f32 %v4497_v31, %v4498_v42  ;;  %7357 = vmatpush3.bf16.msra.mxu0 %v7354_v44 }
 0xe6e   :  { %v4492_v58 = vsub.f32 %v4490_v54, %v4491_v0  ;;  %v7370_v9 = vpack.c.bf16 %v4498_v42, %v4491_v0  ;;  %v1621_v56 = vpop.permute.xlu0 %1620 }
 0xe6f   :  { %v4500_v4 = vand.u32 4294901760, %v4499_v49  ;;  %v1628_v39 = vpop.permute.xlu1 %1627  ;;  %v1624_v46 = vmul.f32 %v1621_v56, %v8178_v10 }
 0xe70   :  { %7070 = vmatmul.mubr.f32.vlgmr.msra.gmra.mrb[66].mxu0 %v8124_v43  ;;  %v4493_v28 = vand.u32 4294901760, %v4492_v58  ;;  %v1635_v32 = vadd.f32 %v1628_v39, %v1623_v2 }
 0xe71   :  { %7076 = vmatprep.mubr.f32.mxu0 %v8096_v22 }
 0xe72   :  { %v7358_v50 = vpack.c.bf16 %v4500_v4, %v4493_v28  ;;  %v1633_v61 = vpop.permute.xlu0 %1632 }
 0xe73   :  { %v1636_v34 = vadd.f32 %v1633_v61, %v1624_v46 }
 0xe74   :  { %7359 = vmatprep.subr.bf16.mxu0 %v7358_v50 }
 0xe75   :  { %7361 = vmatpush3.bf16.msra.mxu0 %v7358_v50 }
 0xe76   :  { %7363 = vmatprep.subr.bf16.mxu0 %v7362_v37  ;;  %v4931_v1 = vpop.permute.xlu0 %4930 }
 0xe78   :  { %7077 = vmatmul.mubr.f32.vlgmr.msra.gmra.mrb[66].mxu0 %v8114_v29 }
 0xe79   :  { %7365 = vmatpush3.bf16.msra.mxu0 %v7362_v37  ;;  %7083 = vmatprep.mubr.f32.mxu0 %v8099_v23 }
 0xe7a   :  { %7367 = vmatprep.subr.bf16.mxu0 %v7354_v44  ;;  %v4953_v12 = vpop.permute.xlu0 %4952 }
 0xe80   :  { %7084 = vmatmul.mubr.f32.vlgmr.msra.gmra.mrb[66].mxu0 %v8117_v30 }
 0xe81   :  { %7369 = vmatpush3.bf16.msra.mxu0 %v7354_v44  ;;  %7090 = vmatprep.mubr.f32.mxu0 %v8102_v24 }
 0xe82   :  { %7371 = vmatprep.subr.bf16.mxu0 %v7370_v9 }
 0xe88   :  { %7091 = vmatmul.mubr.f32.vlgmr.msra.gmra.mrb[66].mxu0 %v8120_v33 }
 0xe89   :  { %7373 = vmatpush3.bf16.msra.mxu0 %v7370_v9  ;;  %7097 = vmatprep.mubr.f32.mxu0 %v8096_v22 }
 0xe8a   :  { %7375 = vmatprep.subr.bf16.mxu0 %v7354_v44 }
 0xe90   :  { %7098 = vmatmul.mubr.f32.vlgmr.msra.gmra.mrb[66].mxu0 %v8114_v29 }
 0xe91   :  { %7377 = vmatpush3.bf16.msra.mxu0 %v7354_v44  ;;  %7104 = vmatprep.mubr.f32.mxu0 %v8096_v22  ;;  %v4963_v44 = vpop.permute.xlu0 %4962 }
 0xe98   :  { %7105 = vmatmul.mubr.f32.vlgmr.msra.gmra.mrb[66].mxu0 %v8114_v29 }
 0xe99   :  { %7131 = vmatprep.mubr.f32.mxu0 %v8106_v26 }
 0xf6b   :  { %v7106_v25 = vpop.f32.mrb[66].mxu0 }
 0xf6c   :  { %v4904_v45 = vmul.f32 0.00390625, %v7106_v25  ;;  %v4893_v51 = vpop.f32.mrb[67].mxu0 }
 0xf6d   :  { %v4903_v8 = vmul.f32 0.00390625, %v4893_v51 }
 0xf6e   :  { %v4906_v3 = vadd.f32 1e-05, %v4904_v45 }
 0xf6f   :  { %v4905_v60 = vadd.f32 1e-05, %v4903_v8 }
 0xf70   :  { %7732 = vrsqrt.f32 %v4906_v3 }
 0xf71   :  { %7734 = vrsqrt.f32 %v4905_v60  ;;  %v5078_v60 = vpop.permute.xlu0 %5077 }
 0xf7a   :  { %v7733_v63 = vpop.eup %7732 }
 0xf7b   :  { %v4910_v7 = vmul.f32 %v7733_v63, %v6388_v27  ;;  %v7735_v13 = vpop.eup %7734 }
 0xf7c   :  { %v4909_v41 = vmul.f32 %v7735_v13, %v6387_v55 }
 0xf7d   :  { %4918 = vperm.xlu1 %7504, %v4910_v7  }
 0xf81   :  { %4913 = vperm.xlu1 %7504, %v4909_v41  }
 0xf85   :  { %4925 = vperm.xlu1 %7504, %v6389_v35  }
 0xf89   :  { %4947 = vperm.xlu1 %7504, %v4941_v17  }
 0xf8d   :  { %4957 = vperm.xlu1 %7504, %v4943_v40  }
 0xf91   :  { %5072 = vperm.xlu1 %7504, %v5068_v59  }
 0xffc   :  { %v4919_v38 = vpop.permute.xlu1 %4918 }
 0xffd   :  { %v4922_v47 = vmul.f32 %v4919_v38, %v9074_v6  ;;  %v7598_v6 = vld [vmem:[%s9225_s11 + $0x8] sm:$0xff]  }
 0xfff   :  { %v4934_v62 = vadd.f32 %v4931_v1, %v4922_v47 }
0x1000   :  { %v4914_v5 = vpop.permute.xlu1 %4913 }
0x1001   :  { %v4921_v15 = vmul.f32 %v4914_v5, %v9077_v21  ;;  %v4936_v11 = vadd.f32 %v4934_v62, %v1636_v34 }
0x1004   :  { %v4926_v57 = vpop.permute.xlu1 %4925 }
0x1005   :  { %v4933_v53 = vadd.f32 %v4926_v57, %v4921_v15 }
0x1007   :  { %v4935_v18 = vadd.f32 %v4933_v53, %v1635_v32 }
0x1008   :  { %v4948_v10 = vpop.permute.xlu1 %4947 }
0x1009   :  { %v7378_v36 = vpack.c.bf16 %v4936_v11, %v4935_v18 }
0x100b   :  { %7379 = vmatprep.subr.bf16.mxu1 %v7378_v36 }
0x100c   :  { %7381 = vmatpush3.bf16.msra.mxu1 %v7378_v36  ;;  %v4958_v21 = vpop.permute.xlu1 %4957 }
0x100d   :  { %7382 = vmatprep.subr.bf16.mxu1 %v7785_v19 }
0x100f   :  { %7112 = vmatmul.mubr.msk.bf16.vlgmr.msra.gmra.mrb[40].mxu1 %vm574_vm2, %v7598_v6 }
0x1010   :  { %7123 = vmatprep.mubr.msk.bf16.mxu1 %vm7784_vm0, %v7783_v52  ;;  %v7599_v52 = vld [vmem:[%s9227_s13] sm:$0xff]   ;;  %v5073_v45 = vpop.permute.xlu1 %5072 }
0x10e2   :  { %v7113_v16 = vpop.f32.mrb[40].mxu1 }
0x10e3   :  { %v5056_v20 = vadd.f32 %v7113_v16, %v4958_v21  ;;  %v5047_v31 = vpop.f32.mrb[41].mxu1 }
0x10e4   :  { %v5048_v54 = vadd.f32 %v5047_v31, %v4948_v10  ;;  %v7114_v42 = vpop.f32.mrb[42].mxu1 }
0x10e5   :  { %v5059_v0 = vadd.f32 %v7114_v42, %v4963_v44  ;;  %v5050_v49 = vpop.f32.mrb[43].mxu1  ;;  %v5064_v4 = vmax.f32 %v5056_v20, 0.0 }
0x10e6   :  { %v5051_v58 = vadd.f32 %v5050_v49, %v4953_v12  ;;  %v5062_v50 = vmax.f32 %v5048_v54, 0.0 }
0x10e7   :  { %v5065_v28 = vmax.f32 %v5059_v0, 0.0 }
0x10e8   :  { %v5063_v37 = vmax.f32 %v5051_v58, 0.0 }
0x10e9   :  { %v7386_v9 = vpack.c.bf16 %v5065_v28, %v5064_v4 }
0x10ea   :  { %v7383_v25 = vpack.c.bf16 %v5063_v37, %v5062_v50 }
0x10ec   :  { %7384 = vmatpush3.bf16.msra.mxu1 %v7383_v25 }
0x10ed   :  { %7385 = vmatprep.subr.bf16.mxu1 %v7785_v19 }
0x10f0   :  { %7387 = vmatpush3.bf16.msra.mxu1 %v7386_v9  ;;  %v6397_v9 = vld [vmem:[%s9229_s15 + $0x20] sm:$0xff] }
0x10f3   :  { %7124 = vmatmul.mubr.msk.bf16.vlgmr.msra.gmra.mrb[44].mxu1 %vm5085_vm5, %v7599_v52 }
0x10f4   :  { %7173 = vmatprep.mubr.f32.mxu1 %v8106_v26 }
0x11c6   :  { %v5155_v51 = vpop.f32.mrb[44].mxu1 }
0x11c7   :  { %v5156_v8 = vadd.f32 %v5155_v51, %v5073_v45  ;;  %v7125_v3 = vpop.f32.mrb[45].mxu1  ;;  %v6399_v45 = vld [vmem:[%s9230_s16 + $0x20] sm:$0xff]  ;;  %v6400_v51 = vld [vmem:[%s9230_s16 + $0x28] sm:$0xff] }
0x11c8   :  { %v5158_v27 = vpop.f32.mrb[46].mxu1 }
0x11c9   :  { %v5162_v63 = vadd.f32 %v5156_v8, %v4935_v18  ;;  %v5159_v7 = vadd.f32 %v5158_v27, %v5078_v60  ;;  %v7126_v13 = vpop.f32.mrb[47].mxu1 }
0x11cb   :  { %v5163_v55 = vadd.f32 %v5159_v7, %v4936_v11  ;;  %5170 = vadd.xlane.f32.xlu1 %v5162_v63 }
0x11cd   :  { %5172 = vadd.xlane.f32.xlu0 %v5163_v55 }
0x1258   :  { %v5171_v19 = vpop.xlane.xlu1 %5170 }
0x1259   :  { %v5175_v41 = vand.u32 4294901760, %v5171_v19 }
0x125a   :  { %v5173_v35 = vpop.xlane.xlu0 %5172 }
0x125b   :  { %v5263_v17 = vsub.f32 %v5171_v19, %v5175_v41  ;;  %v5178_v40 = vand.u32 4294901760, %v5173_v35 }
0x125d   :  { %v5264_v48 = vand.u32 4294901760, %v5263_v17  ;;  %v7388_v59 = vpack.c.bf16 %v5178_v40, %v5175_v41  ;;  %v5270_v26 = vsub.f32 %v5173_v35, %v5178_v40 }
0x125f   :  { %v5265_v14 = vsub.f32 %v5263_v17, %v5264_v48  ;;  %v5271_v56 = vand.u32 4294901760, %v5270_v26  ;;  %7389 = vmatprep.subr.bf16.mxu0 %v7388_v59  ;;  %v7396_v5 = vpack.c.bf16 %v5270_v26, %v5263_v17 }
0x1260   :  { %7391 = vmatpush3.bf16.msra.mxu0 %v7388_v59 }
0x1261   :  { %v5272_v39 = vsub.f32 %v5270_v26, %v5271_v56  ;;  %v5266_v61 = vand.u32 4294901760, %v5265_v14  ;;  %v7404_v1 = vpack.c.bf16 %v5271_v56, %v5264_v48 }
0x1263   :  { %7132 = vmatmul.mubr.f32.vlgmr.msra.gmra.mrb[68].mxu0 %v8124_v43  ;;  %v5273_v38 = vand.u32 4294901760, %v5272_v39 }
0x1264   :  { %7138 = vmatprep.mubr.f32.mxu0 %v8096_v22 }
0x1265   :  { %v7392_v47 = vpack.c.bf16 %v5273_v38, %v5266_v61 }
0x1267   :  { %7393 = vmatprep.subr.bf16.mxu0 %v7392_v47 }
0x1268   :  { %7395 = vmatpush3.bf16.msra.mxu0 %v7392_v47 }
0x1269   :  { %7397 = vmatprep.subr.bf16.mxu0 %v7396_v5 }
0x126b   :  { %7139 = vmatmul.mubr.f32.vlgmr.msra.gmra.mrb[68].mxu0 %v8114_v29 }
0x126c   :  { %7399 = vmatpush3.bf16.msra.mxu0 %v7396_v5  ;;  %7145 = vmatprep.mubr.f32.mxu0 %v8099_v23 }
0x126d   :  { %7401 = vmatprep.subr.bf16.mxu0 %v7388_v59 }
0x1273   :  { %7146 = vmatmul.mubr.f32.vlgmr.msra.gmra.mrb[68].mxu0 %v8117_v30 }
0x1274   :  { %7403 = vmatpush3.bf16.msra.mxu0 %v7388_v59  ;;  %7152 = vmatprep.mubr.f32.mxu0 %v8102_v24 }
0x1275   :  { %7405 = vmatprep.subr.bf16.mxu0 %v7404_v1 }
0x127b   :  { %7153 = vmatmul.mubr.f32.vlgmr.msra.gmra.mrb[68].mxu0 %v8120_v33 }
0x127c   :  { %7407 = vmatpush3.bf16.msra.mxu0 %v7404_v1  ;;  %7159 = vmatprep.mubr.f32.mxu0 %v8096_v22 }
0x127d   :  { %7409 = vmatprep.subr.bf16.mxu0 %v7388_v59 }
0x1283   :  { %7160 = vmatmul.mubr.f32.vlgmr.msra.gmra.mrb[68].mxu0 %v8114_v29 }
0x1284   :  { %7411 = vmatpush3.bf16.msra.mxu0 %v7388_v59  ;;  %7166 = vmatprep.mubr.f32.mxu0 %v8096_v22 }
0x128b   :  { %7167 = vmatmul.mubr.f32.vlgmr.msra.gmra.mrb[68].mxu0 %v8114_v29 }
0x135e   :  { %v7168_v2 = vpop.f32.mrb[68].mxu0 }
0x135f   :  { %v5677_v46 = vmul.f32 0.00390625, %v7168_v2  ;;  %v5666_v62 = vpop.f32.mrb[69].mxu0 }
0x1360   :  { %v5676_v15 = vmul.f32 0.00390625, %v5666_v62 }
0x1361   :  { %5685 = vperm.xlu1 %7504, %v5677_v46  }
0x1362   :  { %5680 = vperm.xlu0 %7503, %v5676_v15  }
0x13e0   :  { %v5686_v57 = vpop.permute.xlu1 %5685 }
0x13e1   :  { %v9169_v32 = vsub.f32 %v5163_v55, %v5686_v57  ;;  %v5681_v34 = vpop.permute.xlu0 %5680 }
0x13e2   :  { %v9171_v53 = vsub.f32 %v5162_v63, %v5681_v34 }
0x13e3   :  { %v5691_v11 = vmul.f32 %v9169_v32, %v9169_v32 }
0x13e4   :  { %v5690_v18 = vmul.f32 %v9171_v53, %v9171_v53 }
0x13e5   :  { %5694 = vadd.xlane.f32.xlu0 %v5691_v11 }
0x13e6   :  { %5692 = vadd.xlane.f32.xlu1 %v5690_v18 }
0x1472   :  { %v5695_v36 = vpop.xlane.xlu0 %5694 }
0x1473   :  { %v5700_v6 = vand.u32 4294901760, %v5695_v36  ;;  %v5693_v10 = vpop.xlane.xlu1 %5692 }
0x1474   :  { %v5697_v12 = vand.u32 4294901760, %v5693_v10 }
0x1475   :  { %v5792_v21 = vsub.f32 %v5695_v36, %v5700_v6 }
0x1476   :  { %v7412_v16 = vpack.c.bf16 %v5700_v6, %v5697_v12  ;;  %v5785_v20 = vsub.f32 %v5693_v10, %v5697_v12 }
0x1477   :  { %v5793_v31 = vand.u32 4294901760, %v5792_v21 }
0x1478   :  { %v5786_v44 = vand.u32 4294901760, %v5785_v20  ;;  %7413 = vmatprep.subr.bf16.mxu1 %v7412_v16  ;;  %v7420_v4 = vpack.c.bf16 %v5792_v21, %v5785_v20 }
0x1479   :  { %v5794_v54 = vsub.f32 %v5792_v21, %v5793_v31  ;;  %7415 = vmatpush3.bf16.msra.mxu1 %v7412_v16 }
0x147a   :  { %v5787_v42 = vsub.f32 %v5785_v20, %v5786_v44  ;;  %v7428_v28 = vpack.c.bf16 %v5793_v31, %v5786_v44 }
0x147b   :  { %v5795_v0 = vand.u32 4294901760, %v5794_v54 }
0x147c   :  { %7174 = vmatmul.mubr.f32.vlgmr.msra.gmra.mrb[48].mxu1 %v8124_v43  ;;  %v5788_v49 = vand.u32 4294901760, %v5787_v42 }
0x147d   :  { %7180 = vmatprep.mubr.f32.mxu1 %v8096_v22 }
0x147e   :  { %v7416_v58 = vpack.c.bf16 %v5795_v0, %v5788_v49 }
0x1480   :  { %7417 = vmatprep.subr.bf16.mxu1 %v7416_v58 }
0x1481   :  { %7419 = vmatpush3.bf16.msra.mxu1 %v7416_v58 }
0x1482   :  { %7421 = vmatprep.subr.bf16.mxu1 %v7420_v4 }
0x1484   :  { %7181 = vmatmul.mubr.f32.vlgmr.msra.gmra.mrb[48].mxu1 %v8114_v29 }
0x1485   :  { %7423 = vmatpush3.bf16.msra.mxu1 %v7420_v4  ;;  %7187 = vmatprep.mubr.f32.mxu1 %v8099_v23 }
0x1486   :  { %7425 = vmatprep.subr.bf16.mxu1 %v7412_v16 }
0x148c   :  { %7188 = vmatmul.mubr.f32.vlgmr.msra.gmra.mrb[48].mxu1 %v8117_v30 }
0x148d   :  { %7427 = vmatpush3.bf16.msra.mxu1 %v7412_v16  ;;  %7194 = vmatprep.mubr.f32.mxu1 %v8102_v24 }
0x148e   :  { %7429 = vmatprep.subr.bf16.mxu1 %v7428_v28 }
0x1494   :  { %7195 = vmatmul.mubr.f32.vlgmr.msra.gmra.mrb[48].mxu1 %v8120_v33  ;;  %v6398_v33 = vld [vmem:[%s9229_s15 + $0x28] sm:$0xff]  ;;  %s7786_s15 = smov [#allocation2]  }
0x1495   :  { %7431 = vmatpush3.bf16.msra.mxu1 %v7428_v28  ;;  %7201 = vmatprep.mubr.f32.mxu1 %v8096_v22  ;;  %s6237_s9 = sshll.u32 %s7786_s15, 4  ;;  %s6238_s9 = int_to_ptr.vmem [resolvable:$true] %s6237_s9 }
0x1496   :  { %7433 = vmatprep.subr.bf16.mxu1 %v7412_v16  ;;  %s7758_s6 = scalar_lea.vmem %s6238_s9, 256  ;;  %p7763_p1 = scmp.lt.s32.totalorder %s6238_s9, %s6238_s9 }
0x1497   :  { %p7759_p0 = scmp.ne.s32.totalorder %s6238_s9, %s7758_s6  ;;  %p7764_p2 = scmp.lt.s32.totalorder %s7758_s6, %s7758_s6 }
0x1499   :  { %p7765_p3 = por %p7764_p2, %p7763_p1 }
0x149b   :  { %p7766_p4 = pnand %p7765_p3, %p7759_p0 }
0x149c   :  { %7202 = vmatmul.mubr.f32.vlgmr.msra.gmra.mrb[48].mxu1 %v8114_v29 }
0x149d   :  { %7435 = vmatpush3.bf16.msra.mxu1 %v7412_v16  ;;  %7208 = vmatprep.mubr.f32.mxu1 %v8096_v22 }
0x14a4   :  { %7209 = vmatmul.mubr.f32.vlgmr.msra.gmra.mrb[48].mxu1 %v8114_v29 }
0x1577   :  { %v7210_v23 = vpop.f32.mrb[48].mxu1 }
0x1578   :  { %v6199_v30 = vmul.f32 0.00390625, %v7210_v23  ;;  %v6188_v43 = vpop.f32.mrb[49].mxu1 }
0x1579   :  { %v6198_v50 = vmul.f32 0.00390625, %v6188_v43 }
0x157a   :  { %v6201_v37 = vadd.f32 1e-05, %v6199_v30 }
0x157b   :  { %v6200_v24 = vadd.f32 1e-05, %v6198_v50 }
0x157c   :  { %7736 = vrsqrt.f32 %v6201_v37 }
0x157d   :  { %7738 = vrsqrt.f32 %v6200_v24 }
0x1586   :  { %v7737_v25 = vpop.eup %7736 }
0x1587   :  { %v7739_v22 = vpop.eup %7738  ;;  %v6205_v52 = vmul.f32 %v7737_v25, %v6398_v33 }
0x1588   :  { %v6204_v29 = vmul.f32 %v7739_v22, %v6397_v9 }
0x1589   :  { %6213 = vperm.xlu1 %7504, %v6205_v52  }
0x158a   :  { %6208 = vperm.xlu0 %7503, %v6204_v29  }
0x158d   :  { %6220 = vperm.xlu1 %7504, %v6399_v45  }
0x158e   :  { %6225 = vperm.xlu0 %7503, %v6400_v51  }
0x1608   :  { %v6214_v8 = vpop.permute.xlu1 %6213 }
0x1609   :  { %v6209_v3 = vpop.permute.xlu0 %6208  ;;  %v6217_v27 = vmul.f32 %v6214_v8, %v9169_v32 }
0x160a   :  { %v6216_v60 = vmul.f32 %v6209_v3, %v9171_v53 }
0x160c   :  { %v6221_v63 = vpop.permute.xlu1 %6220 }
0x160d   :  { %v6228_v7 = vadd.f32 %v6221_v63, %v6216_v60  ;;  %v6226_v13 = vpop.permute.xlu0 %6225 }
0x160e   :  { %v6229_v55 = vadd.f32 %v6226_v13, %v6217_v27 }
0x160f   :  { %6230 = vst [vmem:[#allocation2] sm:$0xff] %v6228_v7 }
0x1610   :  { %6231 = vst [vmem:[#allocation2 + $0x8] sm:$0xff] %v6229_v55 }
0x1611   :  { %7769 = shalt.err (!%p7766_p4)
}
0x1612   :  { %s7770_s4 = scalar_lea.hbm %s9235_s21, 256 }
0x1613   :  { %p7771_p5 = scmp.ne.s32.totalorder %s9235_s21, %s7770_s4  ;;  %p7774_p6 = scmp.lt.u32.totalorder %s7770_s4, %s9235_s21 }
0x1615   :  { %p7776_p7 = pnand %p7774_p6, %p7771_p5 }
0x1617   :  { %7779 = shalt.err (!%p7776_p7)
}
0x1618   :  { %s7787_s5 = smov 128   ;;  %s7788_s22 = smov 8  }
0x1619   :  { %6243 = dma.vmem_to_hbm [thread:$0]  %s6238_s9, 256, %s9235_s21, [#allocation3], %s7787_s5, %s7787_s5, %s7788_s22  }
0x161a   :  { %7780 = dma.done.wait [#allocation3], 256  }
0x161b   :  { %7781 = vsyncadd [#allocation3], 4294967040 }
0x161c   :  { %6247 = vsyncpa [#allocation3], 1 }

</bundles_post_ra>
